<compile_context>
chip_gen: v7x
topology: tpu7x:2x2x1
jax: 0.10.0
libtpu: 0.0.40
codegen_flags: <defaults>
</compile_context>

<pallas_src>
import jax
import jax.numpy as jnp
from jax import lax
from jax.experimental import pallas as pl
from jax.experimental.pallas import tpu as pltpu

INPUT_SIZE = 28
HIDDEN_SIZE = 128
NUM_CLASSES = 10
NUM_LAYERS = 2
SUBLANE = 8  # f32 sublane count; batch is padded to a multiple of this


def _gates_to_hc(g, c_prev):
    """PyTorch LSTM gate order (i, f, g, o); all math in f32."""
    H = HIDDEN_SIZE
    i = jax.nn.sigmoid(g[:, 0:H])
    f = jax.nn.sigmoid(g[:, H:2 * H])
    gg = jnp.tanh(g[:, 2 * H:3 * H])
    o = jax.nn.sigmoid(g[:, 3 * H:4 * H])
    c_new = f * c_prev + i * gg
    h_new = o * jnp.tanh(c_new)
    return h_new, c_new


def lstm_fc_kernel(x_ref, wih1_ref, whh1_ref, b1_ref,
                   w2_ref, b2_ref, wfc_ref, bfc_ref,
                   out_ref, xg_ref):
    """Whole forward pass in one invocation (no grid).

    x_ref:   (T*B, INPUT_SIZE)  bf16, time-major rows (t major, b minor), B padded to 8
    wih1_t:  (INPUT_SIZE, 4H)   bf16   layer-0 input weights (transposed)
    whh1_t:  (H, 4H)            bf16   layer-0 recurrent weights (transposed)
    b1:      (1, 4H)            f32    layer-0 fused bias (b_ih + b_hh)
    w2_t:    (2H, 4H)           bf16   layer-1 [W_ih; W_hh] concatenated along K
    b2:      (1, 4H)            f32    layer-1 fused bias
    wfc_t:   (H, NUM_CLASSES)   bf16;  bfc: (1, NUM_CLASSES) f32
    out_ref: (B, NUM_CLASSES)   f32
    xg_ref:  (T*B, 4H)          f32 VMEM scratch for the hoisted input projection
    """
    TB = x_ref.shape[0]
    B = out_ref.shape[0]
    T = TB // B
    H = HIDDEN_SIZE

    # ---- hoisted input projection: one well-shaped MXU pass for all timesteps ----
    xg_ref[...] = (
        jnp.dot(x_ref[...], wih1_ref[...], preferred_element_type=jnp.float32)
        + b1_ref[...])

    # ---- hoisted weight loads / bias broadcast (not re-issued per iteration) ----
    whh1 = whh1_ref[...]                              # (H, 4H)  bf16
    w2 = w2_ref[...]                                  # (2H, 4H) bf16
    b2b = jnp.broadcast_to(b2_ref[...], (B, 4 * H))   # (B, 4H)  f32

    def step(t, carry):
        h1, c1, h2, c2 = carry
        start = pl.multiple_of(t * B, SUBLANE)
        # Layer 0: only the recurrent matmul remains inside the loop.
        g1 = xg_ref[pl.ds(start, B), :] + jnp.dot(
            h1.astype(jnp.bfloat16), whh1, preferred_element_type=jnp.float32)
        h1n, c1n = _gates_to_hc(g1, c1)
        # Layer 1: fused [x | h_prev] @ [W_ih; W_hh] -> single K=2H MXU pass.
        lhs2 = jnp.concatenate([h1n, h2], axis=1).astype(jnp.bfloat16)
        g2 = jnp.dot(lhs2, w2, preferred_element_type=jnp.float32) + b2b
        h2n, c2n = _gates_to_hc(g2, c2)
        return (h1n, c1n, h2n, c2n)

    zeros = jnp.zeros((B, H), jnp.float32)  # h0 / c0 are zeros, as in the module
    _, _, h2, _ = lax.fori_loop(0, T, step, (zeros, zeros, zeros, zeros),
                                unroll=True)

    # fc on the last time step's top-layer hidden state
    out_ref[...] = (
        jnp.dot(h2.astype(jnp.bfloat16), wfc_ref[...],
                preferred_element_type=jnp.float32)
        + bfc_ref[...])


def recurrent_neural_net(x, kparams):
    """x: (B, T, INPUT_SIZE) float32, batch-first like PyTorch."""
    B, T, In = x.shape
    assert In == INPUT_SIZE
    B_pad = max(SUBLANE, ((B + SUBLANE - 1) // SUBLANE) * SUBLANE)

    x_tm = jnp.transpose(x, (1, 0, 2)).astype(jnp.float32)      # (T, B, In)
    if B_pad != B:
        x_tm = jnp.pad(x_tm, ((0, 0), (0, B_pad - B), (0, 0)))  # pad batch to sublane group
    x_2d = x_tm.reshape(T * B_pad, In).astype(jnp.bfloat16)     # time-major rows

    vmem = pl.BlockSpec(memory_space=pltpu.MemorySpace.VMEM)
    out = pl.pallas_call(
        lstm_fc_kernel,
        out_shape=jax.ShapeDtypeStruct((B_pad, NUM_CLASSES), jnp.float32),
        in_specs=[vmem] * 8,
        out_specs=vmem,
        scratch_shapes=[pltpu.VMEM((T * B_pad, 4 * HIDDEN_SIZE), jnp.float32)],
    )(x_2d,
      kparams["wih1_t"], kparams["whh1_t"], kparams["b1"],
      kparams["w2_t"], kparams["b2"],
      kparams["wfc_t"], kparams["bfc"])
    return out[:B]


def init_params(key):
    """f32 master params mimicking PyTorch's U(-1/sqrt(H), 1/sqrt(H)) init."""
    H = HIDDEN_SIZE
    bound = 1.0 / (H ** 0.5)
    keys = jax.random.split(key, 10)

    def u(k_, shape):
        return jax.random.uniform(k_, shape, jnp.float32, -bound, bound)

    wih1 = u(keys[0], (4 * H, INPUT_SIZE))   # weight_ih_l0
    whh1 = u(keys[1], (4 * H, H))            # weight_hh_l0
    bih1 = u(keys[2], (4 * H,))
    bhh1 = u(keys[3], (4 * H,))
    wih2 = u(keys[4], (4 * H, H))            # weight_ih_l1
    whh2 = u(keys[5], (4 * H, H))            # weight_hh_l1
    bih2 = u(keys[6], (4 * H,))
    bhh2 = u(keys[7], (4 * H,))
    wfc = u(keys[8], (NUM_CLASSES, H))       # fc.weight
    bfc = u(keys[9], (NUM_CLASSES,))         # fc.bias

    return {
        "wih1_t": wih1.T, "whh1_t": whh1.T, "b1": (bih1 + bhh1)[None, :],
        "wih2_t": wih2.T, "whh2_t": whh2.T, "b2": (bih2 + bhh2)[None, :],
        "wfc_t": wfc.T, "bfc": bfc[None, :],
    }


def pack_kernel_params(p):
    """Kernel-ready params: bf16 MXU operands, layer-1 [W_ih; W_hh] fused along K."""
    return {
        "wih1_t": p["wih1_t"].astype(jnp.bfloat16),
        "whh1_t": p["whh1_t"].astype(jnp.bfloat16),
        "b1": p["b1"],
        "w2_t": jnp.concatenate([p["wih2_t"], p["whh2_t"]],
                                axis=0).astype(jnp.bfloat16),
        "b2": p["b2"],
        "wfc_t": p["wfc_t"].astype(jnp.bfloat16),
        "bfc": p["bfc"],
    }


def reference_forward(x, params):
    """Pure-JAX f32 reference matching PyTorch nn.LSTM semantics (validation)."""
    H = HIDDEN_SIZE
    B = x.shape[0]

    def cell(x_t, h, c, wih_t, whh_t, b):
        g = x_t @ wih_t + h @ whh_t + b
        i = jax.nn.sigmoid(g[:, 0:H])
        f = jax.nn.sigmoid(g[:, H:2 * H])
        gg = jnp.tanh(g[:, 2 * H:3 * H])
        o = jax.nn.sigmoid(g[:, 3 * H:4 * H])
        c_new = f * c + i * gg
        return o * jnp.tanh(c_new), c_new

    def scan_fn(carry, x_t):
        h1, c1, h2, c2 = carry
        h1, c1 = cell(x_t, h1, c1, params["wih1_t"], params["whh1_t"], params["b1"])
        h2, c2 = cell(h1, h2, c2, params["wih2_t"], params["whh2_t"], params["b2"])
        return (h1, c1, h2, c2), None

    z = jnp.zeros((B, H), jnp.float32)
    (_, _, h2, _), _ = lax.scan(scan_fn, (z, z, z, z),
                                jnp.transpose(x, (1, 0, 2)))
    return h2 @ params["wfc_t"] + params["bfc"]


if __name__ == "__main__":
    key = jax.random.PRNGKey(0)
    k_x, k_p = jax.random.split(key)

    B, T = 2, 8  # small batch, short sequence of 28-dim rows (MNIST-row style)
    x = jax.random.normal(k_x, (B, T, INPUT_SIZE), jnp.float32)
    params = init_params(k_p)
    kparams = pack_kernel_params(params)

    out = jax.block_until_ready(recurrent_neural_net(x, kparams))
    ref = reference_forward(x, params)

    assert out.shape == (B, NUM_CLASSES)
    max_err = float(jnp.max(jnp.abs(out - ref)))
    # bf16 MXU operands (f32 accumulate / gates) => relaxed tolerance vs f32 reference.
    assert jnp.allclose(out, ref, atol=3e-2, rtol=3e-2), \
        f"mismatch vs reference, max|diff|={max_err:.3e}"

    print("KERNEL_OK")
</pallas_src>

<mosaic_0001>
module attributes {stable_mosaic.version = 11 : i64} {
  func.func @lstm_fc_kernel(%arg0: memref<64x28xbf16, #tpu.memory_space<vmem>>, %arg1: memref<28x512xbf16, #tpu.memory_space<vmem>>, %arg2: memref<128x512xbf16, #tpu.memory_space<vmem>>, %arg3: memref<1x512xf32, #tpu.memory_space<vmem>>, %arg4: memref<256x512xbf16, #tpu.memory_space<vmem>>, %arg5: memref<1x512xf32, #tpu.memory_space<vmem>>, %arg6: memref<128x10xbf16, #tpu.memory_space<vmem>>, %arg7: memref<1x10xf32, #tpu.memory_space<vmem>>, %arg8: memref<8x10xf32, #tpu.memory_space<vmem>>, %arg9: memref<64x512xf32, #tpu.memory_space<vmem>>) attributes {dimension_semantics = [], scalar_prefetch = 0 : i64, scratch_operands = 1 : i64, tpu.core_type = #tpu.core_type<tc>} {
    %c0 = arith.constant 0 : index
    %c0_0 = arith.constant 0 : index
    %0 = vector.load %arg0[%c0, %c0_0] : memref<64x28xbf16, #tpu.memory_space<vmem>>, vector<64x28xbf16>
    %c0_1 = arith.constant 0 : index
    %c0_2 = arith.constant 0 : index
    %1 = vector.load %arg1[%c0_1, %c0_2] : memref<28x512xbf16, #tpu.memory_space<vmem>>, vector<28x512xbf16>
    %cst = arith.constant dense<0.000000e+00> : vector<64x512xf32>
    %2 = tpu.matmul %0, %1, %cst {dimension_numbers = #tpu.dot_dimension_numbers<[1], [0], [0], [1], [0, 0, 1, 1], [], []>} : vector<64x28xbf16>, vector<28x512xbf16>, vector<64x512xf32> -> vector<64x512xf32>
    %c0_3 = arith.constant 0 : index
    %c0_4 = arith.constant 0 : index
    %3 = vector.load %arg3[%c0_3, %c0_4] : memref<1x512xf32, #tpu.memory_space<vmem>>, vector<1x512xf32>
    %4 = vector.broadcast %3 : vector<1x512xf32> to vector<64x512xf32>
    %5 = arith.addf %2, %4 : vector<64x512xf32>
    %c0_5 = arith.constant 0 : index
    %c0_6 = arith.constant 0 : index
    %6 = vector.load %arg9[%c0_5, %c0_6] : memref<64x512xf32, #tpu.memory_space<vmem>>, vector<64x512xf32>
    tpu.vector_store %arg9[%c0_5, %c0_6], %5 {strides = array<i32>} : memref<64x512xf32, #tpu.memory_space<vmem>>, vector<64x512xf32>,
    %c0_7 = arith.constant 0 : index
    %c0_8 = arith.constant 0 : index
    %7 = vector.load %arg2[%c0_7, %c0_8] : memref<128x512xbf16, #tpu.memory_space<vmem>>, vector<128x512xbf16>
    %c0_9 = arith.constant 0 : index
    %c0_10 = arith.constant 0 : index
    %8 = vector.load %arg4[%c0_9, %c0_10] : memref<256x512xbf16, #tpu.memory_space<vmem>>, vector<256x512xbf16>
    %c0_11 = arith.constant 0 : index
    %c0_12 = arith.constant 0 : index
    %9 = vector.load %arg5[%c0_11, %c0_12] : memref<1x512xf32, #tpu.memory_space<vmem>>, vector<1x512xf32>
    %10 = vector.shape_cast %9 : vector<1x512xf32> to vector<1x512xf32>
    %11 = vector.broadcast %10 : vector<1x512xf32> to vector<8x512xf32>
    %cst_13 = arith.constant 0.000000e+00 : f32
    %12 = vector.broadcast %cst_13 : f32 to vector<8x128xf32>
    %c0_i32 = arith.constant 0 : i32
    %c8_i32 = arith.constant 8 : i32
    %13 = arith.muli %c0_i32, %c8_i32 : i32
    %14 = tpu.assume_multiple %13, 8 : i32
    %15 = arith.index_cast %14 : i32 to index
    %c0_14 = arith.constant 0 : index
    %16 = vector.load %arg9[%15, %c0_14] : memref<64x512xf32, #tpu.memory_space<vmem>>, vector<8x512xf32>
    %17 = arith.truncf %12 : vector<8x128xf32> to vector<8x128xbf16>
    %cst_15 = arith.constant dense<0.000000e+00> : vector<8x512xf32>
    %18 = tpu.matmul %17, %7, %cst_15 {dimension_numbers = #tpu.dot_dimension_numbers<[1], [0], [0], [1], [0, 0, 1, 1], [], []>} : vector<8x128xbf16>, vector<128x512xbf16>, vector<8x512xf32> -> vector<8x512xf32>
    %19 = arith.addf %16, %18 : vector<8x512xf32>
    %20 = vector.extract_strided_slice %19 {offsets = [0, 0], sizes = [8, 128], strides = [1, 1]} : vector<8x512xf32> to vector<8x128xf32>
    %21 = arith.negf %20 : vector<8x128xf32>
    %22 = math.exp %21 : vector<8x128xf32>
    %cst_16 = arith.constant 1.000000e+00 : f32
    %23 = vector.broadcast %cst_16 : f32 to vector<8x128xf32>
    %24 = arith.addf %23, %22 : vector<8x128xf32>
    %25 = arith.divf %23, %24 : vector<8x128xf32>
    %26 = vector.extract_strided_slice %19 {offsets = [0, 128], sizes = [8, 128], strides = [1, 1]} : vector<8x512xf32> to vector<8x128xf32>
    %27 = arith.negf %26 : vector<8x128xf32>
    %28 = math.exp %27 : vector<8x128xf32>
    %cst_17 = arith.constant 1.000000e+00 : f32
    %29 = vector.broadcast %cst_17 : f32 to vector<8x128xf32>
    %30 = arith.addf %29, %28 : vector<8x128xf32>
    %31 = arith.divf %29, %30 : vector<8x128xf32>
    %32 = vector.extract_strided_slice %19 {offsets = [0, 256], sizes = [8, 128], strides = [1, 1]} : vector<8x512xf32> to vector<8x128xf32>
    %33 = math.tanh %32 : vector<8x128xf32>
    %34 = vector.extract_strided_slice %19 {offsets = [0, 384], sizes = [8, 128], strides = [1, 1]} : vector<8x512xf32> to vector<8x128xf32>
    %35 = arith.negf %34 : vector<8x128xf32>
    %36 = math.exp %35 : vector<8x128xf32>
    %cst_18 = arith.constant 1.000000e+00 : f32
    %37 = vector.broadcast %cst_18 : f32 to vector<8x128xf32>
    %38 = arith.addf %37, %36 : vector<8x128xf32>
    %39 = arith.divf %37, %38 : vector<8x128xf32>
    %40 = arith.mulf %31, %12 : vector<8x128xf32>
    %41 = arith.mulf %25, %33 : vector<8x128xf32>
    %42 = arith.addf %40, %41 : vector<8x128xf32>
    %43 = math.tanh %42 : vector<8x128xf32>
    %44 = arith.mulf %39, %43 : vector<8x128xf32>
    %45 = tpu.concatenate %44, %12 in 1 : vector<8x128xf32>, vector<8x128xf32> -> vector<8x256xf32>
    %46 = arith.truncf %45 : vector<8x256xf32> to vector<8x256xbf16>
    %cst_19 = arith.constant dense<0.000000e+00> : vector<8x512xf32>
    %47 = tpu.matmul %46, %8, %cst_19 {dimension_numbers = #tpu.dot_dimension_numbers<[1], [0], [0], [1], [0, 0, 1, 1], [], []>} : vector<8x256xbf16>, vector<256x512xbf16>, vector<8x512xf32> -> vector<8x512xf32>
    %48 = arith.addf %47, %11 : vector<8x512xf32>
    %49 = vector.extract_strided_slice %48 {offsets = [0, 0], sizes = [8, 128], strides = [1, 1]} : vector<8x512xf32> to vector<8x128xf32>
    %50 = arith.negf %49 : vector<8x128xf32>
    %51 = math.exp %50 : vector<8x128xf32>
    %cst_20 = arith.constant 1.000000e+00 : f32
    %52 = vector.broadcast %cst_20 : f32 to vector<8x128xf32>
    %53 = arith.addf %52, %51 : vector<8x128xf32>
    %54 = arith.divf %52, %53 : vector<8x128xf32>
    %55 = vector.extract_strided_slice %48 {offsets = [0, 128], sizes = [8, 128], strides = [1, 1]} : vector<8x512xf32> to vector<8x128xf32>
    %56 = arith.negf %55 : vector<8x128xf32>
    %57 = math.exp %56 : vector<8x128xf32>
    %cst_21 = arith.constant 1.000000e+00 : f32
    %58 = vector.broadcast %cst_21 : f32 to vector<8x128xf32>
    %59 = arith.addf %58, %57 : vector<8x128xf32>
    %60 = arith.divf %58, %59 : vector<8x128xf32>
    %61 = vector.extract_strided_slice %48 {offsets = [0, 256], sizes = [8, 128], strides = [1, 1]} : vector<8x512xf32> to vector<8x128xf32>
    %62 = math.tanh %61 : vector<8x128xf32>
    %63 = vector.extract_strided_slice %48 {offsets = [0, 384], sizes = [8, 128], strides = [1, 1]} : vector<8x512xf32> to vector<8x128xf32>
    %64 = arith.negf %63 : vector<8x128xf32>
    %65 = math.exp %64 : vector<8x128xf32>
    %cst_22 = arith.constant 1.000000e+00 : f32
    %66 = vector.broadcast %cst_22 : f32 to vector<8x128xf32>
    %67 = arith.addf %66, %65 : vector<8x128xf32>
    %68 = arith.divf %66, %67 : vector<8x128xf32>
    %69 = arith.mulf %60, %12 : vector<8x128xf32>
    %70 = arith.mulf %54, %62 : vector<8x128xf32>
    %71 = arith.addf %69, %70 : vector<8x128xf32>
    %72 = math.tanh %71 : vector<8x128xf32>
    %73 = arith.mulf %68, %72 : vector<8x128xf32>
    %c1_i32 = arith.constant 1 : i32
    %c8_i32_23 = arith.constant 8 : i32
    %74 = arith.muli %c1_i32, %c8_i32_23 : i32
    %75 = tpu.assume_multiple %74, 8 : i32
    %76 = arith.index_cast %75 : i32 to index
    %c0_24 = arith.constant 0 : index
    %77 = vector.load %arg9[%76, %c0_24] : memref<64x512xf32, #tpu.memory_space<vmem>>, vector<8x512xf32>
    %78 = arith.truncf %44 : vector<8x128xf32> to vector<8x128xbf16>
    %cst_25 = arith.constant dense<0.000000e+00> : vector<8x512xf32>
    %79 = tpu.matmul %78, %7, %cst_25 {dimension_numbers = #tpu.dot_dimension_numbers<[1], [0], [0], [1], [0, 0, 1, 1], [], []>} : vector<8x128xbf16>, vector<128x512xbf16>, vector<8x512xf32> -> vector<8x512xf32>
    %80 = arith.addf %77, %79 : vector<8x512xf32>
    %81 = vector.extract_strided_slice %80 {offsets = [0, 0], sizes = [8, 128], strides = [1, 1]} : vector<8x512xf32> to vector<8x128xf32>
    %82 = arith.negf %81 : vector<8x128xf32>
    %83 = math.exp %82 : vector<8x128xf32>
    %cst_26 = arith.constant 1.000000e+00 : f32
    %84 = vector.broadcast %cst_26 : f32 to vector<8x128xf32>
    %85 = arith.addf %84, %83 : vector<8x128xf32>
    %86 = arith.divf %84, %85 : vector<8x128xf32>
    %87 = vector.extract_strided_slice %80 {offsets = [0, 128], sizes = [8, 128], strides = [1, 1]} : vector<8x512xf32> to vector<8x128xf32>
    %88 = arith.negf %87 : vector<8x128xf32>
    %89 = math.exp %88 : vector<8x128xf32>
    %cst_27 = arith.constant 1.000000e+00 : f32
    %90 = vector.broadcast %cst_27 : f32 to vector<8x128xf32>
    %91 = arith.addf %90, %89 : vector<8x128xf32>
    %92 = arith.divf %90, %91 : vector<8x128xf32>
    %93 = vector.extract_strided_slice %80 {offsets = [0, 256], sizes = [8, 128], strides = [1, 1]} : vector<8x512xf32> to vector<8x128xf32>
    %94 = math.tanh %93 : vector<8x128xf32>
    %95 = vector.extract_strided_slice %80 {offsets = [0, 384], sizes = [8, 128], strides = [1, 1]} : vector<8x512xf32> to vector<8x128xf32>
    %96 = arith.negf %95 : vector<8x128xf32>
    %97 = math.exp %96 : vector<8x128xf32>
    %cst_28 = arith.constant 1.000000e+00 : f32
    %98 = vector.broadcast %cst_28 : f32 to vector<8x128xf32>
    %99 = arith.addf %98, %97 : vector<8x128xf32>
    %100 = arith.divf %98, %99 : vector<8x128xf32>
    %101 = arith.mulf %92, %42 : vector<8x128xf32>
    %102 = arith.mulf %86, %94 : vector<8x128xf32>
    %103 = arith.addf %101, %102 : vector<8x128xf32>
    %104 = math.tanh %103 : vector<8x128xf32>
    %105 = arith.mulf %100, %104 : vector<8x128xf32>
    %106 = tpu.concatenate %105, %73 in 1 : vector<8x128xf32>, vector<8x128xf32> -> vector<8x256xf32>
    %107 = arith.truncf %106 : vector<8x256xf32> to vector<8x256xbf16>
    %cst_29 = arith.constant dense<0.000000e+00> : vector<8x512xf32>
    %108 = tpu.matmul %107, %8, %cst_29 {dimension_numbers = #tpu.dot_dimension_numbers<[1], [0], [0], [1], [0, 0, 1, 1], [], []>} : vector<8x256xbf16>, vector<256x512xbf16>, vector<8x512xf32> -> vector<8x512xf32>
    %109 = arith.addf %108, %11 : vector<8x512xf32>
    %110 = vector.extract_strided_slice %109 {offsets = [0, 0], sizes = [8, 128], strides = [1, 1]} : vector<8x512xf32> to vector<8x128xf32>
    %111 = arith.negf %110 : vector<8x128xf32>
    %112 = math.exp %111 : vector<8x128xf32>
    %cst_30 = arith.constant 1.000000e+00 : f32
    %113 = vector.broadcast %cst_30 : f32 to vector<8x128xf32>
    %114 = arith.addf %113, %112 : vector<8x128xf32>
    %115 = arith.divf %113, %114 : vector<8x128xf32>
    %116 = vector.extract_strided_slice %109 {offsets = [0, 128], sizes = [8, 128], strides = [1, 1]} : vector<8x512xf32> to vector<8x128xf32>
    %117 = arith.negf %116 : vector<8x128xf32>
    %118 = math.exp %117 : vector<8x128xf32>
    %cst_31 = arith.constant 1.000000e+00 : f32
    %119 = vector.broadcast %cst_31 : f32 to vector<8x128xf32>
    %120 = arith.addf %119, %118 : vector<8x128xf32>
    %121 = arith.divf %119, %120 : vector<8x128xf32>
    %122 = vector.extract_strided_slice %109 {offsets = [0, 256], sizes = [8, 128], strides = [1, 1]} : vector<8x512xf32> to vector<8x128xf32>
    %123 = math.tanh %122 : vector<8x128xf32>
    %124 = vector.extract_strided_slice %109 {offsets = [0, 384], sizes = [8, 128], strides = [1, 1]} : vector<8x512xf32> to vector<8x128xf32>
    %125 = arith.negf %124 : vector<8x128xf32>
    %126 = math.exp %125 : vector<8x128xf32>
    %cst_32 = arith.constant 1.000000e+00 : f32
    %127 = vector.broadcast %cst_32 : f32 to vector<8x128xf32>
    %128 = arith.addf %127, %126 : vector<8x128xf32>
    %129 = arith.divf %127, %128 : vector<8x128xf32>
    %130 = arith.mulf %121, %71 : vector<8x128xf32>
    %131 = arith.mulf %115, %123 : vector<8x128xf32>
    %132 = arith.addf %130, %131 : vector<8x128xf32>
    %133 = math.tanh %132 : vector<8x128xf32>
    %134 = arith.mulf %129, %133 : vector<8x128xf32>
    %c2_i32 = arith.constant 2 : i32
    %c8_i32_33 = arith.constant 8 : i32
    %135 = arith.muli %c2_i32, %c8_i32_33 : i32
    %136 = tpu.assume_multiple %135, 8 : i32
    %137 = arith.index_cast %136 : i32 to index
    %c0_34 = arith.constant 0 : index
    %138 = vector.load %arg9[%137, %c0_34] : memref<64x512xf32, #tpu.memory_space<vmem>>, vector<8x512xf32>
    %139 = arith.truncf %105 : vector<8x128xf32> to vector<8x128xbf16>
    %cst_35 = arith.constant dense<0.000000e+00> : vector<8x512xf32>
    %140 = tpu.matmul %139, %7, %cst_35 {dimension_numbers = #tpu.dot_dimension_numbers<[1], [0], [0], [1], [0, 0, 1, 1], [], []>} : vector<8x128xbf16>, vector<128x512xbf16>, vector<8x512xf32> -> vector<8x512xf32>
    %141 = arith.addf %138, %140 : vector<8x512xf32>
    %142 = vector.extract_strided_slice %141 {offsets = [0, 0], sizes = [8, 128], strides = [1, 1]} : vector<8x512xf32> to vector<8x128xf32>
    %143 = arith.negf %142 : vector<8x128xf32>
    %144 = math.exp %143 : vector<8x128xf32>
    %cst_36 = arith.constant 1.000000e+00 : f32
    %145 = vector.broadcast %cst_36 : f32 to vector<8x128xf32>
    %146 = arith.addf %145, %144 : vector<8x128xf32>
    %147 = arith.divf %145, %146 : vector<8x128xf32>
    %148 = vector.extract_strided_slice %141 {offsets = [0, 128], sizes = [8, 128], strides = [1, 1]} : vector<8x512xf32> to vector<8x128xf32>
    %149 = arith.negf %148 : vector<8x128xf32>
    %150 = math.exp %149 : vector<8x128xf32>
    %cst_37 = arith.constant 1.000000e+00 : f32
    %151 = vector.broadcast %cst_37 : f32 to vector<8x128xf32>
    %152 = arith.addf %151, %150 : vector<8x128xf32>
    %153 = arith.divf %151, %152 : vector<8x128xf32>
    %154 = vector.extract_strided_slice %141 {offsets = [0, 256], sizes = [8, 128], strides = [1, 1]} : vector<8x512xf32> to vector<8x128xf32>
    %155 = math.tanh %154 : vector<8x128xf32>
    %156 = vector.extract_strided_slice %141 {offsets = [0, 384], sizes = [8, 128], strides = [1, 1]} : vector<8x512xf32> to vector<8x128xf32>
    %157 = arith.negf %156 : vector<8x128xf32>
    %158 = math.exp %157 : vector<8x128xf32>
    %cst_38 = arith.constant 1.000000e+00 : f32
    %159 = vector.broadcast %cst_38 : f32 to vector<8x128xf32>
    %160 = arith.addf %159, %158 : vector<8x128xf32>
    %161 = arith.divf %159, %160 : vector<8x128xf32>
    %162 = arith.mulf %153, %103 : vector<8x128xf32>
    %163 = arith.mulf %147, %155 : vector<8x128xf32>
    %164 = arith.addf %162, %163 : vector<8x128xf32>
    %165 = math.tanh %164 : vector<8x128xf32>
    %166 = arith.mulf %161, %165 : vector<8x128xf32>
    %167 = tpu.concatenate %166, %134 in 1 : vector<8x128xf32>, vector<8x128xf32> -> vector<8x256xf32>
    %168 = arith.truncf %167 : vector<8x256xf32> to vector<8x256xbf16>
    %cst_39 = arith.constant dense<0.000000e+00> : vector<8x512xf32>
    %169 = tpu.matmul %168, %8, %cst_39 {dimension_numbers = #tpu.dot_dimension_numbers<[1], [0], [0], [1], [0, 0, 1, 1], [], []>} : vector<8x256xbf16>, vector<256x512xbf16>, vector<8x512xf32> -> vector<8x512xf32>
    %170 = arith.addf %169, %11 : vector<8x512xf32>
    %171 = vector.extract_strided_slice %170 {offsets = [0, 0], sizes = [8, 128], strides = [1, 1]} : vector<8x512xf32> to vector<8x128xf32>
    %172 = arith.negf %171 : vector<8x128xf32>
    %173 = math.exp %172 : vector<8x128xf32>
    %cst_40 = arith.constant 1.000000e+00 : f32
    %174 = vector.broadcast %cst_40 : f32 to vector<8x128xf32>
    %175 = arith.addf %174, %173 : vector<8x128xf32>
    %176 = arith.divf %174, %175 : vector<8x128xf32>
    %177 = vector.extract_strided_slice %170 {offsets = [0, 128], sizes = [8, 128], strides = [1, 1]} : vector<8x512xf32> to vector<8x128xf32>
    %178 = arith.negf %177 : vector<8x128xf32>
    %179 = math.exp %178 : vector<8x128xf32>
    %cst_41 = arith.constant 1.000000e+00 : f32
    %180 = vector.broadcast %cst_41 : f32 to vector<8x128xf32>
    %181 = arith.addf %180, %179 : vector<8x128xf32>
    %182 = arith.divf %180, %181 : vector<8x128xf32>
    %183 = vector.extract_strided_slice %170 {offsets = [0, 256], sizes = [8, 128], strides = [1, 1]} : vector<8x512xf32> to vector<8x128xf32>
    %184 = math.tanh %183 : vector<8x128xf32>
    %185 = vector.extract_strided_slice %170 {offsets = [0, 384], sizes = [8, 128], strides = [1, 1]} : vector<8x512xf32> to vector<8x128xf32>
    %186 = arith.negf %185 : vector<8x128xf32>
    %187 = math.exp %186 : vector<8x128xf32>
    %cst_42 = arith.constant 1.000000e+00 : f32
    %188 = vector.broadcast %cst_42 : f32 to vector<8x128xf32>
    %189 = arith.addf %188, %187 : vector<8x128xf32>
    %190 = arith.divf %188, %189 : vector<8x128xf32>
    %191 = arith.mulf %182, %132 : vector<8x128xf32>
    %192 = arith.mulf %176, %184 : vector<8x128xf32>
    %193 = arith.addf %191, %192 : vector<8x128xf32>
    %194 = math.tanh %193 : vector<8x128xf32>
    %195 = arith.mulf %190, %194 : vector<8x128xf32>
    %c3_i32 = arith.constant 3 : i32
    %c8_i32_43 = arith.constant 8 : i32
    %196 = arith.muli %c3_i32, %c8_i32_43 : i32
    %197 = tpu.assume_multiple %196, 8 : i32
    %198 = arith.index_cast %197 : i32 to index
    %c0_44 = arith.constant 0 : index
    %199 = vector.load %arg9[%198, %c0_44] : memref<64x512xf32, #tpu.memory_space<vmem>>, vector<8x512xf32>
    %200 = arith.truncf %166 : vector<8x128xf32> to vector<8x128xbf16>
    %cst_45 = arith.constant dense<0.000000e+00> : vector<8x512xf32>
    %201 = tpu.matmul %200, %7, %cst_45 {dimension_numbers = #tpu.dot_dimension_numbers<[1], [0], [0], [1], [0, 0, 1, 1], [], []>} : vector<8x128xbf16>, vector<128x512xbf16>, vector<8x512xf32> -> vector<8x512xf32>
    %202 = arith.addf %199, %201 : vector<8x512xf32>
    %203 = vector.extract_strided_slice %202 {offsets = [0, 0], sizes = [8, 128], strides = [1, 1]} : vector<8x512xf32> to vector<8x128xf32>
    %204 = arith.negf %203 : vector<8x128xf32>
    %205 = math.exp %204 : vector<8x128xf32>
    %cst_46 = arith.constant 1.000000e+00 : f32
    %206 = vector.broadcast %cst_46 : f32 to vector<8x128xf32>
    %207 = arith.addf %206, %205 : vector<8x128xf32>
    %208 = arith.divf %206, %207 : vector<8x128xf32>
    %209 = vector.extract_strided_slice %202 {offsets = [0, 128], sizes = [8, 128], strides = [1, 1]} : vector<8x512xf32> to vector<8x128xf32>
    %210 = arith.negf %209 : vector<8x128xf32>
    %211 = math.exp %210 : vector<8x128xf32>
    %cst_47 = arith.constant 1.000000e+00 : f32
    %212 = vector.broadcast %cst_47 : f32 to vector<8x128xf32>
    %213 = arith.addf %212, %211 : vector<8x128xf32>
    %214 = arith.divf %212, %213 : vector<8x128xf32>
    %215 = vector.extract_strided_slice %202 {offsets = [0, 256], sizes = [8, 128], strides = [1, 1]} : vector<8x512xf32> to vector<8x128xf32>
    %216 = math.tanh %215 : vector<8x128xf32>
    %217 = vector.extract_strided_slice %202 {offsets = [0, 384], sizes = [8, 128], strides = [1, 1]} : vector<8x512xf32> to vector<8x128xf32>
    %218 = arith.negf %217 : vector<8x128xf32>
    %219 = math.exp %218 : vector<8x128xf32>
    %cst_48 = arith.constant 1.000000e+00 : f32
    %220 = vector.broadcast %cst_48 : f32 to vector<8x128xf32>
    %221 = arith.addf %220, %219 : vector<8x128xf32>
    %222 = arith.divf %220, %221 : vector<8x128xf32>
    %223 = arith.mulf %214, %164 : vector<8x128xf32>
    %224 = arith.mulf %208, %216 : vector<8x128xf32>
    %225 = arith.addf %223, %224 : vector<8x128xf32>
    %226 = math.tanh %225 : vector<8x128xf32>
    %227 = arith.mulf %222, %226 : vector<8x128xf32>
    %228 = tpu.concatenate %227, %195 in 1 : vector<8x128xf32>, vector<8x128xf32> -> vector<8x256xf32>
    %229 = arith.truncf %228 : vector<8x256xf32> to vector<8x256xbf16>
    %cst_49 = arith.constant dense<0.000000e+00> : vector<8x512xf32>
    %230 = tpu.matmul %229, %8, %cst_49 {dimension_numbers = #tpu.dot_dimension_numbers<[1], [0], [0], [1], [0, 0, 1, 1], [], []>} : vector<8x256xbf16>, vector<256x512xbf16>, vector<8x512xf32> -> vector<8x512xf32>
    %231 = arith.addf %230, %11 : vector<8x512xf32>
    %232 = vector.extract_strided_slice %231 {offsets = [0, 0], sizes = [8, 128], strides = [1, 1]} : vector<8x512xf32> to vector<8x128xf32>
    %233 = arith.negf %232 : vector<8x128xf32>
    %234 = math.exp %233 : vector<8x128xf32>
    %cst_50 = arith.constant 1.000000e+00 : f32
    %235 = vector.broadcast %cst_50 : f32 to vector<8x128xf32>
    %236 = arith.addf %235, %234 : vector<8x128xf32>
    %237 = arith.divf %235, %236 : vector<8x128xf32>
    %238 = vector.extract_strided_slice %231 {offsets = [0, 128], sizes = [8, 128], strides = [1, 1]} : vector<8x512xf32> to vector<8x128xf32>
    %239 = arith.negf %238 : vector<8x128xf32>
    %240 = math.exp %239 : vector<8x128xf32>
    %cst_51 = arith.constant 1.000000e+00 : f32
    %241 = vector.broadcast %cst_51 : f32 to vector<8x128xf32>
    %242 = arith.addf %241, %240 : vector<8x128xf32>
    %243 = arith.divf %241, %242 : vector<8x128xf32>
    %244 = vector.extract_strided_slice %231 {offsets = [0, 256], sizes = [8, 128], strides = [1, 1]} : vector<8x512xf32> to vector<8x128xf32>
    %245 = math.tanh %244 : vector<8x128xf32>
    %246 = vector.extract_strided_slice %231 {offsets = [0, 384], sizes = [8, 128], strides = [1, 1]} : vector<8x512xf32> to vector<8x128xf32>
    %247 = arith.negf %246 : vector<8x128xf32>
    %248 = math.exp %247 : vector<8x128xf32>
    %cst_52 = arith.constant 1.000000e+00 : f32
    %249 = vector.broadcast %cst_52 : f32 to vector<8x128xf32>
    %250 = arith.addf %249, %248 : vector<8x128xf32>
    %251 = arith.divf %249, %250 : vector<8x128xf32>
    %252 = arith.mulf %243, %193 : vector<8x128xf32>
    %253 = arith.mulf %237, %245 : vector<8x128xf32>
    %254 = arith.addf %252, %253 : vector<8x128xf32>
    %255 = math.tanh %254 : vector<8x128xf32>
    %256 = arith.mulf %251, %255 : vector<8x128xf32>
    %c4_i32 = arith.constant 4 : i32
    %c8_i32_53 = arith.constant 8 : i32
    %257 = arith.muli %c4_i32, %c8_i32_53 : i32
    %258 = tpu.assume_multiple %257, 8 : i32
    %259 = arith.index_cast %258 : i32 to index
    %c0_54 = arith.constant 0 : index
    %260 = vector.load %arg9[%259, %c0_54] : memref<64x512xf32, #tpu.memory_space<vmem>>, vector<8x512xf32>
    %261 = arith.truncf %227 : vector<8x128xf32> to vector<8x128xbf16>
    %cst_55 = arith.constant dense<0.000000e+00> : vector<8x512xf32>
    %262 = tpu.matmul %261, %7, %cst_55 {dimension_numbers = #tpu.dot_dimension_numbers<[1], [0], [0], [1], [0, 0, 1, 1], [], []>} : vector<8x128xbf16>, vector<128x512xbf16>, vector<8x512xf32> -> vector<8x512xf32>
    %263 = arith.addf %260, %262 : vector<8x512xf32>
    %264 = vector.extract_strided_slice %263 {offsets = [0, 0], sizes = [8, 128], strides = [1, 1]} : vector<8x512xf32> to vector<8x128xf32>
    %265 = arith.negf %264 : vector<8x128xf32>
    %266 = math.exp %265 : vector<8x128xf32>
    %cst_56 = arith.constant 1.000000e+00 : f32
    %267 = vector.broadcast %cst_56 : f32 to vector<8x128xf32>
    %268 = arith.addf %267, %266 : vector<8x128xf32>
    %269 = arith.divf %267, %268 : vector<8x128xf32>
    %270 = vector.extract_strided_slice %263 {offsets = [0, 128], sizes = [8, 128], strides = [1, 1]} : vector<8x512xf32> to vector<8x128xf32>
    %271 = arith.negf %270 : vector<8x128xf32>
    %272 = math.exp %271 : vector<8x128xf32>
    %cst_57 = arith.constant 1.000000e+00 : f32
    %273 = vector.broadcast %cst_57 : f32 to vector<8x128xf32>
    %274 = arith.addf %273, %272 : vector<8x128xf32>
    %275 = arith.divf %273, %274 : vector<8x128xf32>
    %276 = vector.extract_strided_slice %263 {offsets = [0, 256], sizes = [8, 128], strides = [1, 1]} : vector<8x512xf32> to vector<8x128xf32>
    %277 = math.tanh %276 : vector<8x128xf32>
    %278 = vector.extract_strided_slice %263 {offsets = [0, 384], sizes = [8, 128], strides = [1, 1]} : vector<8x512xf32> to vector<8x128xf32>
    %279 = arith.negf %278 : vector<8x128xf32>
    %280 = math.exp %279 : vector<8x128xf32>
    %cst_58 = arith.constant 1.000000e+00 : f32
    %281 = vector.broadcast %cst_58 : f32 to vector<8x128xf32>
    %282 = arith.addf %281, %280 : vector<8x128xf32>
    %283 = arith.divf %281, %282 : vector<8x128xf32>
    %284 = arith.mulf %275, %225 : vector<8x128xf32>
    %285 = arith.mulf %269, %277 : vector<8x128xf32>
    %286 = arith.addf %284, %285 : vector<8x128xf32>
    %287 = math.tanh %286 : vector<8x128xf32>
    %288 = arith.mulf %283, %287 : vector<8x128xf32>
    %289 = tpu.concatenate %288, %256 in 1 : vector<8x128xf32>, vector<8x128xf32> -> vector<8x256xf32>
    %290 = arith.truncf %289 : vector<8x256xf32> to vector<8x256xbf16>
    %cst_59 = arith.constant dense<0.000000e+00> : vector<8x512xf32>
    %291 = tpu.matmul %290, %8, %cst_59 {dimension_numbers = #tpu.dot_dimension_numbers<[1], [0], [0], [1], [0, 0, 1, 1], [], []>} : vector<8x256xbf16>, vector<256x512xbf16>, vector<8x512xf32> -> vector<8x512xf32>
    %292 = arith.addf %291, %11 : vector<8x512xf32>
    %293 = vector.extract_strided_slice %292 {offsets = [0, 0], sizes = [8, 128], strides = [1, 1]} : vector<8x512xf32> to vector<8x128xf32>
    %294 = arith.negf %293 : vector<8x128xf32>
    %295 = math.exp %294 : vector<8x128xf32>
    %cst_60 = arith.constant 1.000000e+00 : f32
    %296 = vector.broadcast %cst_60 : f32 to vector<8x128xf32>
    %297 = arith.addf %296, %295 : vector<8x128xf32>
    %298 = arith.divf %296, %297 : vector<8x128xf32>
    %299 = vector.extract_strided_slice %292 {offsets = [0, 128], sizes = [8, 128], strides = [1, 1]} : vector<8x512xf32> to vector<8x128xf32>
    %300 = arith.negf %299 : vector<8x128xf32>
    %301 = math.exp %300 : vector<8x128xf32>
    %cst_61 = arith.constant 1.000000e+00 : f32
    %302 = vector.broadcast %cst_61 : f32 to vector<8x128xf32>
    %303 = arith.addf %302, %301 : vector<8x128xf32>
    %304 = arith.divf %302, %303 : vector<8x128xf32>
    %305 = vector.extract_strided_slice %292 {offsets = [0, 256], sizes = [8, 128], strides = [1, 1]} : vector<8x512xf32> to vector<8x128xf32>
    %306 = math.tanh %305 : vector<8x128xf32>
    %307 = vector.extract_strided_slice %292 {offsets = [0, 384], sizes = [8, 128], strides = [1, 1]} : vector<8x512xf32> to vector<8x128xf32>
    %308 = arith.negf %307 : vector<8x128xf32>
    %309 = math.exp %308 : vector<8x128xf32>
    %cst_62 = arith.constant 1.000000e+00 : f32
    %310 = vector.broadcast %cst_62 : f32 to vector<8x128xf32>
    %311 = arith.addf %310, %309 : vector<8x128xf32>
    %312 = arith.divf %310, %311 : vector<8x128xf32>
    %313 = arith.mulf %304, %254 : vector<8x128xf32>
    %314 = arith.mulf %298, %306 : vector<8x128xf32>
    %315 = arith.addf %313, %314 : vector<8x128xf32>
    %316 = math.tanh %315 : vector<8x128xf32>
    %317 = arith.mulf %312, %316 : vector<8x128xf32>
    %c5_i32 = arith.constant 5 : i32
    %c8_i32_63 = arith.constant 8 : i32
    %318 = arith.muli %c5_i32, %c8_i32_63 : i32
    %319 = tpu.assume_multiple %318, 8 : i32
    %320 = arith.index_cast %319 : i32 to index
    %c0_64 = arith.constant 0 : index
    %321 = vector.load %arg9[%320, %c0_64] : memref<64x512xf32, #tpu.memory_space<vmem>>, vector<8x512xf32>
    %322 = arith.truncf %288 : vector<8x128xf32> to vector<8x128xbf16>
    %cst_65 = arith.constant dense<0.000000e+00> : vector<8x512xf32>
    %323 = tpu.matmul %322, %7, %cst_65 {dimension_numbers = #tpu.dot_dimension_numbers<[1], [0], [0], [1], [0, 0, 1, 1], [], []>} : vector<8x128xbf16>, vector<128x512xbf16>, vector<8x512xf32> -> vector<8x512xf32>
    %324 = arith.addf %321, %323 : vector<8x512xf32>
    %325 = vector.extract_strided_slice %324 {offsets = [0, 0], sizes = [8, 128], strides = [1, 1]} : vector<8x512xf32> to vector<8x128xf32>
    %326 = arith.negf %325 : vector<8x128xf32>
    %327 = math.exp %326 : vector<8x128xf32>
    %cst_66 = arith.constant 1.000000e+00 : f32
    %328 = vector.broadcast %cst_66 : f32 to vector<8x128xf32>
    %329 = arith.addf %328, %327 : vector<8x128xf32>
    %330 = arith.divf %328, %329 : vector<8x128xf32>
    %331 = vector.extract_strided_slice %324 {offsets = [0, 128], sizes = [8, 128], strides = [1, 1]} : vector<8x512xf32> to vector<8x128xf32>
    %332 = arith.negf %331 : vector<8x128xf32>
    %333 = math.exp %332 : vector<8x128xf32>
    %cst_67 = arith.constant 1.000000e+00 : f32
    %334 = vector.broadcast %cst_67 : f32 to vector<8x128xf32>
    %335 = arith.addf %334, %333 : vector<8x128xf32>
    %336 = arith.divf %334, %335 : vector<8x128xf32>
    %337 = vector.extract_strided_slice %324 {offsets = [0, 256], sizes = [8, 128], strides = [1, 1]} : vector<8x512xf32> to vector<8x128xf32>
    %338 = math.tanh %337 : vector<8x128xf32>
    %339 = vector.extract_strided_slice %324 {offsets = [0, 384], sizes = [8, 128], strides = [1, 1]} : vector<8x512xf32> to vector<8x128xf32>
    %340 = arith.negf %339 : vector<8x128xf32>
    %341 = math.exp %340 : vector<8x128xf32>
    %cst_68 = arith.constant 1.000000e+00 : f32
    %342 = vector.broadcast %cst_68 : f32 to vector<8x128xf32>
    %343 = arith.addf %342, %341 : vector<8x128xf32>
    %344 = arith.divf %342, %343 : vector<8x128xf32>
    %345 = arith.mulf %336, %286 : vector<8x128xf32>
    %346 = arith.mulf %330, %338 : vector<8x128xf32>
    %347 = arith.addf %345, %346 : vector<8x128xf32>
    %348 = math.tanh %347 : vector<8x128xf32>
    %349 = arith.mulf %344, %348 : vector<8x128xf32>
    %350 = tpu.concatenate %349, %317 in 1 : vector<8x128xf32>, vector<8x128xf32> -> vector<8x256xf32>
    %351 = arith.truncf %350 : vector<8x256xf32> to vector<8x256xbf16>
    %cst_69 = arith.constant dense<0.000000e+00> : vector<8x512xf32>
    %352 = tpu.matmul %351, %8, %cst_69 {dimension_numbers = #tpu.dot_dimension_numbers<[1], [0], [0], [1], [0, 0, 1, 1], [], []>} : vector<8x256xbf16>, vector<256x512xbf16>, vector<8x512xf32> -> vector<8x512xf32>
    %353 = arith.addf %352, %11 : vector<8x512xf32>
    %354 = vector.extract_strided_slice %353 {offsets = [0, 0], sizes = [8, 128], strides = [1, 1]} : vector<8x512xf32> to vector<8x128xf32>
    %355 = arith.negf %354 : vector<8x128xf32>
    %356 = math.exp %355 : vector<8x128xf32>
    %cst_70 = arith.constant 1.000000e+00 : f32
    %357 = vector.broadcast %cst_70 : f32 to vector<8x128xf32>
    %358 = arith.addf %357, %356 : vector<8x128xf32>
    %359 = arith.divf %357, %358 : vector<8x128xf32>
    %360 = vector.extract_strided_slice %353 {offsets = [0, 128], sizes = [8, 128], strides = [1, 1]} : vector<8x512xf32> to vector<8x128xf32>
    %361 = arith.negf %360 : vector<8x128xf32>
    %362 = math.exp %361 : vector<8x128xf32>
    %cst_71 = arith.constant 1.000000e+00 : f32
    %363 = vector.broadcast %cst_71 : f32 to vector<8x128xf32>
    %364 = arith.addf %363, %362 : vector<8x128xf32>
    %365 = arith.divf %363, %364 : vector<8x128xf32>
    %366 = vector.extract_strided_slice %353 {offsets = [0, 256], sizes = [8, 128], strides = [1, 1]} : vector<8x512xf32> to vector<8x128xf32>
    %367 = math.tanh %366 : vector<8x128xf32>
    %368 = vector.extract_strided_slice %353 {offsets = [0, 384], sizes = [8, 128], strides = [1, 1]} : vector<8x512xf32> to vector<8x128xf32>
    %369 = arith.negf %368 : vector<8x128xf32>
    %370 = math.exp %369 : vector<8x128xf32>
    %cst_72 = arith.constant 1.000000e+00 : f32
    %371 = vector.broadcast %cst_72 : f32 to vector<8x128xf32>
    %372 = arith.addf %371, %370 : vector<8x128xf32>
    %373 = arith.divf %371, %372 : vector<8x128xf32>
    %374 = arith.mulf %365, %315 : vector<8x128xf32>
    %375 = arith.mulf %359, %367 : vector<8x128xf32>
    %376 = arith.addf %374, %375 : vector<8x128xf32>
    %377 = math.tanh %376 : vector<8x128xf32>
    %378 = arith.mulf %373, %377 : vector<8x128xf32>
    %c6_i32 = arith.constant 6 : i32
    %c8_i32_73 = arith.constant 8 : i32
    %379 = arith.muli %c6_i32, %c8_i32_73 : i32
    %380 = tpu.assume_multiple %379, 8 : i32
    %381 = arith.index_cast %380 : i32 to index
    %c0_74 = arith.constant 0 : index
    %382 = vector.load %arg9[%381, %c0_74] : memref<64x512xf32, #tpu.memory_space<vmem>>, vector<8x512xf32>
    %383 = arith.truncf %349 : vector<8x128xf32> to vector<8x128xbf16>
    %cst_75 = arith.constant dense<0.000000e+00> : vector<8x512xf32>
    %384 = tpu.matmul %383, %7, %cst_75 {dimension_numbers = #tpu.dot_dimension_numbers<[1], [0], [0], [1], [0, 0, 1, 1], [], []>} : vector<8x128xbf16>, vector<128x512xbf16>, vector<8x512xf32> -> vector<8x512xf32>
    %385 = arith.addf %382, %384 : vector<8x512xf32>
    %386 = vector.extract_strided_slice %385 {offsets = [0, 0], sizes = [8, 128], strides = [1, 1]} : vector<8x512xf32> to vector<8x128xf32>
    %387 = arith.negf %386 : vector<8x128xf32>
    %388 = math.exp %387 : vector<8x128xf32>
    %cst_76 = arith.constant 1.000000e+00 : f32
    %389 = vector.broadcast %cst_76 : f32 to vector<8x128xf32>
    %390 = arith.addf %389, %388 : vector<8x128xf32>
    %391 = arith.divf %389, %390 : vector<8x128xf32>
    %392 = vector.extract_strided_slice %385 {offsets = [0, 128], sizes = [8, 128], strides = [1, 1]} : vector<8x512xf32> to vector<8x128xf32>
    %393 = arith.negf %392 : vector<8x128xf32>
    %394 = math.exp %393 : vector<8x128xf32>
    %cst_77 = arith.constant 1.000000e+00 : f32
    %395 = vector.broadcast %cst_77 : f32 to vector<8x128xf32>
    %396 = arith.addf %395, %394 : vector<8x128xf32>
    %397 = arith.divf %395, %396 : vector<8x128xf32>
    %398 = vector.extract_strided_slice %385 {offsets = [0, 256], sizes = [8, 128], strides = [1, 1]} : vector<8x512xf32> to vector<8x128xf32>
    %399 = math.tanh %398 : vector<8x128xf32>
    %400 = vector.extract_strided_slice %385 {offsets = [0, 384], sizes = [8, 128], strides = [1, 1]} : vector<8x512xf32> to vector<8x128xf32>
    %401 = arith.negf %400 : vector<8x128xf32>
    %402 = math.exp %401 : vector<8x128xf32>
    %cst_78 = arith.constant 1.000000e+00 : f32
    %403 = vector.broadcast %cst_78 : f32 to vector<8x128xf32>
    %404 = arith.addf %403, %402 : vector<8x128xf32>
    %405 = arith.divf %403, %404 : vector<8x128xf32>
    %406 = arith.mulf %397, %347 : vector<8x128xf32>
    %407 = arith.mulf %391, %399 : vector<8x128xf32>
    %408 = arith.addf %406, %407 : vector<8x128xf32>
    %409 = math.tanh %408 : vector<8x128xf32>
    %410 = arith.mulf %405, %409 : vector<8x128xf32>
    %411 = tpu.concatenate %410, %378 in 1 : vector<8x128xf32>, vector<8x128xf32> -> vector<8x256xf32>
    %412 = arith.truncf %411 : vector<8x256xf32> to vector<8x256xbf16>
    %cst_79 = arith.constant dense<0.000000e+00> : vector<8x512xf32>
    %413 = tpu.matmul %412, %8, %cst_79 {dimension_numbers = #tpu.dot_dimension_numbers<[1], [0], [0], [1], [0, 0, 1, 1], [], []>} : vector<8x256xbf16>, vector<256x512xbf16>, vector<8x512xf32> -> vector<8x512xf32>
    %414 = arith.addf %413, %11 : vector<8x512xf32>
    %415 = vector.extract_strided_slice %414 {offsets = [0, 0], sizes = [8, 128], strides = [1, 1]} : vector<8x512xf32> to vector<8x128xf32>
    %416 = arith.negf %415 : vector<8x128xf32>
    %417 = math.exp %416 : vector<8x128xf32>
    %cst_80 = arith.constant 1.000000e+00 : f32
    %418 = vector.broadcast %cst_80 : f32 to vector<8x128xf32>
    %419 = arith.addf %418, %417 : vector<8x128xf32>
    %420 = arith.divf %418, %419 : vector<8x128xf32>
    %421 = vector.extract_strided_slice %414 {offsets = [0, 128], sizes = [8, 128], strides = [1, 1]} : vector<8x512xf32> to vector<8x128xf32>
    %422 = arith.negf %421 : vector<8x128xf32>
    %423 = math.exp %422 : vector<8x128xf32>
    %cst_81 = arith.constant 1.000000e+00 : f32
    %424 = vector.broadcast %cst_81 : f32 to vector<8x128xf32>
    %425 = arith.addf %424, %423 : vector<8x128xf32>
    %426 = arith.divf %424, %425 : vector<8x128xf32>
    %427 = vector.extract_strided_slice %414 {offsets = [0, 256], sizes = [8, 128], strides = [1, 1]} : vector<8x512xf32> to vector<8x128xf32>
    %428 = math.tanh %427 : vector<8x128xf32>
    %429 = vector.extract_strided_slice %414 {offsets = [0, 384], sizes = [8, 128], strides = [1, 1]} : vector<8x512xf32> to vector<8x128xf32>
    %430 = arith.negf %429 : vector<8x128xf32>
    %431 = math.exp %430 : vector<8x128xf32>
    %cst_82 = arith.constant 1.000000e+00 : f32
    %432 = vector.broadcast %cst_82 : f32 to vector<8x128xf32>
    %433 = arith.addf %432, %431 : vector<8x128xf32>
    %434 = arith.divf %432, %433 : vector<8x128xf32>
    %435 = arith.mulf %426, %376 : vector<8x128xf32>
    %436 = arith.mulf %420, %428 : vector<8x128xf32>
    %437 = arith.addf %435, %436 : vector<8x128xf32>
    %438 = math.tanh %437 : vector<8x128xf32>
    %439 = arith.mulf %434, %438 : vector<8x128xf32>
    %c7_i32 = arith.constant 7 : i32
    %c8_i32_83 = arith.constant 8 : i32
    %440 = arith.muli %c7_i32, %c8_i32_83 : i32
    %441 = tpu.assume_multiple %440, 8 : i32
    %442 = arith.index_cast %441 : i32 to index
    %c0_84 = arith.constant 0 : index
    %443 = vector.load %arg9[%442, %c0_84] : memref<64x512xf32, #tpu.memory_space<vmem>>, vector<8x512xf32>
    %444 = arith.truncf %410 : vector<8x128xf32> to vector<8x128xbf16>
    %cst_85 = arith.constant dense<0.000000e+00> : vector<8x512xf32>
    %445 = tpu.matmul %444, %7, %cst_85 {dimension_numbers = #tpu.dot_dimension_numbers<[1], [0], [0], [1], [0, 0, 1, 1], [], []>} : vector<8x128xbf16>, vector<128x512xbf16>, vector<8x512xf32> -> vector<8x512xf32>
    %446 = arith.addf %443, %445 : vector<8x512xf32>
    %447 = vector.extract_strided_slice %446 {offsets = [0, 0], sizes = [8, 128], strides = [1, 1]} : vector<8x512xf32> to vector<8x128xf32>
    %448 = arith.negf %447 : vector<8x128xf32>
    %449 = math.exp %448 : vector<8x128xf32>
    %cst_86 = arith.constant 1.000000e+00 : f32
    %450 = vector.broadcast %cst_86 : f32 to vector<8x128xf32>
    %451 = arith.addf %450, %449 : vector<8x128xf32>
    %452 = arith.divf %450, %451 : vector<8x128xf32>
    %453 = vector.extract_strided_slice %446 {offsets = [0, 128], sizes = [8, 128], strides = [1, 1]} : vector<8x512xf32> to vector<8x128xf32>
    %454 = arith.negf %453 : vector<8x128xf32>
    %455 = math.exp %454 : vector<8x128xf32>
    %cst_87 = arith.constant 1.000000e+00 : f32
    %456 = vector.broadcast %cst_87 : f32 to vector<8x128xf32>
    %457 = arith.addf %456, %455 : vector<8x128xf32>
    %458 = arith.divf %456, %457 : vector<8x128xf32>
    %459 = vector.extract_strided_slice %446 {offsets = [0, 256], sizes = [8, 128], strides = [1, 1]} : vector<8x512xf32> to vector<8x128xf32>
    %460 = math.tanh %459 : vector<8x128xf32>
    %461 = vector.extract_strided_slice %446 {offsets = [0, 384], sizes = [8, 128], strides = [1, 1]} : vector<8x512xf32> to vector<8x128xf32>
    %462 = arith.negf %461 : vector<8x128xf32>
    %463 = math.exp %462 : vector<8x128xf32>
    %cst_88 = arith.constant 1.000000e+00 : f32
    %464 = vector.broadcast %cst_88 : f32 to vector<8x128xf32>
    %465 = arith.addf %464, %463 : vector<8x128xf32>
    %466 = arith.divf %464, %465 : vector<8x128xf32>
    %467 = arith.mulf %458, %408 : vector<8x128xf32>
    %468 = arith.mulf %452, %460 : vector<8x128xf32>
    %469 = arith.addf %467, %468 : vector<8x128xf32>
    %470 = math.tanh %469 : vector<8x128xf32>
    %471 = arith.mulf %466, %470 : vector<8x128xf32>
    %472 = tpu.concatenate %471, %439 in 1 : vector<8x128xf32>, vector<8x128xf32> -> vector<8x256xf32>
    %473 = arith.truncf %472 : vector<8x256xf32> to vector<8x256xbf16>
    %cst_89 = arith.constant dense<0.000000e+00> : vector<8x512xf32>
    %474 = tpu.matmul %473, %8, %cst_89 {dimension_numbers = #tpu.dot_dimension_numbers<[1], [0], [0], [1], [0, 0, 1, 1], [], []>} : vector<8x256xbf16>, vector<256x512xbf16>, vector<8x512xf32> -> vector<8x512xf32>
    %475 = arith.addf %474, %11 : vector<8x512xf32>
    %476 = vector.extract_strided_slice %475 {offsets = [0, 0], sizes = [8, 128], strides = [1, 1]} : vector<8x512xf32> to vector<8x128xf32>
    %477 = arith.negf %476 : vector<8x128xf32>
    %478 = math.exp %477 : vector<8x128xf32>
    %cst_90 = arith.constant 1.000000e+00 : f32
    %479 = vector.broadcast %cst_90 : f32 to vector<8x128xf32>
    %480 = arith.addf %479, %478 : vector<8x128xf32>
    %481 = arith.divf %479, %480 : vector<8x128xf32>
    %482 = vector.extract_strided_slice %475 {offsets = [0, 128], sizes = [8, 128], strides = [1, 1]} : vector<8x512xf32> to vector<8x128xf32>
    %483 = arith.negf %482 : vector<8x128xf32>
    %484 = math.exp %483 : vector<8x128xf32>
    %cst_91 = arith.constant 1.000000e+00 : f32
    %485 = vector.broadcast %cst_91 : f32 to vector<8x128xf32>
    %486 = arith.addf %485, %484 : vector<8x128xf32>
    %487 = arith.divf %485, %486 : vector<8x128xf32>
    %488 = vector.extract_strided_slice %475 {offsets = [0, 256], sizes = [8, 128], strides = [1, 1]} : vector<8x512xf32> to vector<8x128xf32>
    %489 = math.tanh %488 : vector<8x128xf32>
    %490 = vector.extract_strided_slice %475 {offsets = [0, 384], sizes = [8, 128], strides = [1, 1]} : vector<8x512xf32> to vector<8x128xf32>
    %491 = arith.negf %490 : vector<8x128xf32>
    %492 = math.exp %491 : vector<8x128xf32>
    %cst_92 = arith.constant 1.000000e+00 : f32
    %493 = vector.broadcast %cst_92 : f32 to vector<8x128xf32>
    %494 = arith.addf %493, %492 : vector<8x128xf32>
    %495 = arith.divf %493, %494 : vector<8x128xf32>
    %496 = arith.mulf %487, %437 : vector<8x128xf32>
    %497 = arith.mulf %481, %489 : vector<8x128xf32>
    %498 = arith.addf %496, %497 : vector<8x128xf32>
    %499 = math.tanh %498 : vector<8x128xf32>
    %500 = arith.mulf %495, %499 : vector<8x128xf32>
    %c8_i32_93 = arith.constant 8 : i32
    %501 = arith.truncf %500 : vector<8x128xf32> to vector<8x128xbf16>
    %c0_94 = arith.constant 0 : index
    %c0_95 = arith.constant 0 : index
    %502 = vector.load %arg6[%c0_94, %c0_95] : memref<128x10xbf16, #tpu.memory_space<vmem>>, vector<128x10xbf16>
    %cst_96 = arith.constant dense<0.000000e+00> : vector<8x10xf32>
    %503 = tpu.matmul %501, %502, %cst_96 {dimension_numbers = #tpu.dot_dimension_numbers<[1], [0], [0], [1], [0, 0, 1, 1], [], []>} : vector<8x128xbf16>, vector<128x10xbf16>, vector<8x10xf32> -> vector<8x10xf32>
    %c0_97 = arith.constant 0 : index
    %c0_98 = arith.constant 0 : index
    %504 = vector.load %arg7[%c0_97, %c0_98] : memref<1x10xf32, #tpu.memory_space<vmem>>, vector<1x10xf32>
    %505 = vector.broadcast %504 : vector<1x10xf32> to vector<8x10xf32>
    %506 = arith.addf %503, %505 : vector<8x10xf32>
    %c0_99 = arith.constant 0 : index
    %c0_100 = arith.constant 0 : index
    %507 = vector.load %arg8[%c0_99, %c0_100] : memref<8x10xf32, #tpu.memory_space<vmem>>, vector<8x10xf32>
    tpu.vector_store %arg8[%c0_99, %c0_100], %506 {strides = array<i32>} : memref<8x10xf32, #tpu.memory_space<vmem>>, vector<8x10xf32>,
    return
  }
}

</mosaic_0001>

<bundles_post_ra>
// kernel: tpu_custom_call.1
= control target key start
LH: loop header
LB: loop body
LE: loop exit
PB: predicated region body
PF: predicated region fallthrough
CT: control target
= control target key end

     0   :  { %13 = vsyncpa [#allocation4], 0  ;;  %s5570_s0 = inlined_call_operand.vmem [shape: bf16[64,28], index: 0, kind: input, shape index: {}]   ;;  %s5571_s1 = inlined_call_operand.vmem [shape: bf16[28,512], index: 1, kind: input, shape index: {}]   ;;  %s5572_s2 = inlined_call_operand.hbm [shape: bf16[128,512], index: 2, kind: input, shape index: {}]   ;;  %s5573_s3 = inlined_call_operand.vmem [shape: f32[1,512], index: 3, kind: input, shape index: {}]   ;;  %s5574_s4 = inlined_call_operand.hbm [shape: bf16[256,512], index: 4, kind: input, shape index: {}]   ;;  %s5575_s5 = inlined_call_operand.vmem [shape: f32[1,512], index: 5, kind: input, shape index: {}]   ;;  %s5576_s6 = inlined_call_operand.vmem [shape: bf16[128,10], index: 6, kind: input, shape index: {}]   ;;  %s5577_s7 = inlined_call_operand.vmem [shape: f32[1,10], index: 7, kind: input, shape index: {}]   ;;  %s5578_s8 = inlined_call_operand.hbm [shape: f32[8,10], index: 8, kind: output, shape index: {}]  }
   0x1   :  { %14 = vsyncpa [#allocation7], 0 }
   0x2   :  { %15 = vsyncpa [#allocation5], 0  ;;  %s3793_s27 = smov [#allocation3]   ;;  %s3721_s9 = scalar_lea.hbm %s5572_s2, 4096 }
   0x3   :  { %s25_s28 = sshll.u32 %s3793_s27, 4  ;;  %p3722_p0 = scmp.ne.s32.totalorder %s5572_s2, %s3721_s9  ;;  %s26_s28 = int_to_ptr.vmem [resolvable:$true] %s25_s28 }
   0x4   :  { %p3725_p1 = scmp.lt.u32.totalorder %s3721_s9, %s5572_s2 }
   0x6   :  { %p3727_p2 = pnand %p3725_p1, %p3722_p0 }
   0x8   :  { %3730 = shalt.err (!%p3727_p2)
}
   0x9   :  { %s3731_s14 = scalar_lea.vmem %s26_s28, 4096  ;;  %p3736_p4 = scmp.lt.s32.totalorder %s26_s28, %s26_s28 }
   0xa   :  { %p3732_p3 = scmp.ne.s32.totalorder %s26_s28, %s3731_s14  ;;  %p3737_p5 = scmp.lt.s32.totalorder %s3731_s14, %s3731_s14 }
   0xc   :  { %p3738_p6 = por %p3737_p5, %p3736_p4 }
   0xe   :  { %p3739_p7 = pnand %p3738_p6, %p3732_p3 }
  0x10   :  { %3742 = shalt.err (!%p3739_p7)
}
  0x11   :  { %s3794_s15 = smov 256   ;;  %s3795_s16 = smov 16  }
  0x12   :  { %31 = dma.hbm_to_vmem [thread:$0]  %s5572_s2, 4096, %s26_s28, [#allocation4], %s3794_s15, %s3794_s15, %s3795_s16  }
  0x13   :  { %s3796_s19 = smov [#allocation6]   ;;  %s3743_s23 = scalar_lea.hbm %s5574_s4, 8192 }
  0x14   :  { %s39_s20 = sshll.u32 %s3796_s19, 4  ;;  %p3744_p8 = scmp.ne.s32.totalorder %s5574_s4, %s3743_s23  ;;  %s40_s20 = int_to_ptr.vmem [resolvable:$true] %s39_s20 }
  0x15   :  { %p3747_p9 = scmp.lt.u32.totalorder %s3743_s23, %s5574_s4 }
  0x17   :  { %p3749_p10 = pnand %p3747_p9, %p3744_p8 }
  0x19   :  { %3752 = shalt.err (!%p3749_p10)
}
  0x1a   :  { %s3753_s29 = scalar_lea.vmem %s40_s20, 8192  ;;  %p3758_p12 = scmp.lt.s32.totalorder %s40_s20, %s40_s20 }
  0x1b   :  { %p3754_p11 = scmp.ne.s32.totalorder %s40_s20, %s3753_s29  ;;  %p3759_p13 = scmp.lt.s32.totalorder %s3753_s29, %s3753_s29 }
  0x1d   :  { %p3760_p0 = por %p3759_p13, %p3758_p12 }
  0x1f   :  { %p3761_p1 = pnand %p3760_p0, %p3754_p11 }
  0x21   :  { %3764 = shalt.err (!%p3761_p1)
}
  0x22   :  { %45 = dma.hbm_to_vmem [thread:$0]  %s5574_s4, 8192, %s40_s20, [#allocation7], %s3794_s15, %s3794_s15, %s3795_s16  }
  0x23   :  { %3787 = dma.done.wait [#allocation4], 4096  }
  0x24   :  { %3788 = vsyncadd [#allocation4], 4294963200 }
  0x25   :  { %3789 = dma.done.wait [#allocation7], 8192  }
  0x26   :  { %3790 = vsyncadd [#allocation7], 4294959104  ;;  %v5579_v0 = vmov 0   ;;  %v3105_v1 = vld [vmem:[%s5571_s1 + $0x4] ss:$16 sps:$4 sm:$0xff]   ;;  %vm166_vm0 = vcmask 1045504  }
  0x27   :  { %211 = vmatprep.mubr.bf16.mxu0 %v5579_v0  ;;  %284 = vmatprep.mubr.bf16.mxu1 %v5579_v0  ;;  %v3107_v2 = vld [vmem:[%s5571_s1 + $0xc] ss:$16 sps:$4 sm:$0xff]   ;;  %v3109_v3 = vld [vmem:[%s5571_s1] ss:$16 sps:$4 sm:$0xff]   ;;  %v3110_v4 = vld [vmem:[%s5571_s1 + $0x8] ss:$16 sps:$4 sm:$0xff]  }
  0x28   :  { %179 = vmatprep.subr.bf16.mxu0 %v3105_v1  ;;  %252 = vmatprep.subr.bf16.mxu1 %v3107_v2  ;;  %v3111_v5 = vld [vmem:[%s5571_s1 + $0x24] ss:$16 sps:$4 sm:$0x3f]   ;;  %v3113_v6 = vld [vmem:[%s5571_s1 + $0x2c] ss:$16 sps:$4 sm:$0x3f]  }
  0x29   :  { %180 = vmatpush1.bf16.msra.mxu0 %v3109_v3  ;;  %253 = vmatpush1.bf16.msra.mxu1 %v3110_v4  ;;  %v3115_v7 = vld [vmem:[%s5571_s1 + $0x20] ss:$16 sps:$4 sm:$0x3f]   ;;  %v3116_v8 = vld [vmem:[%s5571_s1 + $0x28] ss:$16 sps:$4 sm:$0x3f]  }
  0x2a   :  { %2904 = vmatprep.subr.msk.bf16.mxu0 %vm166_vm0, %v3111_v5  ;;  %v3117_v9 = vld [vmem:[%s5570_s0] sm:$0xff]   ;;  %2909 = vmatprep.subr.msk.bf16.mxu1 %vm166_vm0, %v3113_v6  ;;  %v168_v10 = vsel %vm166_vm0, %v3115_v7, 0  ;;  %v174_v11 = vsel %vm166_vm0, %v3116_v8, 0  ;;  %vm153_vm1 = vcmask 228352   ;;  %v3902_v13 = vld [vmem:[#allocation3 + $0xc] ss:$16 sps:$4 sm:$0xff]  }
  0x2b   :  { %v3900_v12 = vld [vmem:[#allocation3 + $0x4] ss:$16 sps:$4 sm:$0xff]   ;;  %v3904_v14 = vld [vmem:[#allocation3] ss:$16 sps:$4 sm:$0xff]   ;;  %v3907_v15 = vld [vmem:[#allocation3 + $0x8] ss:$16 sps:$4 sm:$0xff]  }
  0x2c   :  { %v3910_v16 = vld [vmem:[#allocation3 + $0x24] ss:$16 sps:$4 sm:$0xff]   ;;  %v3914_v17 = vld [vmem:[#allocation3 + $0x2c] ss:$16 sps:$4 sm:$0xff]   ;;  %v3916_v18 = vld [vmem:[#allocation3 + $0x20] ss:$16 sps:$4 sm:$0xff]  }
  0x2d   :  { %182 = vmatpush1.bf16.msra.mxu0 %v168_v10  ;;  %255 = vmatpush1.bf16.msra.mxu1 %v174_v11  ;;  %v3920_v19 = vld [vmem:[#allocation3 + $0x28] ss:$16 sps:$4 sm:$0xff]   ;;  %v3924_v20 = vld [vmem:[#allocation3 + $0x44] ss:$16 sps:$4 sm:$0xff]   ;;  %v3928_v21 = vld [vmem:[#allocation3 + $0x4c] ss:$16 sps:$4 sm:$0xff]  }
  0x2e   :  { %642 = vmatprep.subr.bf16.mxu0 %v3900_v12  ;;  %683 = vmatprep.subr.bf16.mxu1 %v3902_v13  ;;  %v3130_v22 = vld [vmem:[%s5570_s0 + $0x8] sm:$0xff]   ;;  %v3933_v23 = vld [vmem:[#allocation3 + $0x40] ss:$16 sps:$4 sm:$0xff]   ;;  %v3941_v25 = vld [vmem:[#allocation3 + $0x64] ss:$16 sps:$4 sm:$0xff]   ;;  %vm3800_vm2 = vmmov 0  }
  0x2f   :  { %v3937_v24 = vld [vmem:[#allocation3 + $0x48] ss:$16 sps:$4 sm:$0xff]   ;;  %v3943_v26 = vld [vmem:[#allocation3 + $0x6c] ss:$16 sps:$4 sm:$0xff]   ;;  %v3947_v27 = vld [vmem:[#allocation3 + $0x60] ss:$16 sps:$4 sm:$0xff]  }
  0x30   :  { %2905 = vmatmul.mubr.msk.bf16.vlgmr.msra.gmra.mrb[0].mxu0 %vm153_vm1, %v3117_v9  ;;  %2910 = vmatmul.mubr.msk.bf16.vlgmr.msra.gmra.mrb[0].mxu1 %vm153_vm1, %v3117_v9  ;;  %v3951_v28 = vld [vmem:[#allocation3 + $0x68] ss:$16 sps:$4 sm:$0xff]   ;;  %v3955_v29 = vld [vmem:[#allocation3 + $0x84] ss:$16 sps:$4 sm:$0xff]   ;;  %v3957_v30 = vld [vmem:[#allocation3 + $0x8c] ss:$16 sps:$4 sm:$0xff]  }
  0x31   :  { %643 = vmatpush1.bf16.msra.mxu0 %v3904_v14  ;;  %684 = vmatpush1.bf16.msra.mxu1 %v3907_v15  ;;  %v3143_v31 = vld [vmem:[%s5570_s0 + $0x10] sm:$0xff]   ;;  %v3968_v33 = vld [vmem:[#allocation3 + $0x88] ss:$16 sps:$4 sm:$0xff]   ;;  %v3974_v35 = vld [vmem:[#allocation3 + $0xac] ss:$16 sps:$4 sm:$0xff]   ;;  %s3801_s24 = smov [#allocation8]  }
  0x32   :  { %644 = vmatprep.subr.bf16.mxu0 %v3910_v16  ;;  %685 = vmatprep.subr.bf16.mxu1 %v3914_v17  ;;  %v3964_v32 = vld [vmem:[#allocation3 + $0x80] ss:$16 sps:$4 sm:$0xff]   ;;  %v3970_v34 = vld [vmem:[#allocation3 + $0xa4] ss:$16 sps:$4 sm:$0xff]   ;;  %v3980_v37 = vld [vmem:[#allocation3 + $0xa8] ss:$16 sps:$4 sm:$0xff]  }
  0x33   :  { %221 = vmatprep.mubr.bf16.mxu0 %v5579_v0  ;;  %294 = vmatprep.mubr.bf16.mxu1 %v5579_v0  ;;  %v3978_v36 = vld [vmem:[#allocation3 + $0xa0] ss:$16 sps:$4 sm:$0xff]   ;;  %v3984_v38 = vld [vmem:[#allocation3 + $0xc4] ss:$16 sps:$4 sm:$0xff]   ;;  %v3988_v39 = vld [vmem:[#allocation3 + $0xcc] ss:$16 sps:$4 sm:$0xff]  }
  0x34   :  { %v3156_v40 = vld [vmem:[%s5570_s0 + $0x18] sm:$0xff]   ;;  %v3995_v41 = vld [vmem:[#allocation3 + $0xc0] ss:$16 sps:$4 sm:$0xff]   ;;  %v3999_v43 = vld [vmem:[#allocation3 + $0xe4] ss:$16 sps:$4 sm:$0xff]   ;;  %s2875_s1 = sshll.u32 %s3801_s24, 4  ;;  %s2876_s1 = int_to_ptr.vmem [resolvable:$true] %s2875_s1 }
  0x35   :  { %645 = vmatpush1.bf16.msra.mxu0 %v3916_v18  ;;  %686 = vmatpush1.bf16.msra.mxu1 %v3920_v19  ;;  %v3997_v42 = vld [vmem:[#allocation3 + $0xc8] ss:$16 sps:$4 sm:$0xff]   ;;  %v4001_v44 = vld [vmem:[#allocation3 + $0xec] ss:$16 sps:$4 sm:$0xff]   ;;  %v4007_v45 = vld [vmem:[#allocation3 + $0xe0] ss:$16 sps:$4 sm:$0xff]   ;;  %p3770_p3 = scmp.lt.s32.totalorder %s2876_s1, %s2876_s1 }
  0x36   :  { %646 = vmatprep.subr.bf16.mxu0 %v3924_v20  ;;  %687 = vmatprep.subr.bf16.mxu1 %v3928_v21  ;;  %v4009_v46 = vld [vmem:[#allocation3 + $0xe8] ss:$16 sps:$4 sm:$0xff]   ;;  %v4023_v47 = vld [vmem:[#allocation6 + $0x4] ss:$16 sps:$4 sm:$0xff]   ;;  %v4025_v48 = vld [vmem:[#allocation6 + $0xc] ss:$16 sps:$4 sm:$0xff]  }
  0x37   :  { %v4027_v49 = vld [vmem:[#allocation6] ss:$16 sps:$4 sm:$0xff]   ;;  %v4029_v50 = vld [vmem:[#allocation6 + $0x8] ss:$16 sps:$4 sm:$0xff]   ;;  %v4035_v51 = vld [vmem:[#allocation6 + $0x24] ss:$16 sps:$4 sm:$0xff]  }
  0x38   :  { %2906 = vmatmul.mubr.msk.bf16.gmra.mrb[4].mxu0 %vm153_vm1, %v3130_v22  ;;  %2911 = vmatmul.mubr.msk.bf16.gmra.mrb[4].mxu1 %vm153_vm1, %v3130_v22  ;;  %v4037_v52 = vld [vmem:[#allocation6 + $0x2c] ss:$16 sps:$4 sm:$0xff]   ;;  %v4039_v53 = vld [vmem:[#allocation6 + $0x20] ss:$16 sps:$4 sm:$0xff]   ;;  %v4041_v54 = vld [vmem:[#allocation6 + $0x28] ss:$16 sps:$4 sm:$0xff]  }
  0x39   :  { %647 = vmatpush1.bf16.msra.mxu0 %v3933_v23  ;;  %688 = vmatpush1.bf16.msra.mxu1 %v3937_v24  ;;  %v4047_v55 = vld [vmem:[#allocation6 + $0x44] ss:$16 sps:$4 sm:$0xff]   ;;  %v4049_v56 = vld [vmem:[#allocation6 + $0x4c] ss:$16 sps:$4 sm:$0xff]   ;;  %v4051_v57 = vld [vmem:[#allocation6 + $0x40] ss:$16 sps:$4 sm:$0xff]  }
  0x3a   :  { %648 = vmatprep.subr.bf16.mxu0 %v3941_v25  ;;  %689 = vmatprep.subr.bf16.mxu1 %v3943_v26  ;;  %5922 = vst [vmem:[#allocation12_spill] sm:$0xff] %v4049_v56  ;;  %5923 = vst [vmem:[#allocation13_spill] sm:$0xff] %v4051_v57  ;;  %v4053_v58 = vld [vmem:[#allocation6 + $0x48] ss:$16 sps:$4 sm:$0xff]   ;;  %v4059_v59 = vld [vmem:[#allocation6 + $0x64] ss:$16 sps:$4 sm:$0xff]  }
  0x3b   :  { %231 = vmatprep.mubr.bf16.mxu0 %v5579_v0  ;;  %304 = vmatprep.mubr.bf16.mxu1 %v5579_v0  ;;  %5924 = vst [vmem:[#allocation14_spill] sm:$0xff] %v4053_v58  ;;  %5925 = vst [vmem:[#allocation15_spill] sm:$0xff] %v4059_v59  ;;  %v4061_v60 = vld [vmem:[#allocation6 + $0x6c] ss:$16 sps:$4 sm:$0xff]   ;;  %v4063_v61 = vld [vmem:[#allocation6 + $0x60] ss:$16 sps:$4 sm:$0xff]  }
  0x3c   :  { %5926 = vst [vmem:[#allocation16_spill] sm:$0xff] %v4061_v60  ;;  %5927 = vst [vmem:[#allocation17_spill] sm:$0xff] %v4063_v61  ;;  %v4065_v62 = vld [vmem:[#allocation6 + $0x68] ss:$16 sps:$4 sm:$0xff]   ;;  %v4071_v63 = vld [vmem:[#allocation6 + $0x84] ss:$16 sps:$4 sm:$0xff]  }
  0x3d   :  { %649 = vmatpush1.bf16.msra.mxu0 %v3947_v27  ;;  %690 = vmatpush1.bf16.msra.mxu1 %v3951_v28  ;;  %5928 = vst [vmem:[#allocation18_spill] sm:$0xff] %v4065_v62  ;;  %5929 = vst [vmem:[#allocation19_spill] sm:$0xff] %v4071_v63  ;;  %v4073_v1 = vld [vmem:[#allocation6 + $0x8c] ss:$16 sps:$4 sm:$0xff]   ;;  %v4077_v2 = vld [vmem:[#allocation6 + $0x80] ss:$16 sps:$4 sm:$0xff]  }
  0x3e   :  { %650 = vmatprep.subr.bf16.mxu0 %v3955_v29  ;;  %691 = vmatprep.subr.bf16.mxu1 %v3957_v30  ;;  %5930 = vst [vmem:[#allocation20_spill] sm:$0xff] %v4073_v1  ;;  %5931 = vst [vmem:[#allocation21_spill] sm:$0xff] %v4077_v2  ;;  %v4079_v3 = vld [vmem:[#allocation6 + $0x88] ss:$16 sps:$4 sm:$0xff]   ;;  %v4083_v4 = vld [vmem:[#allocation6 + $0xa4] ss:$16 sps:$4 sm:$0xff]  }
  0x3f   :  { %5932 = vst [vmem:[#allocation22_spill] sm:$0xff] %v4079_v3  ;;  %5933 = vst [vmem:[#allocation23_spill] sm:$0xff] %v4083_v4  ;;  %v4085_v5 = vld [vmem:[#allocation6 + $0xac] ss:$16 sps:$4 sm:$0xff]   ;;  %v4087_v6 = vld [vmem:[#allocation6 + $0xa0] ss:$16 sps:$4 sm:$0xff]  }
  0x40   :  { %2907 = vmatmul.mubr.msk.bf16.gmra.mrb[8].mxu0 %vm153_vm1, %v3143_v31  ;;  %2912 = vmatmul.mubr.msk.bf16.gmra.mrb[8].mxu1 %vm153_vm1, %v3143_v31  ;;  %5934 = vst [vmem:[#allocation24_spill] sm:$0xff] %v4085_v5  ;;  %5935 = vst [vmem:[#allocation25_spill] sm:$0xff] %v4087_v6  ;;  %v4089_v7 = vld [vmem:[#allocation6 + $0xa8] ss:$16 sps:$4 sm:$0xff]   ;;  %v4095_v8 = vld [vmem:[#allocation6 + $0xc4] ss:$16 sps:$4 sm:$0xff]  }
  0x41   :  { %651 = vmatpush1.bf16.msra.mxu0 %v3964_v32  ;;  %692 = vmatpush1.bf16.msra.mxu1 %v3968_v33  ;;  %5936 = vst [vmem:[#allocation26_spill] sm:$0xff] %v4089_v7  ;;  %5937 = vst [vmem:[#allocation27_spill] sm:$0xff] %v4095_v8  ;;  %v4097_v9 = vld [vmem:[#allocation6 + $0xcc] ss:$16 sps:$4 sm:$0xff]   ;;  %v4099_v10 = vld [vmem:[#allocation6 + $0xc0] ss:$16 sps:$4 sm:$0xff]  }
  0x42   :  { %652 = vmatprep.subr.bf16.mxu0 %v3970_v34  ;;  %693 = vmatprep.subr.bf16.mxu1 %v3974_v35  ;;  %5938 = vst [vmem:[#allocation28_spill] sm:$0xff] %v4097_v9  ;;  %5939 = vst [vmem:[#allocation29_spill] sm:$0xff] %v4099_v10  ;;  %v4101_v11 = vld [vmem:[#allocation6 + $0xc8] ss:$16 sps:$4 sm:$0xff]   ;;  %v4107_v22 = vld [vmem:[#allocation6 + $0xe4] ss:$16 sps:$4 sm:$0xff]  }
  0x43   :  { %241 = vmatprep.mubr.bf16.mxu0 %v5579_v0  ;;  %314 = vmatprep.mubr.bf16.mxu1 %v5579_v0  ;;  %5940 = vst [vmem:[#allocation30_spill] sm:$0xff] %v4101_v11  ;;  %5941 = vst [vmem:[#allocation31_spill] sm:$0xff] %v4107_v22  ;;  %v4109_v31 = vld [vmem:[#allocation6 + $0xec] ss:$16 sps:$4 sm:$0xff]   ;;  %vm2867_vm3 = vcmask 80896   ;;  %s3765_s25 = scalar_lea.vmem %s2876_s1, 128 }
  0x44   :  { %5942 = vst [vmem:[#allocation32_spill] sm:$0xff] %v4109_v31  ;;  %p3766_p2 = scmp.ne.s32.totalorder %s2876_s1, %s3765_s25  ;;  %p3771_p4 = scmp.lt.s32.totalorder %s3765_s25, %s3765_s25 }
  0x45   :  { %653 = vmatpush1.bf16.msra.mxu0 %v3978_v36  ;;  %694 = vmatpush1.bf16.msra.mxu1 %v3980_v37 }
  0x46   :  { %654 = vmatprep.subr.bf16.mxu0 %v3984_v38  ;;  %695 = vmatprep.subr.bf16.mxu1 %v3988_v39  ;;  %p3772_p5 = por %p3771_p4, %p3770_p3 }
  0x48   :  { %2908 = vmatmul.mubr.msk.bf16.gmra.mrb[12].mxu0 %vm153_vm1, %v3156_v40  ;;  %2913 = vmatmul.mubr.msk.bf16.gmra.mrb[12].mxu1 %vm153_vm1, %v3156_v40  ;;  %v4111_v40 = vld [vmem:[#allocation6 + $0xe0] ss:$16 sps:$4 sm:$0xff]   ;;  %p3773_p6 = pnand %p3772_p5, %p3766_p2 }
  0x49   :  { %655 = vmatpush1.bf16.msra.mxu0 %v3995_v41  ;;  %696 = vmatpush1.bf16.msra.mxu1 %v3997_v42  ;;  %5943 = vst [vmem:[#allocation33_spill] sm:$0xff] %v4111_v40 }
  0x4a   :  { %656 = vmatprep.subr.bf16.mxu0 %v3999_v43  ;;  %697 = vmatprep.subr.bf16.mxu1 %v4001_v44 }
  0x4b   :  { %674 = vmatprep.mubr.bf16.mxu0 %v5579_v0  ;;  %715 = vmatprep.mubr.bf16.mxu1 %v5579_v0 }
  0x4d   :  { %657 = vmatpush1.bf16.msra.mxu0 %v4007_v45  ;;  %698 = vmatpush1.bf16.msra.mxu1 %v4009_v46 }
  0x4e   :  { %1074 = vmatprep.subr.bf16.mxu0 %v4023_v47  ;;  %1115 = vmatprep.subr.bf16.mxu1 %v4025_v48 }
  0x50   :  { %675 = vmatmul.mubr.bf16.vlgmr.msra.gmra.mrb[16].mxu0 %v5579_v0  ;;  %716 = vmatmul.mubr.bf16.vlgmr.msra.gmra.mrb[16].mxu1 %v5579_v0  ;;  %v4113_v0 = vld [vmem:[#allocation6 + $0xe8] ss:$16 sps:$4 sm:$0xff]  }
  0x51   :  { %1075 = vmatpush1.bf16.msra.mxu0 %v4027_v49  ;;  %1116 = vmatpush1.bf16.msra.mxu1 %v4029_v50  ;;  %5944 = vst [vmem:[#allocation34_spill] sm:$0xff] %v4113_v0 }
  0x52   :  { %1076 = vmatprep.subr.bf16.mxu0 %v4035_v51  ;;  %1117 = vmatprep.subr.bf16.mxu1 %v4037_v52 }
  0x55   :  { %1077 = vmatpush1.bf16.msra.mxu0 %v4039_v53  ;;  %1118 = vmatpush1.bf16.msra.mxu1 %v4041_v54 }
  0x56   :  { %1078 = vmatprep.subr.bf16.mxu0 %v4047_v55  ;;  %1119 = vmatprep.subr.bf16.mxu1 %v4049_v56 }
  0x59   :  { %1079 = vmatpush1.bf16.msra.mxu0 %v4051_v57  ;;  %1120 = vmatpush1.bf16.msra.mxu1 %v4053_v58 }
  0x5a   :  { %1080 = vmatprep.subr.bf16.mxu0 %v4059_v59  ;;  %1121 = vmatprep.subr.bf16.mxu1 %v4061_v60 }
  0x5d   :  { %1081 = vmatpush1.bf16.msra.mxu0 %v4063_v61  ;;  %1122 = vmatpush1.bf16.msra.mxu1 %v4065_v62 }
  0x5e   :  { %1082 = vmatprep.subr.bf16.mxu0 %v4071_v63  ;;  %1123 = vmatprep.subr.bf16.mxu1 %v4073_v1 }
  0x61   :  { %1083 = vmatpush1.bf16.msra.mxu0 %v4077_v2  ;;  %1124 = vmatpush1.bf16.msra.mxu1 %v4079_v3 }
  0x62   :  { %1084 = vmatprep.subr.bf16.mxu0 %v4083_v4  ;;  %1125 = vmatprep.subr.bf16.mxu1 %v4085_v5  ;;  %v3798_v5 = vmov 0.0|0.0  }
  0x63   :  { %1106 = vmatprep.mubr.bf16.mxu0 %v3798_v5  ;;  %1147 = vmatprep.mubr.bf16.mxu1 %v3798_v5  ;;  %v77_v5 = vlaneseq }
  0x65   :  { %1085 = vmatpush1.bf16.msra.mxu0 %v4087_v6  ;;  %1126 = vmatpush1.bf16.msra.mxu1 %v4089_v7  ;;  %v4187_v7 = vld [vmem:[#allocation6 + $0x1c4] ss:$16 sps:$4 sm:$0xff]   ;;  %v4189_v6 = vld [vmem:[#allocation6 + $0x1cc] ss:$16 sps:$4 sm:$0xff]  }
  0x66   :  { %1086 = vmatprep.subr.bf16.mxu0 %v4095_v8  ;;  %1127 = vmatprep.subr.bf16.mxu1 %v4097_v9  ;;  %v4119_v9 = vld [vmem:[#allocation6 + $0x104] ss:$16 sps:$4 sm:$0xff]   ;;  %v4125_v8 = vld [vmem:[#allocation6 + $0x108] ss:$16 sps:$4 sm:$0xff]   ;;  %5969 = vst [vmem:[#allocation59_spill] sm:$0xff] %v4187_v7  ;;  %5970 = vst [vmem:[#allocation60_spill] sm:$0xff] %v4189_v6 }
  0x67   :  { %5945 = vst [vmem:[#allocation35_spill] sm:$0xff] %v4119_v9  ;;  %5948 = vst [vmem:[#allocation38_spill] sm:$0xff] %v4125_v8 }
  0x69   :  { %1087 = vmatpush1.bf16.msra.mxu0 %v4099_v10  ;;  %1128 = vmatpush1.bf16.msra.mxu1 %v4101_v11  ;;  %v4121_v10 = vld [vmem:[#allocation6 + $0x10c] ss:$16 sps:$4 sm:$0xff]   ;;  %v4123_v11 = vld [vmem:[#allocation6 + $0x100] ss:$16 sps:$4 sm:$0xff]  }
  0x6a   :  { %1088 = vmatprep.subr.bf16.mxu0 %v4107_v22  ;;  %1129 = vmatprep.subr.bf16.mxu1 %v4109_v31  ;;  %5946 = vst [vmem:[#allocation36_spill] sm:$0xff] %v4121_v10  ;;  %5947 = vst [vmem:[#allocation37_spill] sm:$0xff] %v4123_v11  ;;  %v4131_v31 = vld [vmem:[#allocation6 + $0x124] ss:$16 sps:$4 sm:$0xff]   ;;  %v4137_v22 = vld [vmem:[#allocation6 + $0x128] ss:$16 sps:$4 sm:$0xff]  }
  0x6b   :  { %5949 = vst [vmem:[#allocation39_spill] sm:$0xff] %v4131_v31  ;;  %5952 = vst [vmem:[#allocation42_spill] sm:$0xff] %v4137_v22 }
  0x6d   :  { %1089 = vmatpush1.bf16.msra.mxu0 %v4111_v40  ;;  %1130 = vmatpush1.bf16.msra.mxu1 %v4113_v0  ;;  %v4133_v40 = vld [vmem:[#allocation6 + $0x12c] ss:$16 sps:$4 sm:$0xff]   ;;  %v4135_v0 = vld [vmem:[#allocation6 + $0x120] ss:$16 sps:$4 sm:$0xff]  }
  0x6e   :  { %1090 = vmatprep.subr.bf16.mxu0 %v4119_v9  ;;  %1131 = vmatprep.subr.bf16.mxu1 %v4121_v10  ;;  %5950 = vst [vmem:[#allocation40_spill] sm:$0xff] %v4133_v40  ;;  %5951 = vst [vmem:[#allocation41_spill] sm:$0xff] %v4135_v0  ;;  %v4143_v10 = vld [vmem:[#allocation6 + $0x144] ss:$16 sps:$4 sm:$0xff]   ;;  %v4149_v9 = vld [vmem:[#allocation6 + $0x148] ss:$16 sps:$4 sm:$0xff]  }
  0x6f   :  { %5953 = vst [vmem:[#allocation43_spill] sm:$0xff] %v4143_v10  ;;  %5956 = vst [vmem:[#allocation46_spill] sm:$0xff] %v4149_v9 }
  0x71   :  { %1091 = vmatpush1.bf16.msra.mxu0 %v4123_v11  ;;  %1132 = vmatpush1.bf16.msra.mxu1 %v4125_v8  ;;  %v4145_v11 = vld [vmem:[#allocation6 + $0x14c] ss:$16 sps:$4 sm:$0xff]   ;;  %v4147_v8 = vld [vmem:[#allocation6 + $0x140] ss:$16 sps:$4 sm:$0xff]  }
  0x72   :  { %1092 = vmatprep.subr.bf16.mxu0 %v4131_v31  ;;  %1133 = vmatprep.subr.bf16.mxu1 %v4133_v40  ;;  %5954 = vst [vmem:[#allocation44_spill] sm:$0xff] %v4145_v11  ;;  %5955 = vst [vmem:[#allocation45_spill] sm:$0xff] %v4147_v8  ;;  %v4155_v40 = vld [vmem:[#allocation6 + $0x164] ss:$16 sps:$4 sm:$0xff]   ;;  %v4161_v31 = vld [vmem:[#allocation6 + $0x168] ss:$16 sps:$4 sm:$0xff]  }
  0x73   :  { %5957 = vst [vmem:[#allocation47_spill] sm:$0xff] %v4155_v40  ;;  %5960 = vst [vmem:[#allocation50_spill] sm:$0xff] %v4161_v31 }
  0x75   :  { %1093 = vmatpush1.bf16.msra.mxu0 %v4135_v0  ;;  %1134 = vmatpush1.bf16.msra.mxu1 %v4137_v22  ;;  %v4157_v0 = vld [vmem:[#allocation6 + $0x16c] ss:$16 sps:$4 sm:$0xff]   ;;  %v4159_v22 = vld [vmem:[#allocation6 + $0x160] ss:$16 sps:$4 sm:$0xff]  }
  0x76   :  { %1094 = vmatprep.subr.bf16.mxu0 %v4143_v10  ;;  %1135 = vmatprep.subr.bf16.mxu1 %v4145_v11  ;;  %5958 = vst [vmem:[#allocation48_spill] sm:$0xff] %v4157_v0  ;;  %5959 = vst [vmem:[#allocation49_spill] sm:$0xff] %v4159_v22  ;;  %v4167_v11 = vld [vmem:[#allocation6 + $0x184] ss:$16 sps:$4 sm:$0xff]   ;;  %v4173_v10 = vld [vmem:[#allocation6 + $0x188] ss:$16 sps:$4 sm:$0xff]  }
  0x77   :  { %5961 = vst [vmem:[#allocation51_spill] sm:$0xff] %v4167_v11  ;;  %5964 = vst [vmem:[#allocation54_spill] sm:$0xff] %v4173_v10 }
  0x79   :  { %1095 = vmatpush1.bf16.msra.mxu0 %v4147_v8  ;;  %1136 = vmatpush1.bf16.msra.mxu1 %v4149_v9  ;;  %v4169_v8 = vld [vmem:[#allocation6 + $0x18c] ss:$16 sps:$4 sm:$0xff]   ;;  %v4171_v9 = vld [vmem:[#allocation6 + $0x180] ss:$16 sps:$4 sm:$0xff]  }
  0x7a   :  { %1096 = vmatprep.subr.bf16.mxu0 %v4155_v40  ;;  %1137 = vmatprep.subr.bf16.mxu1 %v4157_v0  ;;  %5962 = vst [vmem:[#allocation52_spill] sm:$0xff] %v4169_v8  ;;  %5963 = vst [vmem:[#allocation53_spill] sm:$0xff] %v4171_v9  ;;  %v4179_v0 = vld [vmem:[#allocation6 + $0x1a4] ss:$16 sps:$4 sm:$0xff]   ;;  %v4185_v40 = vld [vmem:[#allocation6 + $0x1a8] ss:$16 sps:$4 sm:$0xff]  }
  0x7b   :  { %5965 = vst [vmem:[#allocation55_spill] sm:$0xff] %v4179_v0  ;;  %5968 = vst [vmem:[#allocation58_spill] sm:$0xff] %v4185_v40 }
  0x7d   :  { %1097 = vmatpush1.bf16.msra.mxu0 %v4159_v22  ;;  %1138 = vmatpush1.bf16.msra.mxu1 %v4161_v31  ;;  %v4181_v22 = vld [vmem:[#allocation6 + $0x1ac] ss:$16 sps:$4 sm:$0xff]   ;;  %v4183_v31 = vld [vmem:[#allocation6 + $0x1a0] ss:$16 sps:$4 sm:$0xff]  }
  0x7e   :  { %1098 = vmatprep.subr.bf16.mxu0 %v4167_v11  ;;  %1139 = vmatprep.subr.bf16.mxu1 %v4169_v8  ;;  %5966 = vst [vmem:[#allocation56_spill] sm:$0xff] %v4181_v22  ;;  %5967 = vst [vmem:[#allocation57_spill] sm:$0xff] %v4183_v31  ;;  %v4201_v8 = vld [vmem:[#allocation6 + $0x1e4] ss:$16 sps:$4 sm:$0xff]   ;;  %v4203_v11 = vld [vmem:[#allocation6 + $0x1ec] ss:$16 sps:$4 sm:$0xff]  }
  0x7f   :  { %5973 = vst [vmem:[#allocation63_spill] sm:$0xff] %v4201_v8  ;;  %5974 = vst [vmem:[#allocation64_spill] sm:$0xff] %v4203_v11 }
  0x81   :  { %1099 = vmatpush1.bf16.msra.mxu0 %v4171_v9  ;;  %1140 = vmatpush1.bf16.msra.mxu1 %v4173_v10  ;;  %v4195_v10 = vld [vmem:[#allocation6 + $0x1c0] ss:$16 sps:$4 sm:$0xff]   ;;  %v4197_v9 = vld [vmem:[#allocation6 + $0x1c8] ss:$16 sps:$4 sm:$0xff]  }
  0x82   :  { %1100 = vmatprep.subr.bf16.mxu0 %v4179_v0  ;;  %1141 = vmatprep.subr.bf16.mxu1 %v4181_v22  ;;  %5971 = vst [vmem:[#allocation61_spill] sm:$0xff] %v4195_v10  ;;  %5972 = vst [vmem:[#allocation62_spill] sm:$0xff] %v4197_v9 }
  0x85   :  { %1101 = vmatpush1.bf16.msra.mxu0 %v4183_v31  ;;  %1142 = vmatpush1.bf16.msra.mxu1 %v4185_v40  ;;  %v4207_v40 = vld [vmem:[#allocation6 + $0x1e0] ss:$16 sps:$4 sm:$0xff]   ;;  %v4209_v31 = vld [vmem:[#allocation6 + $0x1e8] ss:$16 sps:$4 sm:$0xff]  }
  0x86   :  { %1102 = vmatprep.subr.bf16.mxu0 %v4187_v7  ;;  %1143 = vmatprep.subr.bf16.mxu1 %v4189_v6  ;;  %5975 = vst [vmem:[#allocation65_spill] sm:$0xff] %v4207_v40  ;;  %5976 = vst [vmem:[#allocation66_spill] sm:$0xff] %v4209_v31 }
  0x89   :  { %1103 = vmatpush1.bf16.msra.mxu0 %v4195_v10  ;;  %1144 = vmatpush1.bf16.msra.mxu1 %v4197_v9  ;;  %v4217_v10 = vshrl.u32 %v77_v5, 7 }
  0x8a   :  { %1104 = vmatprep.subr.bf16.mxu0 %v4201_v8  ;;  %1145 = vmatprep.subr.bf16.mxu1 %v4203_v11  ;;  %v75_v11 = vld [vmem:[%s5573_s3] sm:$0xf] }
  0x8b   :  { %5977 = vst [vmem:[#allocation67_spill] sm:$0xff] %v4217_v10  ;;  %v5673_v9 = vsub.s32 2, %v4217_v10  ;;  %v5682_v6 = vsub.s32 3, %v4217_v10  ;;  %v5683_v7 = vsub.s32 0, %v4217_v10 }
  0x8d   :  { %1105 = vmatpush1.bf16.msra.mxu0 %v4207_v40  ;;  %1146 = vmatpush1.bf16.msra.mxu1 %v4209_v31  ;;  %v5690_v40 = vsub.s32 1, %v4217_v10  ;;  %v4236_v31 = vrot.slane %v75_v11, %v5682_v6  ;;  %v80_v8 = vrot.slane %v75_v11, %v5683_v7 }
  0x8e   :  { %1187 = vmatprep.subr.bf16.mxu0 %v3900_v12  ;;  %1228 = vmatprep.subr.bf16.mxu1 %v3902_v13  ;;  %v4228_v12 = vrot.slane %v75_v11, %v5673_v9 }
  0x8f   :  { %v84_v4 = vrot.slane %v75_v11, %v5690_v40 }
 0x103   :  { %v4230_v13 = vpop.f32.mrb[0].mxu0  ;;  %v4232_v5 = vpop.f32.mrb[0].mxu1 }
 0x104   :  { %v215_v22 = vpop.f32.mrb[1].mxu0  ;;  %v288_v0 = vpop.f32.mrb[1].mxu1 }
 0x105   :  { %v217_v3 = vpop.f32.mrb[2].mxu0  ;;  %v290_v2 = vpop.f32.mrb[2].mxu1 }
 0x106   :  { %v4242_v9 = vadd.f32 %v217_v3, %v80_v8  ;;  %v219_v1 = vpop.f32.mrb[3].mxu0  ;;  %v4245_v63 = vadd.f32 %v290_v2, %v4228_v12  ;;  %v292_v62 = vpop.f32.mrb[3].mxu1 }
 0x107   :  { %v4247_v61 = vadd.f32 %v219_v1, %v84_v4  ;;  %v4250_v6 = vadd.f32 %v292_v62, %v4236_v31 }
 0x108   :  { %5978 = vst [vmem:[#allocation68_spill] sm:$0xff] %v4242_v9  ;;  %5979 = vst [vmem:[#allocation69_spill] sm:$0xff] %v4245_v63 }
 0x109   :  { %5980 = vst [vmem:[#allocation70_spill] sm:$0xff] %v4247_v61  ;;  %5981 = vst [vmem:[#allocation71_spill] sm:$0xff] %v4250_v6 }
 0x10b   :  { %v223_v7 = vpop.f32.mrb[4].mxu0  ;;  %v296_v60 = vpop.f32.mrb[4].mxu1 }
 0x10c   :  { %v4252_v59 = vadd.f32 %v223_v7, %v80_v8  ;;  %v225_v10 = vpop.f32.mrb[5].mxu0  ;;  %v4255_v11 = vadd.f32 %v296_v60, %v4228_v12  ;;  %v298_v3 = vpop.f32.mrb[5].mxu1 }
 0x10d   :  { %v4257_v40 = vadd.f32 %v225_v10, %v84_v4  ;;  %v227_v9 = vpop.f32.mrb[6].mxu0  ;;  %v4260_v2 = vadd.f32 %v298_v3, %v4236_v31  ;;  %v300_v1 = vpop.f32.mrb[6].mxu1 }
 0x10e   :  { %5982 = vst [vmem:[#allocation72_spill] sm:$0xff] %v4252_v59  ;;  %5983 = vst [vmem:[#allocation73_spill] sm:$0xff] %v4255_v11  ;;  %v4262_v61 = vadd.f32 %v227_v9, %v80_v8  ;;  %v229_v62 = vpop.f32.mrb[7].mxu0  ;;  %v4265_v6 = vadd.f32 %v300_v1, %v4228_v12  ;;  %v302_v7 = vpop.f32.mrb[7].mxu1 }
 0x10f   :  { %5984 = vst [vmem:[#allocation74_spill] sm:$0xff] %v4257_v40  ;;  %5985 = vst [vmem:[#allocation75_spill] sm:$0xff] %v4260_v2  ;;  %v4267_v59 = vadd.f32 %v229_v62, %v84_v4  ;;  %v4270_v60 = vadd.f32 %v302_v7, %v4236_v31 }
 0x110   :  { %5986 = vst [vmem:[#allocation76_spill] sm:$0xff] %v4262_v61  ;;  %5987 = vst [vmem:[#allocation77_spill] sm:$0xff] %v4265_v6 }
 0x111   :  { %5988 = vst [vmem:[#allocation78_spill] sm:$0xff] %v4267_v59  ;;  %5989 = vst [vmem:[#allocation79_spill] sm:$0xff] %v4270_v60 }
 0x113   :  { %v233_v11 = vpop.f32.mrb[8].mxu0  ;;  %v306_v10 = vpop.f32.mrb[8].mxu1 }
 0x114   :  { %v4272_v40 = vadd.f32 %v233_v11, %v80_v8  ;;  %v235_v63 = vpop.f32.mrb[9].mxu0  ;;  %v4275_v3 = vadd.f32 %v306_v10, %v4228_v12  ;;  %v308_v9 = vpop.f32.mrb[9].mxu1 }
 0x115   :  { %v4277_v61 = vadd.f32 %v235_v63, %v84_v4  ;;  %v237_v2 = vpop.f32.mrb[10].mxu0  ;;  %v4280_v1 = vadd.f32 %v308_v9, %v4236_v31  ;;  %v310_v62 = vpop.f32.mrb[10].mxu1 }
 0x116   :  { %5990 = vst [vmem:[#allocation80_spill] sm:$0xff] %v4272_v40  ;;  %5991 = vst [vmem:[#allocation81_spill] sm:$0xff] %v4275_v3  ;;  %v4282_v59 = vadd.f32 %v237_v2, %v80_v8  ;;  %v239_v7 = vpop.f32.mrb[11].mxu0  ;;  %v4285_v60 = vadd.f32 %v310_v62, %v4228_v12  ;;  %v312_v11 = vpop.f32.mrb[11].mxu1 }
 0x117   :  { %5992 = vst [vmem:[#allocation82_spill] sm:$0xff] %v4277_v61  ;;  %5993 = vst [vmem:[#allocation83_spill] sm:$0xff] %v4280_v1  ;;  %v4287_v40 = vadd.f32 %v239_v7, %v84_v4  ;;  %v4290_v10 = vadd.f32 %v312_v11, %v4236_v31 }
 0x118   :  { %5994 = vst [vmem:[#allocation84_spill] sm:$0xff] %v4282_v59  ;;  %5995 = vst [vmem:[#allocation85_spill] sm:$0xff] %v4285_v60 }
 0x119   :  { %5996 = vst [vmem:[#allocation86_spill] sm:$0xff] %v4287_v40  ;;  %5997 = vst [vmem:[#allocation87_spill] sm:$0xff] %v4290_v10 }
 0x11b   :  { %v243_v3 = vpop.f32.mrb[12].mxu0  ;;  %v316_v63 = vpop.f32.mrb[12].mxu1 }
 0x11c   :  { %v4292_v61 = vadd.f32 %v243_v3, %v80_v8  ;;  %v245_v6 = vpop.f32.mrb[13].mxu0  ;;  %v4295_v9 = vadd.f32 %v316_v63, %v4228_v12  ;;  %v318_v2 = vpop.f32.mrb[13].mxu1 }
 0x11d   :  { %v4297_v59 = vadd.f32 %v245_v6, %v84_v4  ;;  %v247_v1 = vpop.f32.mrb[14].mxu0  ;;  %v4300_v62 = vadd.f32 %v318_v2, %v4236_v31  ;;  %v320_v7 = vpop.f32.mrb[14].mxu1  ;;  %v214_v6 = vadd.f32 %v4230_v13, %v80_v8  ;;  %v216_v2 = vadd.f32 %v215_v22, %v84_v4 }
 0x11e   :  { %5998 = vst [vmem:[#allocation88_spill] sm:$0xff] %v4292_v61  ;;  %5999 = vst [vmem:[#allocation89_spill] sm:$0xff] %v4295_v9  ;;  %v4302_v40 = vadd.f32 %v247_v1, %v80_v8  ;;  %v249_v11 = vpop.f32.mrb[15].mxu0  ;;  %v4305_v10 = vadd.f32 %v320_v7, %v4228_v12  ;;  %v322_v3 = vpop.f32.mrb[15].mxu1 }
 0x11f   :  { %6000 = vst [vmem:[#allocation90_spill] sm:$0xff] %v4297_v59  ;;  %6001 = vst [vmem:[#allocation91_spill] sm:$0xff] %v4300_v62  ;;  %v4307_v61 = vadd.f32 %v249_v11, %v84_v4  ;;  %v4310_v63 = vadd.f32 %v322_v3, %v4236_v31  ;;  %v287_v59 = vadd.f32 %v4232_v5, %v4228_v12 }
 0x120   :  { %6002 = vst [vmem:[#allocation92_spill] sm:$0xff] %v4302_v40  ;;  %6003 = vst [vmem:[#allocation93_spill] sm:$0xff] %v4305_v10  ;;  %v289_v62 = vadd.f32 %v288_v0, %v4236_v31 }
 0x121   :  { %6004 = vst [vmem:[#allocation94_spill] sm:$0xff] %v4307_v61  ;;  %6005 = vst [vmem:[#allocation95_spill] sm:$0xff] %v4310_v63 }
 0x123   :  { %v676_v1 = vpop.f32.mrb[16].mxu0  ;;  %v717_v40 = vpop.f32.mrb[16].mxu1 }
 0x124   :  { %v724_v9 = vadd.f32 %v676_v1, %v214_v6  ;;  %v726_v60 = vadd.f32 %v717_v40, %v287_v59  ;;  %v678_v7 = vpop.f32.mrb[17].mxu0  ;;  %v719_v10 = vpop.f32.mrb[17].mxu1  ;;  %v6037_v6 = vld [vmem:[#allocation42_spill] sm:$0xff]  ;;  %v6039_v1 = vld [vmem:[#allocation44_spill] sm:$0xff] }
 0x125   :  { %v725_v58 = vadd.f32 %v678_v7, %v216_v2  ;;  %v727_v11 = vadd.f32 %v719_v10, %v289_v62  ;;  %v680_v61 = vpop.f32.mrb[18].mxu0  ;;  %v721_v57 = vpop.f32.mrb[18].mxu1  ;;  %v6038_v2 = vld [vmem:[#allocation43_spill] sm:$0xff]  ;;  %v6040_v7 = vld [vmem:[#allocation45_spill] sm:$0xff] }
 0x126   :  { %v2946_v3 = vmul.f32 -1.442695, %v724_v9  ;;  %v681_v63 = vpop.f32.mrb[19].mxu0  ;;  %v722_v56 = vpop.f32.mrb[19].mxu1 }
 0x127   :  { %v2947_v8 = vmul.f32 -1.442695, %v725_v58  ;;  %v2948_v12 = vmul.f32 -1.442695, %v727_v11  ;;  %v6041_v11 = vld [vmem:[#allocation46_spill] sm:$0xff] }
 0x128   :  { %3273 = vpow2.f32 %v2946_v3  ;;  %v6042_v3 = vld [vmem:[#allocation47_spill] sm:$0xff] }
 0x129   :  { %3275 = vpow2.f32 %v2947_v8  ;;  %v6043_v8 = vld [vmem:[#allocation48_spill] sm:$0xff] }
 0x12a   :  { %3277 = vpow2.f32 %v2948_v12  ;;  %v6044_v12 = vld [vmem:[#allocation49_spill] sm:$0xff] }
 0x12b   :  { %3279 = vtanh.f32 %v726_v60  ;;  %v6006_v60 = vmov 0  }
 0x132   :  { %v3274_v4 = vpop.eup %3273 }
 0x133   :  { %v3276_v22 = vpop.eup %3275  ;;  %v731_v0 = vadd.f32 1.0, %v3274_v4  ;;  %v6045_v4 = vld [vmem:[#allocation50_spill] sm:$0xff] }
 0x134   :  { %v737_v31 = vadd.f32 1.0, %v3276_v22  ;;  %v3278_v59 = vpop.eup %3277  ;;  %v6046_v22 = vld [vmem:[#allocation51_spill] sm:$0xff] }
 0x135   :  { %3281 = vrcp.f32 %v731_v0  ;;  %v3280_v40 = vpop.eup %3279  ;;  %v744_v5 = vadd.f32 1.0, %v3278_v59  ;;  %v6047_v0 = vld [vmem:[#allocation52_spill] sm:$0xff]  ;;  %v6049_v59 = vld [vmem:[#allocation54_spill] sm:$0xff] }
 0x136   :  { %3283 = vrcp.f32 %v737_v31  ;;  %v6048_v31 = vld [vmem:[#allocation53_spill] sm:$0xff] }
 0x137   :  { %3285 = vrcp.f32 %v744_v5  ;;  %v6054_v5 = vld [vmem:[#allocation59_spill] sm:$0xff] }
 0x13f   :  { %v3282_v13 = vpop.eup %3281 }
 0x140   :  { %v3284_v61 = vpop.eup %3283  ;;  %v748_v57 = vmul.f32 %v3282_v13, %v3280_v40  ;;  %v6050_v40 = vld [vmem:[#allocation55_spill] sm:$0xff]  ;;  %v6051_v13 = vld [vmem:[#allocation56_spill] sm:$0xff] }
 0x141   :  { %v747_v10 = vmul.f32 0.0, %v3284_v61  ;;  %v3286_v58 = vpop.eup %3285  ;;  %v6052_v61 = vld [vmem:[#allocation57_spill] sm:$0xff] }
 0x143   :  { %v4316_v56 = vadd.f32 %v748_v57, %v747_v10  ;;  %v6053_v57 = vld [vmem:[#allocation58_spill] sm:$0xff]  ;;  %v6055_v10 = vld [vmem:[#allocation60_spill] sm:$0xff] }
 0x145   :  { %3287 = vtanh.f32 %v4316_v56 }
 0x14f   :  { %v3288_v9 = vpop.eup %3287 }
 0x150   :  { %v751_v62 = vmul.f32 %v3288_v9, %v3286_v58  ;;  %v6056_v58 = vld [vmem:[#allocation61_spill] sm:$0xff]  ;;  %v6057_v9 = vld [vmem:[#allocation62_spill] sm:$0xff] }
 0x152   :  { %v752_v63 = vpack.c.bf16 %v751_v62, %v751_v62  ;;  %v6058_v62 = vld [vmem:[#allocation63_spill] sm:$0xff] }
 0x154   :  { %1107 = vmatmul.mubr.bf16.vlgmr.msra.gmra.mrb[20].mxu0 %v752_v63  ;;  %1148 = vmatmul.mubr.bf16.vlgmr.msra.gmra.mrb[20].mxu1 %v752_v63 }
 0x155   :  { %1188 = vmatpush1.bf16.msra.mxu0 %v3904_v14  ;;  %1229 = vmatpush1.bf16.msra.mxu1 %v3907_v15  ;;  %v6007_v14 = vld [vmem:[#allocation12_spill] sm:$0xff]  ;;  %v6008_v15 = vld [vmem:[#allocation13_spill] sm:$0xff] }
 0x156   :  { %1189 = vmatprep.subr.bf16.mxu0 %v3910_v16  ;;  %1230 = vmatprep.subr.bf16.mxu1 %v3914_v17  ;;  %v6009_v16 = vld [vmem:[#allocation14_spill] sm:$0xff]  ;;  %v6010_v17 = vld [vmem:[#allocation15_spill] sm:$0xff] }
 0x157   :  { %1219 = vmatprep.mubr.bf16.mxu0 %v6006_v60  ;;  %1260 = vmatprep.mubr.bf16.mxu1 %v6006_v60 }
 0x159   :  { %1190 = vmatpush1.bf16.msra.mxu0 %v3916_v18  ;;  %1231 = vmatpush1.bf16.msra.mxu1 %v3920_v19  ;;  %v6011_v18 = vld [vmem:[#allocation16_spill] sm:$0xff]  ;;  %v6012_v19 = vld [vmem:[#allocation17_spill] sm:$0xff] }
 0x15a   :  { %1191 = vmatprep.subr.bf16.mxu0 %v3924_v20  ;;  %1232 = vmatprep.subr.bf16.mxu1 %v3928_v21  ;;  %v6013_v20 = vld [vmem:[#allocation18_spill] sm:$0xff]  ;;  %v6014_v21 = vld [vmem:[#allocation19_spill] sm:$0xff] }
 0x15d   :  { %1192 = vmatpush1.bf16.msra.mxu0 %v3933_v23  ;;  %1233 = vmatpush1.bf16.msra.mxu1 %v3937_v24  ;;  %v6015_v23 = vld [vmem:[#allocation20_spill] sm:$0xff]  ;;  %v6016_v24 = vld [vmem:[#allocation21_spill] sm:$0xff] }
 0x15e   :  { %1193 = vmatprep.subr.bf16.mxu0 %v3941_v25  ;;  %1234 = vmatprep.subr.bf16.mxu1 %v3943_v26  ;;  %v6017_v25 = vld [vmem:[#allocation22_spill] sm:$0xff]  ;;  %v6018_v26 = vld [vmem:[#allocation23_spill] sm:$0xff] }
 0x161   :  { %1194 = vmatpush1.bf16.msra.mxu0 %v3947_v27  ;;  %1235 = vmatpush1.bf16.msra.mxu1 %v3951_v28  ;;  %v6019_v27 = vld [vmem:[#allocation24_spill] sm:$0xff]  ;;  %v6020_v28 = vld [vmem:[#allocation25_spill] sm:$0xff] }
 0x162   :  { %1195 = vmatprep.subr.bf16.mxu0 %v3955_v29  ;;  %1236 = vmatprep.subr.bf16.mxu1 %v3957_v30  ;;  %v6021_v29 = vld [vmem:[#allocation26_spill] sm:$0xff]  ;;  %v6022_v30 = vld [vmem:[#allocation27_spill] sm:$0xff] }
 0x165   :  { %1196 = vmatpush1.bf16.msra.mxu0 %v3964_v32  ;;  %1237 = vmatpush1.bf16.msra.mxu1 %v3968_v33  ;;  %v6023_v32 = vld [vmem:[#allocation28_spill] sm:$0xff]  ;;  %v6024_v33 = vld [vmem:[#allocation29_spill] sm:$0xff] }
 0x166   :  { %1197 = vmatprep.subr.bf16.mxu0 %v3970_v34  ;;  %1238 = vmatprep.subr.bf16.mxu1 %v3974_v35  ;;  %v6025_v34 = vld [vmem:[#allocation30_spill] sm:$0xff]  ;;  %v6026_v35 = vld [vmem:[#allocation31_spill] sm:$0xff] }
 0x169   :  { %1198 = vmatpush1.bf16.msra.mxu0 %v3978_v36  ;;  %1239 = vmatpush1.bf16.msra.mxu1 %v3980_v37  ;;  %v6027_v36 = vld [vmem:[#allocation32_spill] sm:$0xff]  ;;  %v6028_v37 = vld [vmem:[#allocation33_spill] sm:$0xff] }
 0x16a   :  { %1199 = vmatprep.subr.bf16.mxu0 %v3984_v38  ;;  %1240 = vmatprep.subr.bf16.mxu1 %v3988_v39  ;;  %v6029_v38 = vld [vmem:[#allocation34_spill] sm:$0xff]  ;;  %v6030_v39 = vld [vmem:[#allocation35_spill] sm:$0xff] }
 0x16d   :  { %1200 = vmatpush1.bf16.msra.mxu0 %v3995_v41  ;;  %1241 = vmatpush1.bf16.msra.mxu1 %v3997_v42  ;;  %v6031_v41 = vld [vmem:[#allocation36_spill] sm:$0xff]  ;;  %v6032_v42 = vld [vmem:[#allocation37_spill] sm:$0xff] }
 0x16e   :  { %1201 = vmatprep.subr.bf16.mxu0 %v3999_v43  ;;  %1242 = vmatprep.subr.bf16.mxu1 %v4001_v44  ;;  %v6033_v43 = vld [vmem:[#allocation38_spill] sm:$0xff]  ;;  %v6034_v44 = vld [vmem:[#allocation39_spill] sm:$0xff] }
 0x171   :  { %1202 = vmatpush1.bf16.msra.mxu0 %v4007_v45  ;;  %1243 = vmatpush1.bf16.msra.mxu1 %v4009_v46  ;;  %v6035_v45 = vld [vmem:[#allocation40_spill] sm:$0xff]  ;;  %v6036_v46 = vld [vmem:[#allocation41_spill] sm:$0xff] }
 0x172   :  { %1299 = vmatprep.subr.bf16.mxu0 %v4023_v47  ;;  %1340 = vmatprep.subr.bf16.mxu1 %v4025_v48 }
 0x174   :  { %1220 = vmatmul.mubr.bf16.vlgmr.msra.gmra.mrb[24].mxu0 %v752_v63  ;;  %1261 = vmatmul.mubr.bf16.vlgmr.msra.gmra.mrb[24].mxu1 %v752_v63  ;;  %v6059_v63 = vld [vmem:[#allocation64_spill] sm:$0xff] }
 0x175   :  { %1300 = vmatpush1.bf16.msra.mxu0 %v4027_v49  ;;  %1341 = vmatpush1.bf16.msra.mxu1 %v4029_v50 }
 0x176   :  { %1301 = vmatprep.subr.bf16.mxu0 %v4035_v51  ;;  %1342 = vmatprep.subr.bf16.mxu1 %v4037_v52 }
 0x179   :  { %1302 = vmatpush1.bf16.msra.mxu0 %v4039_v53  ;;  %1343 = vmatpush1.bf16.msra.mxu1 %v4041_v54 }
 0x17a   :  { %1303 = vmatprep.subr.bf16.mxu0 %v4047_v55  ;;  %1344 = vmatprep.subr.bf16.mxu1 %v6007_v14 }
 0x17d   :  { %1304 = vmatpush1.bf16.msra.mxu0 %v6008_v15  ;;  %1345 = vmatpush1.bf16.msra.mxu1 %v6009_v16 }
 0x17e   :  { %1305 = vmatprep.subr.bf16.mxu0 %v6010_v17  ;;  %1346 = vmatprep.subr.bf16.mxu1 %v6011_v18 }
 0x181   :  { %1306 = vmatpush1.bf16.msra.mxu0 %v6012_v19  ;;  %1347 = vmatpush1.bf16.msra.mxu1 %v6013_v20 }
 0x182   :  { %1307 = vmatprep.subr.bf16.mxu0 %v6014_v21  ;;  %1348 = vmatprep.subr.bf16.mxu1 %v6015_v23 }
 0x185   :  { %1308 = vmatpush1.bf16.msra.mxu0 %v6016_v24  ;;  %1349 = vmatpush1.bf16.msra.mxu1 %v6017_v25 }
 0x186   :  { %1309 = vmatprep.subr.bf16.mxu0 %v6018_v26  ;;  %1350 = vmatprep.subr.bf16.mxu1 %v6019_v27 }
 0x189   :  { %1310 = vmatpush1.bf16.msra.mxu0 %v6020_v28  ;;  %1351 = vmatpush1.bf16.msra.mxu1 %v6021_v29 }
 0x18a   :  { %1311 = vmatprep.subr.bf16.mxu0 %v6022_v30  ;;  %1352 = vmatprep.subr.bf16.mxu1 %v6023_v32 }
 0x18d   :  { %1312 = vmatpush1.bf16.msra.mxu0 %v6024_v33  ;;  %1353 = vmatpush1.bf16.msra.mxu1 %v6025_v34 }
 0x18e   :  { %1313 = vmatprep.subr.bf16.mxu0 %v6026_v35  ;;  %1354 = vmatprep.subr.bf16.mxu1 %v6027_v36 }
 0x191   :  { %1314 = vmatpush1.bf16.msra.mxu0 %v6028_v37  ;;  %1355 = vmatpush1.bf16.msra.mxu1 %v6029_v38 }
 0x192   :  { %1315 = vmatprep.subr.bf16.mxu0 %v6030_v39  ;;  %1356 = vmatprep.subr.bf16.mxu1 %v6031_v41 }
 0x195   :  { %1316 = vmatpush1.bf16.msra.mxu0 %v6032_v42  ;;  %1357 = vmatpush1.bf16.msra.mxu1 %v6033_v43 }
 0x196   :  { %1317 = vmatprep.subr.bf16.mxu0 %v6034_v44  ;;  %1358 = vmatprep.subr.bf16.mxu1 %v6035_v45 }
 0x199   :  { %1318 = vmatpush1.bf16.msra.mxu0 %v6036_v46  ;;  %1359 = vmatpush1.bf16.msra.mxu1 %v6037_v6 }
 0x19a   :  { %1319 = vmatprep.subr.bf16.mxu0 %v6038_v2  ;;  %1360 = vmatprep.subr.bf16.mxu1 %v6039_v1 }
 0x19d   :  { %1320 = vmatpush1.bf16.msra.mxu0 %v6040_v7  ;;  %1361 = vmatpush1.bf16.msra.mxu1 %v6041_v11 }
 0x19e   :  { %1321 = vmatprep.subr.bf16.mxu0 %v6042_v3  ;;  %1362 = vmatprep.subr.bf16.mxu1 %v6043_v8 }
 0x1a1   :  { %1322 = vmatpush1.bf16.msra.mxu0 %v6044_v12  ;;  %1363 = vmatpush1.bf16.msra.mxu1 %v6045_v4 }
 0x1a2   :  { %1323 = vmatprep.subr.bf16.mxu0 %v6046_v22  ;;  %1364 = vmatprep.subr.bf16.mxu1 %v6047_v0 }
 0x1a5   :  { %1324 = vmatpush1.bf16.msra.mxu0 %v6048_v31  ;;  %1365 = vmatpush1.bf16.msra.mxu1 %v6049_v59  ;;  %v6060_v59 = vld [vmem:[#allocation65_spill] sm:$0xff] }
 0x1a6   :  { %1325 = vmatprep.subr.bf16.mxu0 %v6050_v40  ;;  %1366 = vmatprep.subr.bf16.mxu1 %v6051_v13  ;;  %v6061_v40 = vld [vmem:[#allocation66_spill] sm:$0xff]  ;;  %v4415_v13 = vld [vmem:[#allocation3 + $0x4] ss:$16 sps:$4 sm:$0xff]  }
 0x1a7   :  { %6062 = vst [vmem:[#allocation12_spill] sm:$0xff] %v4415_v13 }
 0x1a9   :  { %1326 = vmatpush1.bf16.msra.mxu0 %v6052_v61  ;;  %1367 = vmatpush1.bf16.msra.mxu1 %v6053_v57  ;;  %v4418_v57 = vld [vmem:[#allocation3 + $0xc] ss:$16 sps:$4 sm:$0xff]  }
 0x1aa   :  { %1327 = vmatprep.subr.bf16.mxu0 %v6054_v5  ;;  %1368 = vmatprep.subr.bf16.mxu1 %v6055_v10  ;;  %6063 = vst [vmem:[#allocation13_spill] sm:$0xff] %v4418_v57 }
 0x1ad   :  { %1328 = vmatpush1.bf16.msra.mxu0 %v6056_v58  ;;  %1369 = vmatpush1.bf16.msra.mxu1 %v6057_v9  ;;  %v453_v9 = vld [vmem:[%s5575_s5] sm:$0xf] }
 0x1ae   :  { %1329 = vmatprep.subr.bf16.mxu0 %v6058_v62  ;;  %1370 = vmatprep.subr.bf16.mxu1 %v6059_v63  ;;  %v6064_v58 = vld [vmem:[#allocation67_spill] sm:$0xff] }
 0x1af   :  { %v6065_v62 = vsub.s32 0, %v6064_v58 }
 0x1b1   :  { %1330 = vmatpush1.bf16.msra.mxu0 %v6060_v59  ;;  %1371 = vmatpush1.bf16.msra.mxu1 %v6061_v40  ;;  %v4426_v10 = vrot.slane %v453_v9, %v6065_v62  ;;  %v6067_v59 = vsub.s32 1, %v6064_v58  ;;  %v6069_v62 = vsub.s32 3, %v6064_v58 }
 0x1b2   :  { %1412 = vmatprep.subr.bf16.mxu0 %v4415_v13  ;;  %1453 = vmatprep.subr.bf16.mxu1 %v4418_v57 }
 0x1b3   :  { %6066 = vst [vmem:[#allocation14_spill] sm:$0xff] %v4426_v10  ;;  %v4430_v63 = vrot.slane %v453_v9, %v6067_v59  ;;  %v4436_v11 = vrot.slane %v453_v9, %v6069_v62 }
 0x1b5   :  { %6068 = vst [vmem:[#allocation15_spill] sm:$0xff] %v4430_v63  ;;  %6070 = vst [vmem:[#allocation16_spill] sm:$0xff] %v4436_v11 }
 0x227   :  { %v1108_v40 = vpop.f32.mrb[20].mxu0  ;;  %v1149_v5 = vpop.f32.mrb[20].mxu1 }
 0x228   :  { %v1109_v13 = vadd.f32 %v1108_v40, %v4426_v10  ;;  %v1110_v61 = vpop.f32.mrb[21].mxu0  ;;  %v1151_v31 = vpop.f32.mrb[21].mxu1  ;;  %v6071_v40 = vsub.s32 2, %v6064_v58 }
 0x229   :  { %v1111_v57 = vadd.f32 %v1110_v61, %v4430_v63  ;;  %v1112_v0 = vpop.f32.mrb[22].mxu0  ;;  %v1153_v22 = vpop.f32.mrb[22].mxu1  ;;  %v1152_v59 = vadd.f32 %v1151_v31, %v4436_v11  ;;  %v6077_v11 = vld [vmem:[#allocation71_spill] sm:$0xff] }
 0x22a   :  { %v3013_v4 = vmul.f32 -1.442695, %v1109_v13  ;;  %v1113_v12 = vpop.f32.mrb[23].mxu0  ;;  %v1154_v8 = vpop.f32.mrb[23].mxu1  ;;  %v4441_v10 = vrot.slane %v453_v9, %v6071_v40 }
 0x22b   :  { %v3014_v3 = vmul.f32 -1.442695, %v1111_v57  ;;  %v3015_v7 = vmul.f32 -1.442695, %v1152_v59 }
 0x22c   :  { %3289 = vpow2.f32 %v3013_v4  ;;  %6072 = vst [vmem:[#allocation17_spill] sm:$0xff] %v4441_v10  ;;  %v1150_v0 = vadd.f32 %v1149_v5, %v4441_v10  ;;  %v6074_v5 = vld [vmem:[#allocation68_spill] sm:$0xff] }
 0x22d   :  { %3291 = vpow2.f32 %v3014_v3 }
 0x22e   :  { %3293 = vpow2.f32 %v3015_v7 }
 0x22f   :  { %3295 = vtanh.f32 %v1150_v0 }
 0x236   :  { %v3290_v22 = vpop.eup %3289 }
 0x237   :  { %v3292_v13 = vpop.eup %3291  ;;  %v1159_v12 = vadd.f32 1.0, %v3290_v22  ;;  %v6075_v22 = vld [vmem:[#allocation69_spill] sm:$0xff] }
 0x238   :  { %v1165_v8 = vadd.f32 1.0, %v3292_v13  ;;  %v3294_v61 = vpop.eup %3293 }
 0x239   :  { %3297 = vrcp.f32 %v1159_v12  ;;  %v3296_v4 = vpop.eup %3295  ;;  %v1172_v62 = vadd.f32 1.0, %v3294_v61  ;;  %v6076_v12 = vld [vmem:[#allocation70_spill] sm:$0xff] }
 0x23a   :  { %3299 = vrcp.f32 %v1165_v8 }
 0x23b   :  { %3301 = vrcp.f32 %v1172_v62 }
 0x243   :  { %v3298_v3 = vpop.eup %3297 }
 0x244   :  { %v3300_v57 = vpop.eup %3299  ;;  %v1176_v31 = vmul.f32 %v3298_v3, %v3296_v4 }
 0x245   :  { %v1175_v58 = vmul.f32 0.0, %v3300_v57  ;;  %v3302_v62 = vpop.eup %3301 }
 0x247   :  { %v4444_v9 = vadd.f32 %v1176_v31, %v1175_v58  ;;  %v1221_v59 = vpop.f32.mrb[24].mxu0  ;;  %v1262_v40 = vpop.f32.mrb[24].mxu1 }
 0x248   :  { %v1269_v10 = vadd.f32 %v1221_v59, %v6074_v5  ;;  %v1271_v7 = vadd.f32 %v1262_v40, %v6075_v22  ;;  %v1223_v0 = vpop.f32.mrb[25].mxu0  ;;  %v1264_v13 = vpop.f32.mrb[25].mxu1 }
 0x249   :  { %6073 = vst [vmem:[#allocation18_spill] sm:$0xff] %v4444_v9  ;;  %3303 = vtanh.f32 %v4444_v9  ;;  %v1270_v8 = vadd.f32 %v1223_v0, %v6076_v12  ;;  %v1272_v63 = vadd.f32 %v1264_v13, %v6077_v11  ;;  %v1225_v4 = vpop.f32.mrb[26].mxu0  ;;  %v1266_v61 = vpop.f32.mrb[26].mxu1 }
 0x24a   :  { %v3016_v3 = vmul.f32 -1.442695, %v1269_v10  ;;  %v1226_v57 = vpop.f32.mrb[27].mxu0  ;;  %v1267_v31 = vpop.f32.mrb[27].mxu1 }
 0x24b   :  { %v3017_v58 = vmul.f32 -1.442695, %v1270_v8  ;;  %v3018_v5 = vmul.f32 -1.442695, %v1272_v63  ;;  %v4468_v31 = vld [vmem:[#allocation3 + $0x2c] ss:$16 sps:$4 sm:$0xff]  }
 0x24c   :  { %3305 = vpow2.f32 %v3016_v3 }
 0x24d   :  { %3307 = vpow2.f32 %v3017_v58  ;;  %v4473_v58 = vld [vmem:[#allocation3 + $0x20] ss:$16 sps:$4 sm:$0xff]  }
 0x24e   :  { %3309 = vpow2.f32 %v3018_v5  ;;  %v4482_v5 = vld [vmem:[#allocation3 + $0x4c] ss:$16 sps:$4 sm:$0xff]  }
 0x24f   :  { %3311 = vtanh.f32 %v1271_v7 }
 0x253   :  { %v3304_v59 = vpop.eup %3303 }
 0x254   :  { %v1179_v40 = vmul.f32 %v3304_v59, %v3302_v62  ;;  %v4476_v62 = vld [vmem:[#allocation3 + $0x28] ss:$16 sps:$4 sm:$0xff]   ;;  %v4479_v59 = vld [vmem:[#allocation3 + $0x44] ss:$16 sps:$4 sm:$0xff]  }
 0x256   :  { %v3306_v22 = vpop.eup %3305  ;;  %v1298_v1 = vpack.c.bf16 %v1179_v40, %v1179_v40  ;;  %v4485_v40 = vld [vmem:[#allocation3 + $0x40] ss:$16 sps:$4 sm:$0xff]  }
 0x257   :  { %v3308_v2 = vpop.eup %3307  ;;  %v1276_v9 = vadd.f32 1.0, %v3306_v22  ;;  %v4488_v22 = vld [vmem:[#allocation3 + $0x48] ss:$16 sps:$4 sm:$0xff]  }
 0x258   :  { %v1282_v0 = vadd.f32 1.0, %v3308_v2  ;;  %1331 = vmatprep.mubr.bf16.mxu0 %v1298_v1  ;;  %1372 = vmatprep.mubr.bf16.mxu1 %v1298_v1  ;;  %v3310_v11 = vpop.eup %3309  ;;  %v4459_v1 = vld [vmem:[#allocation3] ss:$16 sps:$4 sm:$0xff]  }
 0x259   :  { %3313 = vrcp.f32 %v1276_v9  ;;  %v3312_v10 = vpop.eup %3311  ;;  %v1289_v4 = vadd.f32 1.0, %v3310_v11  ;;  %v4462_v9 = vld [vmem:[#allocation3 + $0x8] ss:$16 sps:$4 sm:$0xff]   ;;  %v4494_v11 = vld [vmem:[#allocation3 + $0x6c] ss:$16 sps:$4 sm:$0xff]  }
 0x25a   :  { %3315 = vrcp.f32 %v1282_v0  ;;  %v4491_v0 = vld [vmem:[#allocation3 + $0x64] ss:$16 sps:$4 sm:$0xff]  }
 0x25b   :  { %3317 = vrcp.f32 %v1289_v4  ;;  %v4509_v4 = vld [vmem:[#allocation3 + $0x80] ss:$16 sps:$4 sm:$0xff]  }
 0x25c   :  { %6079 = vst [vmem:[#allocation20_spill] sm:$0xff] %v4509_v4 }
 0x263   :  { %v3314_v13 = vpop.eup %3313 }
 0x264   :  { %v3316_v12 = vpop.eup %3315  ;;  %v1293_v8 = vmul.f32 %v3314_v13, %v3312_v10  ;;  %v4497_v10 = vld [vmem:[#allocation3 + $0x60] ss:$16 sps:$4 sm:$0xff]   ;;  %v4500_v13 = vld [vmem:[#allocation3 + $0x68] ss:$16 sps:$4 sm:$0xff]  }
 0x265   :  { %v1292_v63 = vmul.f32 %v3316_v12, %v4316_v56  ;;  %v3318_v3 = vpop.eup %3317  ;;  %v4465_v56 = vld [vmem:[#allocation3 + $0x24] ss:$16 sps:$4 sm:$0xff]  }
 0x266   :  { %v4503_v12 = vld [vmem:[#allocation3 + $0x84] ss:$16 sps:$4 sm:$0xff]  }
 0x267   :  { %v4452_v61 = vadd.f32 %v1293_v8, %v1292_v63  ;;  %v4506_v8 = vld [vmem:[#allocation3 + $0x8c] ss:$16 sps:$4 sm:$0xff]   ;;  %v4512_v63 = vld [vmem:[#allocation3 + $0x88] ss:$16 sps:$4 sm:$0xff]  }
 0x268   :  { %6078 = vst [vmem:[#allocation19_spill] sm:$0xff] %v4506_v8  ;;  %6080 = vst [vmem:[#allocation21_spill] sm:$0xff] %v4512_v63 }
 0x269   :  { %3319 = vtanh.f32 %v4452_v61 }
 0x273   :  { %v3320_v7 = vpop.eup %3319 }
 0x274   :  { %v1296_v2 = vmul.f32 %v3320_v7, %v3318_v3  ;;  %v4515_v3 = vld [vmem:[#allocation3 + $0xa4] ss:$16 sps:$4 sm:$0xff]   ;;  %v4518_v7 = vld [vmem:[#allocation3 + $0xac] ss:$16 sps:$4 sm:$0xff]  }
 0x275   :  { %6081 = vst [vmem:[#allocation22_spill] sm:$0xff] %v4515_v3  ;;  %6082 = vst [vmem:[#allocation23_spill] sm:$0xff] %v4518_v7 }
 0x276   :  { %v4455_v57 = vpack.c.bf16 %v1296_v2, %v1296_v2  ;;  %v4521_v2 = vld [vmem:[#allocation3 + $0xa0] ss:$16 sps:$4 sm:$0xff]  }
 0x277   :  { %6083 = vst [vmem:[#allocation24_spill] sm:$0xff] %v4521_v2 }
 0x278   :  { %1332 = vmatmul.mubr.bf16.vlgmr.msra.gmra.mrb[28].mxu0 %v4455_v57  ;;  %1373 = vmatmul.mubr.bf16.vlgmr.msra.gmra.mrb[28].mxu1 %v4455_v57 }
 0x279   :  { %1413 = vmatpush1.bf16.msra.mxu0 %v4459_v1  ;;  %1454 = vmatpush1.bf16.msra.mxu1 %v4462_v9 }
 0x27a   :  { %1414 = vmatprep.subr.bf16.mxu0 %v4465_v56  ;;  %1455 = vmatprep.subr.bf16.mxu1 %v4468_v31 }
 0x27b   :  { %1444 = vmatprep.mubr.bf16.mxu0 %v6006_v60  ;;  %1485 = vmatprep.mubr.bf16.mxu1 %v6006_v60 }
 0x27d   :  { %1415 = vmatpush1.bf16.msra.mxu0 %v4473_v58  ;;  %1456 = vmatpush1.bf16.msra.mxu1 %v4476_v62 }
 0x27e   :  { %1416 = vmatprep.subr.bf16.mxu0 %v4479_v59  ;;  %1457 = vmatprep.subr.bf16.mxu1 %v4482_v5 }
 0x281   :  { %1417 = vmatpush1.bf16.msra.mxu0 %v4485_v40  ;;  %1458 = vmatpush1.bf16.msra.mxu1 %v4488_v22 }
 0x282   :  { %1418 = vmatprep.subr.bf16.mxu0 %v4491_v0  ;;  %1459 = vmatprep.subr.bf16.mxu1 %v4494_v11 }
 0x285   :  { %1419 = vmatpush1.bf16.msra.mxu0 %v4497_v10  ;;  %1460 = vmatpush1.bf16.msra.mxu1 %v4500_v13 }
 0x286   :  { %1420 = vmatprep.subr.bf16.mxu0 %v4503_v12  ;;  %1461 = vmatprep.subr.bf16.mxu1 %v4506_v8  ;;  %v4524_v8 = vld [vmem:[#allocation3 + $0xa8] ss:$16 sps:$4 sm:$0xff]  }
 0x287   :  { %6084 = vst [vmem:[#allocation25_spill] sm:$0xff] %v4524_v8 }
 0x289   :  { %1421 = vmatpush1.bf16.msra.mxu0 %v4509_v4  ;;  %1462 = vmatpush1.bf16.msra.mxu1 %v4512_v63  ;;  %v4527_v4 = vld [vmem:[#allocation3 + $0xc4] ss:$16 sps:$4 sm:$0xff]   ;;  %v4530_v63 = vld [vmem:[#allocation3 + $0xcc] ss:$16 sps:$4 sm:$0xff]  }
 0x28a   :  { %1422 = vmatprep.subr.bf16.mxu0 %v4515_v3  ;;  %1463 = vmatprep.subr.bf16.mxu1 %v4518_v7  ;;  %6085 = vst [vmem:[#allocation26_spill] sm:$0xff] %v4527_v4  ;;  %6086 = vst [vmem:[#allocation27_spill] sm:$0xff] %v4530_v63  ;;  %v4533_v3 = vld [vmem:[#allocation3 + $0xc0] ss:$16 sps:$4 sm:$0xff]   ;;  %v4536_v7 = vld [vmem:[#allocation3 + $0xc8] ss:$16 sps:$4 sm:$0xff]  }
 0x28d   :  { %1423 = vmatpush1.bf16.msra.mxu0 %v4521_v2  ;;  %1464 = vmatpush1.bf16.msra.mxu1 %v4524_v8  ;;  %v4539_v2 = vld [vmem:[#allocation3 + $0xe4] ss:$16 sps:$4 sm:$0xff]   ;;  %v4542_v8 = vld [vmem:[#allocation3 + $0xec] ss:$16 sps:$4 sm:$0xff]  }
 0x28e   :  { %1424 = vmatprep.subr.bf16.mxu0 %v4527_v4  ;;  %1465 = vmatprep.subr.bf16.mxu1 %v4530_v63  ;;  %v4545_v4 = vld [vmem:[#allocation3 + $0xe0] ss:$16 sps:$4 sm:$0xff]   ;;  %v4548_v63 = vld [vmem:[#allocation3 + $0xe8] ss:$16 sps:$4 sm:$0xff]  }
 0x291   :  { %1425 = vmatpush1.bf16.msra.mxu0 %v4533_v3  ;;  %1466 = vmatpush1.bf16.msra.mxu1 %v4536_v7 }
 0x292   :  { %1426 = vmatprep.subr.bf16.mxu0 %v4539_v2  ;;  %1467 = vmatprep.subr.bf16.mxu1 %v4542_v8 }
 0x295   :  { %1427 = vmatpush1.bf16.msra.mxu0 %v4545_v4  ;;  %1468 = vmatpush1.bf16.msra.mxu1 %v4548_v63 }
 0x296   :  { %1524 = vmatprep.subr.bf16.mxu0 %v4023_v47  ;;  %1565 = vmatprep.subr.bf16.mxu1 %v4025_v48  ;;  %v6087_v47 = vld [vmem:[#allocation43_spill] sm:$0xff]  ;;  %v6088_v48 = vld [vmem:[#allocation44_spill] sm:$0xff] }
 0x298   :  { %1445 = vmatmul.mubr.bf16.vlgmr.msra.gmra.mrb[32].mxu0 %v4455_v57  ;;  %1486 = vmatmul.mubr.bf16.vlgmr.msra.gmra.mrb[32].mxu1 %v4455_v57  ;;  %v6115_v57 = vld [vmem:[#allocation16_spill] sm:$0xff] }
 0x299   :  { %1525 = vmatpush1.bf16.msra.mxu0 %v4027_v49  ;;  %1566 = vmatpush1.bf16.msra.mxu1 %v4029_v50  ;;  %v6089_v49 = vld [vmem:[#allocation45_spill] sm:$0xff]  ;;  %v6090_v50 = vld [vmem:[#allocation46_spill] sm:$0xff] }
 0x29a   :  { %1526 = vmatprep.subr.bf16.mxu0 %v4035_v51  ;;  %1567 = vmatprep.subr.bf16.mxu1 %v4037_v52  ;;  %v6091_v51 = vld [vmem:[#allocation47_spill] sm:$0xff]  ;;  %v6092_v52 = vld [vmem:[#allocation48_spill] sm:$0xff] }
 0x29d   :  { %1527 = vmatpush1.bf16.msra.mxu0 %v4039_v53  ;;  %1568 = vmatpush1.bf16.msra.mxu1 %v4041_v54  ;;  %v6093_v53 = vld [vmem:[#allocation49_spill] sm:$0xff]  ;;  %v6094_v54 = vld [vmem:[#allocation50_spill] sm:$0xff] }
 0x29e   :  { %1528 = vmatprep.subr.bf16.mxu0 %v4047_v55  ;;  %1569 = vmatprep.subr.bf16.mxu1 %v6007_v14  ;;  %v6095_v55 = vld [vmem:[#allocation51_spill] sm:$0xff]  ;;  %v6096_v14 = vld [vmem:[#allocation52_spill] sm:$0xff] }
 0x2a1   :  { %1529 = vmatpush1.bf16.msra.mxu0 %v6008_v15  ;;  %1570 = vmatpush1.bf16.msra.mxu1 %v6009_v16  ;;  %v6097_v15 = vld [vmem:[#allocation53_spill] sm:$0xff]  ;;  %v6098_v16 = vld [vmem:[#allocation54_spill] sm:$0xff] }
 0x2a2   :  { %1530 = vmatprep.subr.bf16.mxu0 %v6010_v17  ;;  %1571 = vmatprep.subr.bf16.mxu1 %v6011_v18  ;;  %v6099_v17 = vld [vmem:[#allocation55_spill] sm:$0xff]  ;;  %v6100_v18 = vld [vmem:[#allocation56_spill] sm:$0xff] }
 0x2a5   :  { %1531 = vmatpush1.bf16.msra.mxu0 %v6012_v19  ;;  %1572 = vmatpush1.bf16.msra.mxu1 %v6013_v20  ;;  %v6101_v19 = vld [vmem:[#allocation57_spill] sm:$0xff]  ;;  %v6102_v20 = vld [vmem:[#allocation58_spill] sm:$0xff] }
 0x2a6   :  { %1532 = vmatprep.subr.bf16.mxu0 %v6014_v21  ;;  %1573 = vmatprep.subr.bf16.mxu1 %v6015_v23  ;;  %v6103_v21 = vld [vmem:[#allocation59_spill] sm:$0xff]  ;;  %v6104_v23 = vld [vmem:[#allocation60_spill] sm:$0xff] }
 0x2a9   :  { %1533 = vmatpush1.bf16.msra.mxu0 %v6016_v24  ;;  %1574 = vmatpush1.bf16.msra.mxu1 %v6017_v25  ;;  %v6105_v24 = vld [vmem:[#allocation61_spill] sm:$0xff]  ;;  %v6106_v25 = vld [vmem:[#allocation62_spill] sm:$0xff] }
 0x2aa   :  { %1534 = vmatprep.subr.bf16.mxu0 %v6018_v26  ;;  %1575 = vmatprep.subr.bf16.mxu1 %v6019_v27  ;;  %v6107_v26 = vld [vmem:[#allocation63_spill] sm:$0xff]  ;;  %v6108_v27 = vld [vmem:[#allocation64_spill] sm:$0xff] }
 0x2ad   :  { %1535 = vmatpush1.bf16.msra.mxu0 %v6020_v28  ;;  %1576 = vmatpush1.bf16.msra.mxu1 %v6021_v29  ;;  %v6109_v28 = vld [vmem:[#allocation65_spill] sm:$0xff]  ;;  %v6110_v29 = vld [vmem:[#allocation66_spill] sm:$0xff] }
 0x2ae   :  { %1536 = vmatprep.subr.bf16.mxu0 %v6022_v30  ;;  %1577 = vmatprep.subr.bf16.mxu1 %v6023_v32  ;;  %v6111_v30 = vld [vmem:[#allocation12_spill] sm:$0xff]  ;;  %v6112_v32 = vld [vmem:[#allocation13_spill] sm:$0xff] }
 0x2b1   :  { %1537 = vmatpush1.bf16.msra.mxu0 %v6024_v33  ;;  %1578 = vmatpush1.bf16.msra.mxu1 %v6025_v34 }
 0x2b2   :  { %1538 = vmatprep.subr.bf16.mxu0 %v6026_v35  ;;  %1579 = vmatprep.subr.bf16.mxu1 %v6027_v36  ;;  %v6113_v35 = vld [vmem:[#allocation14_spill] sm:$0xff] }
 0x2b5   :  { %1539 = vmatpush1.bf16.msra.mxu0 %v6028_v37  ;;  %1580 = vmatpush1.bf16.msra.mxu1 %v6029_v38 }
 0x2b6   :  { %1540 = vmatprep.subr.bf16.mxu0 %v6030_v39  ;;  %1581 = vmatprep.subr.bf16.mxu1 %v6031_v41  ;;  %v6114_v39 = vld [vmem:[#allocation15_spill] sm:$0xff] }
 0x2b9   :  { %1541 = vmatpush1.bf16.msra.mxu0 %v6032_v42  ;;  %1582 = vmatpush1.bf16.msra.mxu1 %v6033_v43 }
 0x2ba   :  { %1542 = vmatprep.subr.bf16.mxu0 %v6034_v44  ;;  %1583 = vmatprep.subr.bf16.mxu1 %v6035_v45 }
 0x2bd   :  { %1543 = vmatpush1.bf16.msra.mxu0 %v6036_v46  ;;  %1584 = vmatpush1.bf16.msra.mxu1 %v6037_v6 }
 0x2be   :  { %1544 = vmatprep.subr.bf16.mxu0 %v6087_v47  ;;  %1585 = vmatprep.subr.bf16.mxu1 %v6088_v48 }
 0x2c1   :  { %1545 = vmatpush1.bf16.msra.mxu0 %v6089_v49  ;;  %1586 = vmatpush1.bf16.msra.mxu1 %v6090_v50  ;;  %v6116_v49 = vld [vmem:[#allocation17_spill] sm:$0xff] }
 0x2c2   :  { %1546 = vmatprep.subr.bf16.mxu0 %v6091_v51  ;;  %1587 = vmatprep.subr.bf16.mxu1 %v6092_v52 }
 0x2c5   :  { %1547 = vmatpush1.bf16.msra.mxu0 %v6093_v53  ;;  %1588 = vmatpush1.bf16.msra.mxu1 %v6094_v54 }
 0x2c6   :  { %1548 = vmatprep.subr.bf16.mxu0 %v6095_v55  ;;  %1589 = vmatprep.subr.bf16.mxu1 %v6096_v14 }
 0x2c9   :  { %1549 = vmatpush1.bf16.msra.mxu0 %v6097_v15  ;;  %1590 = vmatpush1.bf16.msra.mxu1 %v6098_v16 }
 0x2ca   :  { %1550 = vmatprep.subr.bf16.mxu0 %v6099_v17  ;;  %1591 = vmatprep.subr.bf16.mxu1 %v6100_v18 }
 0x2cd   :  { %1551 = vmatpush1.bf16.msra.mxu0 %v6101_v19  ;;  %1592 = vmatpush1.bf16.msra.mxu1 %v6102_v20  ;;  %v6117_v19 = vld [vmem:[#allocation18_spill] sm:$0xff] }
 0x2ce   :  { %1552 = vmatprep.subr.bf16.mxu0 %v6103_v21  ;;  %1593 = vmatprep.subr.bf16.mxu1 %v6104_v23 }
 0x2d1   :  { %1553 = vmatpush1.bf16.msra.mxu0 %v6105_v24  ;;  %1594 = vmatpush1.bf16.msra.mxu1 %v6106_v25  ;;  %v6118_v25 = vld [vmem:[#allocation72_spill] sm:$0xff] }
 0x2d2   :  { %1554 = vmatprep.subr.bf16.mxu0 %v6107_v26  ;;  %1595 = vmatprep.subr.bf16.mxu1 %v6108_v27  ;;  %v6119_v27 = vld [vmem:[#allocation73_spill] sm:$0xff] }
 0x2d5   :  { %1555 = vmatpush1.bf16.msra.mxu0 %v6109_v28  ;;  %1596 = vmatpush1.bf16.msra.mxu1 %v6110_v29 }
 0x2d6   :  { %1637 = vmatprep.subr.bf16.mxu0 %v6111_v30  ;;  %1678 = vmatprep.subr.bf16.mxu1 %v6112_v32 }
 0x34b   :  { %v1333_v33 = vpop.f32.mrb[28].mxu0  ;;  %v1374_v34 = vpop.f32.mrb[28].mxu1 }
 0x34c   :  { %v1334_v36 = vadd.f32 %v1333_v33, %v6113_v35  ;;  %v1335_v37 = vpop.f32.mrb[29].mxu0  ;;  %v1376_v38 = vpop.f32.mrb[29].mxu1  ;;  %v1375_v50 = vadd.f32 %v1374_v34, %v6116_v49  ;;  %v6120_v34 = vld [vmem:[#allocation74_spill] sm:$0xff] }
 0x34d   :  { %v1336_v41 = vadd.f32 %v1335_v37, %v6114_v39  ;;  %v1337_v42 = vpop.f32.mrb[30].mxu0  ;;  %v1378_v43 = vpop.f32.mrb[30].mxu1  ;;  %v1377_v47 = vadd.f32 %v1376_v38, %v6115_v57  ;;  %v6121_v37 = vld [vmem:[#allocation75_spill] sm:$0xff] }
 0x34e   :  { %v3019_v44 = vmul.f32 -1.442695, %v1334_v36  ;;  %v1338_v45 = vpop.f32.mrb[31].mxu0  ;;  %v1379_v46 = vpop.f32.mrb[31].mxu1 }
 0x34f   :  { %v3020_v6 = vmul.f32 -1.442695, %v1336_v41  ;;  %v3021_v48 = vmul.f32 -1.442695, %v1377_v47 }
 0x350   :  { %3321 = vpow2.f32 %v3019_v44 }
 0x351   :  { %3323 = vpow2.f32 %v3020_v6 }
 0x352   :  { %3325 = vpow2.f32 %v3021_v48 }
 0x353   :  { %3327 = vtanh.f32 %v1375_v50 }
 0x35a   :  { %v3322_v51 = vpop.eup %3321 }
 0x35b   :  { %v3324_v52 = vpop.eup %3323  ;;  %v1384_v53 = vadd.f32 1.0, %v3322_v51 }
 0x35c   :  { %v1390_v54 = vadd.f32 1.0, %v3324_v52  ;;  %v3326_v55 = vpop.eup %3325 }
 0x35d   :  { %3329 = vrcp.f32 %v1384_v53  ;;  %v3328_v14 = vpop.eup %3327  ;;  %v1397_v18 = vadd.f32 1.0, %v3326_v55 }
 0x35e   :  { %3331 = vrcp.f32 %v1390_v54 }
 0x35f   :  { %3333 = vrcp.f32 %v1397_v18 }
 0x367   :  { %v3330_v15 = vpop.eup %3329 }
 0x368   :  { %v3332_v16 = vpop.eup %3331  ;;  %v1401_v17 = vmul.f32 %v3330_v15, %v3328_v14 }
 0x369   :  { %v1400_v20 = vmul.f32 %v3332_v16, %v6117_v19  ;;  %v3334_v6 = vpop.eup %3333 }
 0x36b   :  { %v1446_v21 = vpop.f32.mrb[32].mxu0  ;;  %v1487_v23 = vpop.f32.mrb[32].mxu1  ;;  %v4624_v24 = vadd.f32 %v1401_v17, %v1400_v20 }
 0x36c   :  { %v1494_v26 = vadd.f32 %v1446_v21, %v6118_v25  ;;  %v1496_v28 = vadd.f32 %v1487_v23, %v6119_v27  ;;  %v1448_v29 = vpop.f32.mrb[33].mxu0  ;;  %v1489_v33 = vpop.f32.mrb[33].mxu1 }
 0x36d   :  { %v1495_v36 = vadd.f32 %v1448_v29, %v6120_v34  ;;  %v1497_v38 = vadd.f32 %v1489_v33, %v6121_v37  ;;  %v1450_v41 = vpop.f32.mrb[34].mxu0  ;;  %v1491_v42 = vpop.f32.mrb[34].mxu1  ;;  %3335 = vtanh.f32 %v4624_v24  ;;  %v6124_v29 = vld [vmem:[#allocation21_spill] sm:$0xff]  ;;  %v6125_v33 = vld [vmem:[#allocation22_spill] sm:$0xff]  ;;  %v6126_v34 = vld [vmem:[#allocation23_spill] sm:$0xff] }
 0x36e   :  { %v3022_v43 = vmul.f32 -1.442695, %v1494_v26  ;;  %v1451_v44 = vpop.f32.mrb[35].mxu0  ;;  %v1492_v45 = vpop.f32.mrb[35].mxu1  ;;  %v6128_v37 = vld [vmem:[#allocation25_spill] sm:$0xff]  ;;  %v6130_v41 = vld [vmem:[#allocation27_spill] sm:$0xff] }
 0x36f   :  { %v3023_v46 = vmul.f32 -1.442695, %v1495_v36  ;;  %v3024_v48 = vmul.f32 -1.442695, %v1497_v38  ;;  %v6127_v36 = vld [vmem:[#allocation24_spill] sm:$0xff]  ;;  %v6129_v38 = vld [vmem:[#allocation26_spill] sm:$0xff] }
 0x370   :  { %3337 = vpow2.f32 %v3022_v43  ;;  %v4667_v42 = vld [vmem:[#allocation6 + $0x4] ss:$16 sps:$4 sm:$0xff]   ;;  %v4670_v43 = vld [vmem:[#allocation6 + $0xc] ss:$16 sps:$4 sm:$0xff]   ;;  %v4673_v44 = vld [vmem:[#allocation6] ss:$16 sps:$4 sm:$0xff]  }
 0x371   :  { %3339 = vpow2.f32 %v3023_v46  ;;  %v4676_v45 = vld [vmem:[#allocation6 + $0x8] ss:$16 sps:$4 sm:$0xff]   ;;  %v4679_v46 = vld [vmem:[#allocation6 + $0x24] ss:$16 sps:$4 sm:$0xff]  }
 0x372   :  { %3341 = vpow2.f32 %v3024_v48  ;;  %v4688_v48 = vld [vmem:[#allocation6 + $0x28] ss:$16 sps:$4 sm:$0xff]  }
 0x373   :  { %3343 = vtanh.f32 %v1496_v28  ;;  %v6123_v28 = vld [vmem:[#allocation20_spill] sm:$0xff] }
 0x377   :  { %v3336_v47 = vpop.eup %3335 }
 0x378   :  { %v1404_v50 = vmul.f32 %v3336_v47, %v3334_v6  ;;  %v4682_v6 = vld [vmem:[#allocation6 + $0x2c] ss:$16 sps:$4 sm:$0xff]   ;;  %v4685_v47 = vld [vmem:[#allocation6 + $0x20] ss:$16 sps:$4 sm:$0xff]  }
 0x37a   :  { %v3338_v51 = vpop.eup %3337  ;;  %v1523_v52 = vpack.c.bf16 %v1404_v50, %v1404_v50  ;;  %v4691_v50 = vld [vmem:[#allocation6 + $0x44] ss:$16 sps:$4 sm:$0xff]  }
 0x37b   :  { %v3340_v53 = vpop.eup %3339  ;;  %v1501_v54 = vadd.f32 1.0, %v3338_v51  ;;  %v4694_v51 = vld [vmem:[#allocation6 + $0x4c] ss:$16 sps:$4 sm:$0xff]  }
 0x37c   :  { %v1507_v55 = vadd.f32 1.0, %v3340_v53  ;;  %1556 = vmatprep.mubr.bf16.mxu0 %v1523_v52  ;;  %1597 = vmatprep.mubr.bf16.mxu1 %v1523_v52  ;;  %v3342_v14 = vpop.eup %3341  ;;  %v4697_v52 = vld [vmem:[#allocation6 + $0x40] ss:$16 sps:$4 sm:$0xff]   ;;  %v4700_v53 = vld [vmem:[#allocation6 + $0x48] ss:$16 sps:$4 sm:$0xff]  }
 0x37d   :  { %3345 = vrcp.f32 %v1501_v54  ;;  %v3344_v15 = vpop.eup %3343  ;;  %v1514_v19 = vadd.f32 1.0, %v3342_v14  ;;  %6131 = vst [vmem:[#allocation28_spill] sm:$0xff] %v4697_v52  ;;  %6132 = vst [vmem:[#allocation29_spill] sm:$0xff] %v4700_v53  ;;  %v4703_v54 = vld [vmem:[#allocation6 + $0x64] ss:$16 sps:$4 sm:$0xff]  }
 0x37e   :  { %3347 = vrcp.f32 %v1507_v55  ;;  %6133 = vst [vmem:[#allocation30_spill] sm:$0xff] %v4703_v54  ;;  %v4706_v55 = vld [vmem:[#allocation6 + $0x6c] ss:$16 sps:$4 sm:$0xff]   ;;  %v4709_v14 = vld [vmem:[#allocation6 + $0x60] ss:$16 sps:$4 sm:$0xff]  }
 0x37f   :  { %3349 = vrcp.f32 %v1514_v19  ;;  %6134 = vst [vmem:[#allocation31_spill] sm:$0xff] %v4706_v55  ;;  %6135 = vst [vmem:[#allocation32_spill] sm:$0xff] %v4709_v14  ;;  %v4724_v19 = vld [vmem:[#allocation6 + $0x88] ss:$16 sps:$4 sm:$0xff]  }
 0x380   :  { %6140 = vst [vmem:[#allocation37_spill] sm:$0xff] %v4724_v19 }
 0x387   :  { %v3346_v16 = vpop.eup %3345 }
 0x388   :  { %v3348_v17 = vpop.eup %3347  ;;  %v1518_v18 = vmul.f32 %v3346_v16, %v3344_v15  ;;  %v4712_v15 = vld [vmem:[#allocation6 + $0x68] ss:$16 sps:$4 sm:$0xff]   ;;  %v4715_v16 = vld [vmem:[#allocation6 + $0x84] ss:$16 sps:$4 sm:$0xff]  }
 0x389   :  { %v1517_v20 = vmul.f32 %v3348_v17, %v4452_v61  ;;  %v3350_v23 = vpop.eup %3349  ;;  %v6122_v61 = vld [vmem:[#allocation19_spill] sm:$0xff]  ;;  %6136 = vst [vmem:[#allocation33_spill] sm:$0xff] %v4712_v15  ;;  %6137 = vst [vmem:[#allocation34_spill] sm:$0xff] %v4715_v16  ;;  %v4718_v17 = vld [vmem:[#allocation6 + $0x8c] ss:$16 sps:$4 sm:$0xff]  }
 0x38a   :  { %6138 = vst [vmem:[#allocation35_spill] sm:$0xff] %v4718_v17 }
 0x38b   :  { %v4632_v21 = vadd.f32 %v1518_v18, %v1517_v20  ;;  %v4721_v18 = vld [vmem:[#allocation6 + $0x80] ss:$16 sps:$4 sm:$0xff]   ;;  %v4727_v20 = vld [vmem:[#allocation6 + $0xa4] ss:$16 sps:$4 sm:$0xff]  }
 0x38c   :  { %6139 = vst [vmem:[#allocation36_spill] sm:$0xff] %v4721_v18  ;;  %6141 = vst [vmem:[#allocation38_spill] sm:$0xff] %v4727_v20 }
 0x38d   :  { %3351 = vtanh.f32 %v4632_v21 }
 0x397   :  { %v3352_v25 = vpop.eup %3351 }
 0x398   :  { %v1521_v26 = vmul.f32 %v3352_v25, %v3350_v23  ;;  %v4730_v23 = vld [vmem:[#allocation6 + $0xac] ss:$16 sps:$4 sm:$0xff]   ;;  %v4733_v25 = vld [vmem:[#allocation6 + $0xa0] ss:$16 sps:$4 sm:$0xff]  }
 0x399   :  { %6142 = vst [vmem:[#allocation39_spill] sm:$0xff] %v4730_v23  ;;  %6143 = vst [vmem:[#allocation40_spill] sm:$0xff] %v4733_v25 }
 0x39a   :  { %v1522_v27 = vpack.c.bf16 %v1521_v26, %v1521_v26  ;;  %v4736_v26 = vld [vmem:[#allocation6 + $0xa8] ss:$16 sps:$4 sm:$0xff]  }
 0x39b   :  { %6144 = vst [vmem:[#allocation41_spill] sm:$0xff] %v4736_v26 }
 0x39c   :  { %1557 = vmatmul.mubr.bf16.vlgmr.msra.gmra.mrb[36].mxu0 %v1522_v27  ;;  %1598 = vmatmul.mubr.bf16.vlgmr.msra.gmra.mrb[36].mxu1 %v1522_v27 }
 0x39d   :  { %1638 = vmatpush1.bf16.msra.mxu0 %v4459_v1  ;;  %1679 = vmatpush1.bf16.msra.mxu1 %v4462_v9 }
 0x39e   :  { %1639 = vmatprep.subr.bf16.mxu0 %v4465_v56  ;;  %1680 = vmatprep.subr.bf16.mxu1 %v4468_v31 }
 0x39f   :  { %1669 = vmatprep.mubr.bf16.mxu0 %v6006_v60  ;;  %1710 = vmatprep.mubr.bf16.mxu1 %v6006_v60 }
 0x3a1   :  { %1640 = vmatpush1.bf16.msra.mxu0 %v4473_v58  ;;  %1681 = vmatpush1.bf16.msra.mxu1 %v4476_v62 }
 0x3a2   :  { %1641 = vmatprep.subr.bf16.mxu0 %v4479_v59  ;;  %1682 = vmatprep.subr.bf16.mxu1 %v4482_v5 }
 0x3a5   :  { %1642 = vmatpush1.bf16.msra.mxu0 %v4485_v40  ;;  %1683 = vmatpush1.bf16.msra.mxu1 %v4488_v22 }
 0x3a6   :  { %1643 = vmatprep.subr.bf16.mxu0 %v4491_v0  ;;  %1684 = vmatprep.subr.bf16.mxu1 %v4494_v11 }
 0x3a9   :  { %1644 = vmatpush1.bf16.msra.mxu0 %v4497_v10  ;;  %1685 = vmatpush1.bf16.msra.mxu1 %v4500_v13 }
 0x3aa   :  { %1645 = vmatprep.subr.bf16.mxu0 %v4503_v12  ;;  %1686 = vmatprep.subr.bf16.mxu1 %v6122_v61 }
 0x3ad   :  { %1646 = vmatpush1.bf16.msra.mxu0 %v6123_v28  ;;  %1687 = vmatpush1.bf16.msra.mxu1 %v6124_v29 }
 0x3ae   :  { %1647 = vmatprep.subr.bf16.mxu0 %v6125_v33  ;;  %1688 = vmatprep.subr.bf16.mxu1 %v6126_v34 }
 0x3b1   :  { %1648 = vmatpush1.bf16.msra.mxu0 %v6127_v36  ;;  %1689 = vmatpush1.bf16.msra.mxu1 %v6128_v37 }
 0x3b2   :  { %1649 = vmatprep.subr.bf16.mxu0 %v6129_v38  ;;  %1690 = vmatprep.subr.bf16.mxu1 %v6130_v41 }
 0x3b5   :  { %1650 = vmatpush1.bf16.msra.mxu0 %v4533_v3  ;;  %1691 = vmatpush1.bf16.msra.mxu1 %v4536_v7 }
 0x3b6   :  { %1651 = vmatprep.subr.bf16.mxu0 %v4539_v2  ;;  %1692 = vmatprep.subr.bf16.mxu1 %v4542_v8 }
 0x3b9   :  { %1652 = vmatpush1.bf16.msra.mxu0 %v4545_v4  ;;  %1693 = vmatpush1.bf16.msra.mxu1 %v4548_v63 }
 0x3ba   :  { %1749 = vmatprep.subr.bf16.mxu0 %v4667_v42  ;;  %1790 = vmatprep.subr.bf16.mxu1 %v4670_v43 }
 0x3bc   :  { %1670 = vmatmul.mubr.bf16.vlgmr.msra.gmra.mrb[40].mxu0 %v1522_v27  ;;  %1711 = vmatmul.mubr.bf16.vlgmr.msra.gmra.mrb[40].mxu1 %v1522_v27  ;;  %v4739_v27 = vld [vmem:[#allocation6 + $0xc4] ss:$16 sps:$4 sm:$0xff]  }
 0x3bd   :  { %1750 = vmatpush1.bf16.msra.mxu0 %v4673_v44  ;;  %1791 = vmatpush1.bf16.msra.mxu1 %v4676_v45  ;;  %6145 = vst [vmem:[#allocation42_spill] sm:$0xff] %v4739_v27 }
 0x3be   :  { %1751 = vmatprep.subr.bf16.mxu0 %v4679_v46  ;;  %1792 = vmatprep.subr.bf16.mxu1 %v4682_v6 }
 0x3c1   :  { %1752 = vmatpush1.bf16.msra.mxu0 %v4685_v47  ;;  %1793 = vmatpush1.bf16.msra.mxu1 %v4688_v48 }
 0x3c2   :  { %1753 = vmatprep.subr.bf16.mxu0 %v4691_v50  ;;  %1794 = vmatprep.subr.bf16.mxu1 %v4694_v51 }
 0x3c5   :  { %1754 = vmatpush1.bf16.msra.mxu0 %v4697_v52  ;;  %1795 = vmatpush1.bf16.msra.mxu1 %v4700_v53 }
 0x3c6   :  { %1755 = vmatprep.subr.bf16.mxu0 %v4703_v54  ;;  %1796 = vmatprep.subr.bf16.mxu1 %v4706_v55 }
 0x3c9   :  { %1756 = vmatpush1.bf16.msra.mxu0 %v4709_v14  ;;  %1797 = vmatpush1.bf16.msra.mxu1 %v4712_v15 }
 0x3ca   :  { %1757 = vmatprep.subr.bf16.mxu0 %v4715_v16  ;;  %1798 = vmatprep.subr.bf16.mxu1 %v4718_v17 }
 0x3cd   :  { %1758 = vmatpush1.bf16.msra.mxu0 %v4721_v18  ;;  %1799 = vmatpush1.bf16.msra.mxu1 %v4724_v19  ;;  %v4742_v19 = vld [vmem:[#allocation6 + $0xcc] ss:$16 sps:$4 sm:$0xff]  }
 0x3ce   :  { %1759 = vmatprep.subr.bf16.mxu0 %v4727_v20  ;;  %1800 = vmatprep.subr.bf16.mxu1 %v4730_v23  ;;  %6146 = vst [vmem:[#allocation67_spill] sm:$0xff] %v4742_v19  ;;  %v4745_v20 = vld [vmem:[#allocation6 + $0xc0] ss:$16 sps:$4 sm:$0xff]   ;;  %v4748_v23 = vld [vmem:[#allocation6 + $0xc8] ss:$16 sps:$4 sm:$0xff]  }
 0x3cf   :  { %6147 = vst [vmem:[#allocation68_spill] sm:$0xff] %v4745_v20  ;;  %6148 = vst [vmem:[#allocation69_spill] sm:$0xff] %v4748_v23 }
 0x3d1   :  { %1760 = vmatpush1.bf16.msra.mxu0 %v4733_v25  ;;  %1801 = vmatpush1.bf16.msra.mxu1 %v4736_v26  ;;  %v4751_v25 = vld [vmem:[#allocation6 + $0xe4] ss:$16 sps:$4 sm:$0xff]   ;;  %v4754_v26 = vld [vmem:[#allocation6 + $0xec] ss:$16 sps:$4 sm:$0xff]  }
 0x3d2   :  { %1761 = vmatprep.subr.bf16.mxu0 %v4739_v27  ;;  %1802 = vmatprep.subr.bf16.mxu1 %v4742_v19  ;;  %6149 = vst [vmem:[#allocation70_spill] sm:$0xff] %v4751_v25  ;;  %6150 = vst [vmem:[#allocation71_spill] sm:$0xff] %v4754_v26  ;;  %v4757_v27 = vld [vmem:[#allocation6 + $0xe0] ss:$16 sps:$4 sm:$0xff]   ;;  %v4760_v19 = vld [vmem:[#allocation6 + $0xe8] ss:$16 sps:$4 sm:$0xff]  }
 0x3d3   :  { %6151 = vst [vmem:[#allocation43_spill] sm:$0xff] %v4757_v27  ;;  %6152 = vst [vmem:[#allocation44_spill] sm:$0xff] %v4760_v19 }
 0x3d5   :  { %1762 = vmatpush1.bf16.msra.mxu0 %v4745_v20  ;;  %1803 = vmatpush1.bf16.msra.mxu1 %v4748_v23  ;;  %v4763_v20 = vld [vmem:[#allocation6 + $0x104] ss:$16 sps:$4 sm:$0xff]   ;;  %v4766_v23 = vld [vmem:[#allocation6 + $0x10c] ss:$16 sps:$4 sm:$0xff]  }
 0x3d6   :  { %1763 = vmatprep.subr.bf16.mxu0 %v4751_v25  ;;  %1804 = vmatprep.subr.bf16.mxu1 %v4754_v26  ;;  %6153 = vst [vmem:[#allocation45_spill] sm:$0xff] %v4763_v20  ;;  %6154 = vst [vmem:[#allocation46_spill] sm:$0xff] %v4766_v23  ;;  %v4769_v25 = vld [vmem:[#allocation6 + $0x100] ss:$16 sps:$4 sm:$0xff]   ;;  %v4772_v26 = vld [vmem:[#allocation6 + $0x108] ss:$16 sps:$4 sm:$0xff]  }
 0x3d7   :  { %6155 = vst [vmem:[#allocation47_spill] sm:$0xff] %v4769_v25  ;;  %6156 = vst [vmem:[#allocation48_spill] sm:$0xff] %v4772_v26 }
 0x3d9   :  { %1764 = vmatpush1.bf16.msra.mxu0 %v4757_v27  ;;  %1805 = vmatpush1.bf16.msra.mxu1 %v4760_v19  ;;  %v4775_v27 = vld [vmem:[#allocation6 + $0x124] ss:$16 sps:$4 sm:$0xff]   ;;  %v4778_v19 = vld [vmem:[#allocation6 + $0x12c] ss:$16 sps:$4 sm:$0xff]  }
 0x3da   :  { %1765 = vmatprep.subr.bf16.mxu0 %v4763_v20  ;;  %1806 = vmatprep.subr.bf16.mxu1 %v4766_v23  ;;  %6157 = vst [vmem:[#allocation49_spill] sm:$0xff] %v4775_v27  ;;  %6158 = vst [vmem:[#allocation50_spill] sm:$0xff] %v4778_v19  ;;  %v4781_v20 = vld [vmem:[#allocation6 + $0x120] ss:$16 sps:$4 sm:$0xff]   ;;  %v4784_v23 = vld [vmem:[#allocation6 + $0x128] ss:$16 sps:$4 sm:$0xff]  }
 0x3db   :  { %6159 = vst [vmem:[#allocation51_spill] sm:$0xff] %v4781_v20  ;;  %6160 = vst [vmem:[#allocation52_spill] sm:$0xff] %v4784_v23 }
 0x3dd   :  { %1766 = vmatpush1.bf16.msra.mxu0 %v4769_v25  ;;  %1807 = vmatpush1.bf16.msra.mxu1 %v4772_v26  ;;  %v4787_v25 = vld [vmem:[#allocation6 + $0x144] ss:$16 sps:$4 sm:$0xff]   ;;  %v4790_v26 = vld [vmem:[#allocation6 + $0x14c] ss:$16 sps:$4 sm:$0xff]  }
 0x3de   :  { %1767 = vmatprep.subr.bf16.mxu0 %v4775_v27  ;;  %1808 = vmatprep.subr.bf16.mxu1 %v4778_v19  ;;  %6161 = vst [vmem:[#allocation53_spill] sm:$0xff] %v4787_v25  ;;  %6162 = vst [vmem:[#allocation54_spill] sm:$0xff] %v4790_v26  ;;  %v4793_v27 = vld [vmem:[#allocation6 + $0x140] ss:$16 sps:$4 sm:$0xff]   ;;  %v4796_v19 = vld [vmem:[#allocation6 + $0x148] ss:$16 sps:$4 sm:$0xff]  }
 0x3df   :  { %6163 = vst [vmem:[#allocation55_spill] sm:$0xff] %v4793_v27  ;;  %6164 = vst [vmem:[#allocation56_spill] sm:$0xff] %v4796_v19 }
 0x3e1   :  { %1768 = vmatpush1.bf16.msra.mxu0 %v4781_v20  ;;  %1809 = vmatpush1.bf16.msra.mxu1 %v4784_v23  ;;  %v4799_v20 = vld [vmem:[#allocation6 + $0x164] ss:$16 sps:$4 sm:$0xff]   ;;  %v4802_v23 = vld [vmem:[#allocation6 + $0x16c] ss:$16 sps:$4 sm:$0xff]  }
 0x3e2   :  { %1769 = vmatprep.subr.bf16.mxu0 %v4787_v25  ;;  %1810 = vmatprep.subr.bf16.mxu1 %v4790_v26  ;;  %6165 = vst [vmem:[#allocation57_spill] sm:$0xff] %v4799_v20  ;;  %6166 = vst [vmem:[#allocation58_spill] sm:$0xff] %v4802_v23  ;;  %v4805_v25 = vld [vmem:[#allocation6 + $0x160] ss:$16 sps:$4 sm:$0xff]   ;;  %v4808_v26 = vld [vmem:[#allocation6 + $0x168] ss:$16 sps:$4 sm:$0xff]  }
 0x3e3   :  { %6167 = vst [vmem:[#allocation59_spill] sm:$0xff] %v4805_v25  ;;  %6168 = vst [vmem:[#allocation60_spill] sm:$0xff] %v4808_v26 }
 0x3e5   :  { %1770 = vmatpush1.bf16.msra.mxu0 %v4793_v27  ;;  %1811 = vmatpush1.bf16.msra.mxu1 %v4796_v19  ;;  %v4811_v27 = vld [vmem:[#allocation6 + $0x184] ss:$16 sps:$4 sm:$0xff]   ;;  %v4814_v19 = vld [vmem:[#allocation6 + $0x18c] ss:$16 sps:$4 sm:$0xff]  }
 0x3e6   :  { %1771 = vmatprep.subr.bf16.mxu0 %v4799_v20  ;;  %1812 = vmatprep.subr.bf16.mxu1 %v4802_v23  ;;  %6169 = vst [vmem:[#allocation61_spill] sm:$0xff] %v4811_v27  ;;  %6170 = vst [vmem:[#allocation62_spill] sm:$0xff] %v4814_v19  ;;  %v4817_v20 = vld [vmem:[#allocation6 + $0x180] ss:$16 sps:$4 sm:$0xff]   ;;  %v4820_v23 = vld [vmem:[#allocation6 + $0x188] ss:$16 sps:$4 sm:$0xff]  }
 0x3e7   :  { %6171 = vst [vmem:[#allocation63_spill] sm:$0xff] %v4817_v20  ;;  %6172 = vst [vmem:[#allocation64_spill] sm:$0xff] %v4820_v23 }
 0x3e9   :  { %1772 = vmatpush1.bf16.msra.mxu0 %v4805_v25  ;;  %1813 = vmatpush1.bf16.msra.mxu1 %v4808_v26  ;;  %v4823_v25 = vld [vmem:[#allocation6 + $0x1a4] ss:$16 sps:$4 sm:$0xff]   ;;  %v4826_v26 = vld [vmem:[#allocation6 + $0x1ac] ss:$16 sps:$4 sm:$0xff]  }
 0x3ea   :  { %1773 = vmatprep.subr.bf16.mxu0 %v4811_v27  ;;  %1814 = vmatprep.subr.bf16.mxu1 %v4814_v19  ;;  %6173 = vst [vmem:[#allocation65_spill] sm:$0xff] %v4823_v25  ;;  %6174 = vst [vmem:[#allocation66_spill] sm:$0xff] %v4826_v26  ;;  %v4829_v27 = vld [vmem:[#allocation6 + $0x1a0] ss:$16 sps:$4 sm:$0xff]   ;;  %v4832_v19 = vld [vmem:[#allocation6 + $0x1a8] ss:$16 sps:$4 sm:$0xff]  }
 0x3eb   :  { %6175 = vst [vmem:[#allocation12_spill] sm:$0xff] %v4829_v27  ;;  %6176 = vst [vmem:[#allocation13_spill] sm:$0xff] %v4832_v19 }
 0x3ed   :  { %1774 = vmatpush1.bf16.msra.mxu0 %v4817_v20  ;;  %1815 = vmatpush1.bf16.msra.mxu1 %v4820_v23  ;;  %v4835_v20 = vld [vmem:[#allocation6 + $0x1c4] ss:$16 sps:$4 sm:$0xff]   ;;  %v4838_v23 = vld [vmem:[#allocation6 + $0x1cc] ss:$16 sps:$4 sm:$0xff]  }
 0x3ee   :  { %1775 = vmatprep.subr.bf16.mxu0 %v4823_v25  ;;  %1816 = vmatprep.subr.bf16.mxu1 %v4826_v26  ;;  %6177 = vst [vmem:[#allocation18_spill] sm:$0xff] %v4835_v20  ;;  %6178 = vst [vmem:[#allocation72_spill] sm:$0xff] %v4838_v23  ;;  %v4841_v25 = vld [vmem:[#allocation6 + $0x1c0] ss:$16 sps:$4 sm:$0xff]   ;;  %v4844_v26 = vld [vmem:[#allocation6 + $0x1c8] ss:$16 sps:$4 sm:$0xff]  }
 0x3ef   :  { %6179 = vst [vmem:[#allocation73_spill] sm:$0xff] %v4841_v25  ;;  %6180 = vst [vmem:[#allocation74_spill] sm:$0xff] %v4844_v26 }
 0x3f1   :  { %1776 = vmatpush1.bf16.msra.mxu0 %v4829_v27  ;;  %1817 = vmatpush1.bf16.msra.mxu1 %v4832_v19  ;;  %v4847_v27 = vld [vmem:[#allocation6 + $0x1e4] ss:$16 sps:$4 sm:$0xff]   ;;  %v4850_v19 = vld [vmem:[#allocation6 + $0x1ec] ss:$16 sps:$4 sm:$0xff]  }
 0x3f2   :  { %1777 = vmatprep.subr.bf16.mxu0 %v4835_v20  ;;  %1818 = vmatprep.subr.bf16.mxu1 %v4838_v23  ;;  %6181 = vst [vmem:[#allocation75_spill] sm:$0xff] %v4847_v27  ;;  %6182 = vst [vmem:[#allocation19_spill] sm:$0xff] %v4850_v19  ;;  %v4853_v20 = vld [vmem:[#allocation6 + $0x1e0] ss:$16 sps:$4 sm:$0xff]   ;;  %v4856_v23 = vld [vmem:[#allocation6 + $0x1e8] ss:$16 sps:$4 sm:$0xff]  }
 0x3f3   :  { %6183 = vst [vmem:[#allocation20_spill] sm:$0xff] %v4853_v20  ;;  %6184 = vst [vmem:[#allocation21_spill] sm:$0xff] %v4856_v23 }
 0x3f5   :  { %1778 = vmatpush1.bf16.msra.mxu0 %v4841_v25  ;;  %1819 = vmatpush1.bf16.msra.mxu1 %v4844_v26 }
 0x3f6   :  { %1779 = vmatprep.subr.bf16.mxu0 %v4847_v27  ;;  %1820 = vmatprep.subr.bf16.mxu1 %v4850_v19 }
 0x3f9   :  { %1780 = vmatpush1.bf16.msra.mxu0 %v4853_v20  ;;  %1821 = vmatpush1.bf16.msra.mxu1 %v4856_v23 }
 0x3fa   :  { %1862 = vmatprep.subr.bf16.mxu0 %v6111_v30  ;;  %1903 = vmatprep.subr.bf16.mxu1 %v6112_v32 }
 0x46f   :  { %v1558_v26 = vpop.f32.mrb[36].mxu0  ;;  %v1599_v25 = vpop.f32.mrb[36].mxu1 }
 0x470   :  { %v1559_v27 = vadd.f32 %v1558_v26, %v6113_v35  ;;  %v1560_v18 = vpop.f32.mrb[37].mxu0  ;;  %v1601_v17 = vpop.f32.mrb[37].mxu1  ;;  %v1600_v32 = vadd.f32 %v1599_v25, %v6116_v49  ;;  %v6185_v25 = vld [vmem:[#allocation76_spill] sm:$0xff]  ;;  %v6188_v49 = vld [vmem:[#allocation79_spill] sm:$0xff] }
 0x471   :  { %v1561_v19 = vadd.f32 %v1560_v18, %v6114_v39  ;;  %v1562_v16 = vpop.f32.mrb[38].mxu0  ;;  %v1603_v15 = vpop.f32.mrb[38].mxu1  ;;  %v1602_v30 = vadd.f32 %v1601_v17, %v6115_v57 }
 0x472   :  { %v3025_v14 = vmul.f32 -1.442695, %v1559_v27  ;;  %v1563_v20 = vpop.f32.mrb[39].mxu0  ;;  %v1604_v55 = vpop.f32.mrb[39].mxu1 }
 0x473   :  { %v3026_v54 = vmul.f32 -1.442695, %v1561_v19  ;;  %v3027_v23 = vmul.f32 -1.442695, %v1602_v30 }
 0x474   :  { %3353 = vpow2.f32 %v3025_v14 }
 0x475   :  { %3355 = vpow2.f32 %v3026_v54 }
 0x476   :  { %3357 = vpow2.f32 %v3027_v23  ;;  %v6186_v23 = vld [vmem:[#allocation77_spill] sm:$0xff] }
 0x477   :  { %3359 = vtanh.f32 %v1600_v32 }
 0x47e   :  { %v3354_v53 = vpop.eup %3353 }
 0x47f   :  { %v3356_v52 = vpop.eup %3355  ;;  %v1609_v26 = vadd.f32 1.0, %v3354_v53 }
 0x480   :  { %v1615_v35 = vadd.f32 1.0, %v3356_v52  ;;  %v3358_v15 = vpop.eup %3357 }
 0x481   :  { %3361 = vrcp.f32 %v1609_v26  ;;  %v3360_v16 = vpop.eup %3359  ;;  %v1622_v14 = vadd.f32 1.0, %v3358_v15 }
 0x482   :  { %3363 = vrcp.f32 %v1615_v35  ;;  %v6187_v35 = vld [vmem:[#allocation78_spill] sm:$0xff] }
 0x483   :  { %3365 = vrcp.f32 %v1622_v14 }
 0x48b   :  { %v3362_v18 = vpop.eup %3361 }
 0x48c   :  { %v3364_v55 = vpop.eup %3363  ;;  %v1626_v19 = vmul.f32 %v3362_v18, %v3360_v16 }
 0x48d   :  { %v1625_v54 = vmul.f32 %v3364_v55, %v4624_v24 }
 0x48f   :  { %v1671_v17 = vpop.f32.mrb[40].mxu0  ;;  %v1712_v20 = vpop.f32.mrb[40].mxu1  ;;  %v4866_v27 = vadd.f32 %v1626_v19, %v1625_v54 }
 0x490   :  { %v1719_v53 = vadd.f32 %v1671_v17, %v6185_v25  ;;  %v1721_v30 = vadd.f32 %v1712_v20, %v6186_v23  ;;  %v1673_v52 = vpop.f32.mrb[41].mxu0  ;;  %v1714_v32 = vpop.f32.mrb[41].mxu1 }
 0x491   :  { %v1720_v26 = vadd.f32 %v1673_v52, %v6187_v35  ;;  %v1722_v57 = vadd.f32 %v1714_v32, %v6188_v49  ;;  %v1675_v39 = vpop.f32.mrb[42].mxu0  ;;  %v1716_v16 = vpop.f32.mrb[42].mxu1  ;;  %3367 = vtanh.f32 %v4866_v27 }
 0x492   :  { %v3028_v24 = vmul.f32 -1.442695, %v1719_v53  ;;  %v1676_v15 = vpop.f32.mrb[43].mxu0  ;;  %v1717_v18 = vpop.f32.mrb[43].mxu1 }
 0x493   :  { %v3029_v55 = vmul.f32 -1.442695, %v1720_v26  ;;  %v3366_v19 = vpop.eup %3365  ;;  %v3030_v54 = vmul.f32 -1.442695, %v1722_v57 }
 0x494   :  { %3369 = vpow2.f32 %v3028_v24 }
 0x495   :  { %3371 = vpow2.f32 %v3029_v55 }
 0x496   :  { %3373 = vpow2.f32 %v3030_v54  ;;  %v6222_v54 = vld [vmem:[#allocation56_spill] sm:$0xff] }
 0x497   :  { %3375 = vtanh.f32 %v1721_v30 }
 0x49b   :  { %v3368_v14 = vpop.eup %3367 }
 0x49c   :  { %v1629_v17 = vmul.f32 %v3368_v14, %v3366_v19  ;;  %v6220_v19 = vld [vmem:[#allocation54_spill] sm:$0xff]  ;;  %v6221_v14 = vld [vmem:[#allocation55_spill] sm:$0xff] }
 0x49e   :  { %v3370_v20 = vpop.eup %3369  ;;  %v1748_v25 = vpack.c.bf16 %v1629_v17, %v1629_v17  ;;  %v6223_v17 = vld [vmem:[#allocation57_spill] sm:$0xff] }
 0x49f   :  { %v3372_v23 = vpop.eup %3371  ;;  %v1726_v52 = vadd.f32 1.0, %v3370_v20  ;;  %v6224_v20 = vld [vmem:[#allocation58_spill] sm:$0xff] }
 0x4a0   :  { %v1732_v39 = vadd.f32 1.0, %v3372_v23  ;;  %1781 = vmatprep.mubr.bf16.mxu0 %v1748_v25  ;;  %1822 = vmatprep.mubr.bf16.mxu1 %v1748_v25  ;;  %v3374_v49 = vpop.eup %3373  ;;  %v6225_v25 = vld [vmem:[#allocation59_spill] sm:$0xff]  ;;  %v6226_v23 = vld [vmem:[#allocation60_spill] sm:$0xff] }
 0x4a1   :  { %3377 = vrcp.f32 %v1726_v52  ;;  %v3376_v53 = vpop.eup %3375  ;;  %v1739_v16 = vadd.f32 1.0, %v3374_v49  ;;  %v6227_v52 = vld [vmem:[#allocation61_spill] sm:$0xff]  ;;  %v6229_v49 = vld [vmem:[#allocation63_spill] sm:$0xff] }
 0x4a2   :  { %3379 = vrcp.f32 %v1732_v39  ;;  %v6228_v39 = vld [vmem:[#allocation62_spill] sm:$0xff] }
 0x4a3   :  { %3381 = vrcp.f32 %v1739_v16  ;;  %v6234_v16 = vld [vmem:[#allocation13_spill] sm:$0xff] }
 0x4ab   :  { %v3378_v32 = vpop.eup %3377 }
 0x4ac   :  { %v3380_v35 = vpop.eup %3379  ;;  %v1743_v26 = vmul.f32 %v3378_v32, %v3376_v53  ;;  %v6230_v53 = vld [vmem:[#allocation64_spill] sm:$0xff]  ;;  %v6231_v32 = vld [vmem:[#allocation65_spill] sm:$0xff] }
 0x4ad   :  { %v1742_v57 = vmul.f32 %v3380_v35, %v4632_v21  ;;  %v3382_v15 = vpop.eup %3381  ;;  %v6210_v21 = vld [vmem:[#allocation44_spill] sm:$0xff]  ;;  %v6232_v35 = vld [vmem:[#allocation66_spill] sm:$0xff] }
 0x4af   :  { %v4874_v24 = vadd.f32 %v1743_v26, %v1742_v57  ;;  %v6233_v26 = vld [vmem:[#allocation12_spill] sm:$0xff]  ;;  %v6235_v57 = vld [vmem:[#allocation18_spill] sm:$0xff] }
 0x4b1   :  { %3383 = vtanh.f32 %v4874_v24 }
 0x4bb   :  { %v3384_v30 = vpop.eup %3383 }
 0x4bc   :  { %v1746_v18 = vmul.f32 %v3384_v30, %v3382_v15  ;;  %v6236_v15 = vld [vmem:[#allocation72_spill] sm:$0xff]  ;;  %v6237_v30 = vld [vmem:[#allocation73_spill] sm:$0xff] }
 0x4be   :  { %v1747_v55 = vpack.c.bf16 %v1746_v18, %v1746_v18  ;;  %v6238_v18 = vld [vmem:[#allocation74_spill] sm:$0xff] }
 0x4c0   :  { %1782 = vmatmul.mubr.bf16.vlgmr.msra.gmra.mrb[44].mxu0 %v1747_v55  ;;  %1823 = vmatmul.mubr.bf16.vlgmr.msra.gmra.mrb[44].mxu1 %v1747_v55 }
 0x4c1   :  { %1863 = vmatpush1.bf16.msra.mxu0 %v4459_v1  ;;  %1904 = vmatpush1.bf16.msra.mxu1 %v4462_v9  ;;  %v6189_v1 = vld [vmem:[#allocation28_spill] sm:$0xff]  ;;  %v6190_v9 = vld [vmem:[#allocation29_spill] sm:$0xff] }
 0x4c2   :  { %1864 = vmatprep.subr.bf16.mxu0 %v4465_v56  ;;  %1905 = vmatprep.subr.bf16.mxu1 %v4468_v31  ;;  %v6191_v56 = vld [vmem:[#allocation30_spill] sm:$0xff]  ;;  %v6192_v31 = vld [vmem:[#allocation31_spill] sm:$0xff] }
 0x4c3   :  { %1894 = vmatprep.mubr.bf16.mxu0 %v6006_v60  ;;  %1935 = vmatprep.mubr.bf16.mxu1 %v6006_v60 }
 0x4c5   :  { %1865 = vmatpush1.bf16.msra.mxu0 %v4473_v58  ;;  %1906 = vmatpush1.bf16.msra.mxu1 %v4476_v62  ;;  %v6193_v58 = vld [vmem:[#allocation32_spill] sm:$0xff]  ;;  %v6194_v62 = vld [vmem:[#allocation33_spill] sm:$0xff] }
 0x4c6   :  { %1866 = vmatprep.subr.bf16.mxu0 %v4479_v59  ;;  %1907 = vmatprep.subr.bf16.mxu1 %v4482_v5  ;;  %v6195_v59 = vld [vmem:[#allocation34_spill] sm:$0xff]  ;;  %v6196_v5 = vld [vmem:[#allocation35_spill] sm:$0xff] }
 0x4c9   :  { %1867 = vmatpush1.bf16.msra.mxu0 %v4485_v40  ;;  %1908 = vmatpush1.bf16.msra.mxu1 %v4488_v22  ;;  %v6197_v40 = vld [vmem:[#allocation36_spill] sm:$0xff]  ;;  %v6198_v22 = vld [vmem:[#allocation37_spill] sm:$0xff] }
 0x4ca   :  { %1868 = vmatprep.subr.bf16.mxu0 %v4491_v0  ;;  %1909 = vmatprep.subr.bf16.mxu1 %v4494_v11  ;;  %v6199_v0 = vld [vmem:[#allocation38_spill] sm:$0xff]  ;;  %v6200_v11 = vld [vmem:[#allocation39_spill] sm:$0xff] }
 0x4cd   :  { %1869 = vmatpush1.bf16.msra.mxu0 %v4497_v10  ;;  %1910 = vmatpush1.bf16.msra.mxu1 %v4500_v13  ;;  %v6201_v10 = vld [vmem:[#allocation40_spill] sm:$0xff]  ;;  %v6202_v13 = vld [vmem:[#allocation41_spill] sm:$0xff] }
 0x4ce   :  { %1870 = vmatprep.subr.bf16.mxu0 %v4503_v12  ;;  %1911 = vmatprep.subr.bf16.mxu1 %v6122_v61  ;;  %v6203_v12 = vld [vmem:[#allocation42_spill] sm:$0xff]  ;;  %v6211_v61 = vld [vmem:[#allocation45_spill] sm:$0xff] }
 0x4d1   :  { %1871 = vmatpush1.bf16.msra.mxu0 %v6123_v28  ;;  %1912 = vmatpush1.bf16.msra.mxu1 %v6124_v29  ;;  %v6212_v28 = vld [vmem:[#allocation46_spill] sm:$0xff]  ;;  %v6213_v29 = vld [vmem:[#allocation47_spill] sm:$0xff] }
 0x4d2   :  { %1872 = vmatprep.subr.bf16.mxu0 %v6125_v33  ;;  %1913 = vmatprep.subr.bf16.mxu1 %v6126_v34  ;;  %v6214_v33 = vld [vmem:[#allocation48_spill] sm:$0xff]  ;;  %v6215_v34 = vld [vmem:[#allocation49_spill] sm:$0xff] }
 0x4d5   :  { %1873 = vmatpush1.bf16.msra.mxu0 %v6127_v36  ;;  %1914 = vmatpush1.bf16.msra.mxu1 %v6128_v37  ;;  %v6216_v36 = vld [vmem:[#allocation50_spill] sm:$0xff]  ;;  %v6217_v37 = vld [vmem:[#allocation51_spill] sm:$0xff] }
 0x4d6   :  { %1874 = vmatprep.subr.bf16.mxu0 %v6129_v38  ;;  %1915 = vmatprep.subr.bf16.mxu1 %v6130_v41  ;;  %v6218_v38 = vld [vmem:[#allocation52_spill] sm:$0xff]  ;;  %v6219_v41 = vld [vmem:[#allocation53_spill] sm:$0xff] }
 0x4d9   :  { %1875 = vmatpush1.bf16.msra.mxu0 %v4533_v3  ;;  %1916 = vmatpush1.bf16.msra.mxu1 %v4536_v7  ;;  %v6207_v3 = vld [vmem:[#allocation70_spill] sm:$0xff]  ;;  %v6208_v7 = vld [vmem:[#allocation71_spill] sm:$0xff] }
 0x4da   :  { %1876 = vmatprep.subr.bf16.mxu0 %v4539_v2  ;;  %1917 = vmatprep.subr.bf16.mxu1 %v4542_v8  ;;  %v6204_v8 = vld [vmem:[#allocation67_spill] sm:$0xff] }
 0x4db   :  { %v6209_v2 = vld [vmem:[#allocation43_spill] sm:$0xff] }
 0x4dd   :  { %1877 = vmatpush1.bf16.msra.mxu0 %v4545_v4  ;;  %1918 = vmatpush1.bf16.msra.mxu1 %v4548_v63  ;;  %v6205_v4 = vld [vmem:[#allocation68_spill] sm:$0xff]  ;;  %v6206_v63 = vld [vmem:[#allocation69_spill] sm:$0xff] }
 0x4de   :  { %1974 = vmatprep.subr.bf16.mxu0 %v4667_v42  ;;  %2015 = vmatprep.subr.bf16.mxu1 %v4670_v43 }
 0x4e0   :  { %1895 = vmatmul.mubr.bf16.vlgmr.msra.gmra.mrb[48].mxu0 %v1747_v55  ;;  %1936 = vmatmul.mubr.bf16.vlgmr.msra.gmra.mrb[48].mxu1 %v1747_v55  ;;  %v6239_v55 = vld [vmem:[#allocation75_spill] sm:$0xff] }
 0x4e1   :  { %1975 = vmatpush1.bf16.msra.mxu0 %v4673_v44  ;;  %2016 = vmatpush1.bf16.msra.mxu1 %v4676_v45 }
 0x4e2   :  { %1976 = vmatprep.subr.bf16.mxu0 %v4679_v46  ;;  %2017 = vmatprep.subr.bf16.mxu1 %v4682_v6 }
 0x4e5   :  { %1977 = vmatpush1.bf16.msra.mxu0 %v4685_v47  ;;  %2018 = vmatpush1.bf16.msra.mxu1 %v4688_v48 }
 0x4e6   :  { %1978 = vmatprep.subr.bf16.mxu0 %v4691_v50  ;;  %2019 = vmatprep.subr.bf16.mxu1 %v4694_v51 }
 0x4e9   :  { %1979 = vmatpush1.bf16.msra.mxu0 %v6189_v1  ;;  %2020 = vmatpush1.bf16.msra.mxu1 %v6190_v9 }
 0x4ea   :  { %1980 = vmatprep.subr.bf16.mxu0 %v6191_v56  ;;  %2021 = vmatprep.subr.bf16.mxu1 %v6192_v31 }
 0x4ed   :  { %1981 = vmatpush1.bf16.msra.mxu0 %v6193_v58  ;;  %2022 = vmatpush1.bf16.msra.mxu1 %v6194_v62 }
 0x4ee   :  { %1982 = vmatprep.subr.bf16.mxu0 %v6195_v59  ;;  %2023 = vmatprep.subr.bf16.mxu1 %v6196_v5 }
 0x4f1   :  { %1983 = vmatpush1.bf16.msra.mxu0 %v6197_v40  ;;  %2024 = vmatpush1.bf16.msra.mxu1 %v6198_v22 }
 0x4f2   :  { %1984 = vmatprep.subr.bf16.mxu0 %v6199_v0  ;;  %2025 = vmatprep.subr.bf16.mxu1 %v6200_v11 }
 0x4f5   :  { %1985 = vmatpush1.bf16.msra.mxu0 %v6201_v10  ;;  %2026 = vmatpush1.bf16.msra.mxu1 %v6202_v13 }
 0x4f6   :  { %1986 = vmatprep.subr.bf16.mxu0 %v6203_v12  ;;  %2027 = vmatprep.subr.bf16.mxu1 %v6204_v8 }
 0x4f9   :  { %1987 = vmatpush1.bf16.msra.mxu0 %v6205_v4  ;;  %2028 = vmatpush1.bf16.msra.mxu1 %v6206_v63 }
 0x4fa   :  { %1988 = vmatprep.subr.bf16.mxu0 %v6207_v3  ;;  %2029 = vmatprep.subr.bf16.mxu1 %v6208_v7 }
 0x4fd   :  { %1989 = vmatpush1.bf16.msra.mxu0 %v6209_v2  ;;  %2030 = vmatpush1.bf16.msra.mxu1 %v6210_v21 }
 0x4fe   :  { %1990 = vmatprep.subr.bf16.mxu0 %v6211_v61  ;;  %2031 = vmatprep.subr.bf16.mxu1 %v6212_v28 }
 0x501   :  { %1991 = vmatpush1.bf16.msra.mxu0 %v6213_v29  ;;  %2032 = vmatpush1.bf16.msra.mxu1 %v6214_v33 }
 0x502   :  { %1992 = vmatprep.subr.bf16.mxu0 %v6215_v34  ;;  %2033 = vmatprep.subr.bf16.mxu1 %v6216_v36 }
 0x505   :  { %1993 = vmatpush1.bf16.msra.mxu0 %v6217_v37  ;;  %2034 = vmatpush1.bf16.msra.mxu1 %v6218_v38 }
 0x506   :  { %1994 = vmatprep.subr.bf16.mxu0 %v6219_v41  ;;  %2035 = vmatprep.subr.bf16.mxu1 %v6220_v19 }
 0x509   :  { %1995 = vmatpush1.bf16.msra.mxu0 %v6221_v14  ;;  %2036 = vmatpush1.bf16.msra.mxu1 %v6222_v54 }
 0x50a   :  { %1996 = vmatprep.subr.bf16.mxu0 %v6223_v17  ;;  %2037 = vmatprep.subr.bf16.mxu1 %v6224_v20 }
 0x50d   :  { %1997 = vmatpush1.bf16.msra.mxu0 %v6225_v25  ;;  %2038 = vmatpush1.bf16.msra.mxu1 %v6226_v23 }
 0x50e   :  { %1998 = vmatprep.subr.bf16.mxu0 %v6227_v52  ;;  %2039 = vmatprep.subr.bf16.mxu1 %v6228_v39  ;;  %v6246_v39 = vld [vmem:[#allocation15_spill] sm:$0xff] }
 0x511   :  { %1999 = vmatpush1.bf16.msra.mxu0 %v6229_v49  ;;  %2040 = vmatpush1.bf16.msra.mxu1 %v6230_v53  ;;  %v6240_v49 = vld [vmem:[#allocation19_spill] sm:$0xff]  ;;  %v6241_v53 = vld [vmem:[#allocation20_spill] sm:$0xff] }
 0x512   :  { %2000 = vmatprep.subr.bf16.mxu0 %v6231_v32  ;;  %2041 = vmatprep.subr.bf16.mxu1 %v6232_v35  ;;  %v6242_v32 = vld [vmem:[#allocation21_spill] sm:$0xff] }
 0x513   :  { %v4973_v35 = vld [vmem:[#allocation3 + $0x4] ss:$16 sps:$4 sm:$0xff]  }
 0x514   :  { %6243 = vst [vmem:[#allocation22_spill] sm:$0xff] %v4973_v35 }
 0x515   :  { %2001 = vmatpush1.bf16.msra.mxu0 %v6233_v26  ;;  %2042 = vmatpush1.bf16.msra.mxu1 %v6234_v16  ;;  %v4976_v16 = vld [vmem:[#allocation3 + $0xc] ss:$16 sps:$4 sm:$0xff]  }
 0x516   :  { %2002 = vmatprep.subr.bf16.mxu0 %v6235_v57  ;;  %2043 = vmatprep.subr.bf16.mxu1 %v6236_v15  ;;  %6244 = vst [vmem:[#allocation23_spill] sm:$0xff] %v4976_v16  ;;  %v6245_v57 = vld [vmem:[#allocation14_spill] sm:$0xff] }
 0x519   :  { %2003 = vmatpush1.bf16.msra.mxu0 %v6237_v30  ;;  %2044 = vmatpush1.bf16.msra.mxu1 %v6238_v18 }
 0x51a   :  { %2004 = vmatprep.subr.bf16.mxu0 %v6239_v55  ;;  %2045 = vmatprep.subr.bf16.mxu1 %v6240_v49 }
 0x51d   :  { %2005 = vmatpush1.bf16.msra.mxu0 %v6241_v53  ;;  %2046 = vmatpush1.bf16.msra.mxu1 %v6242_v32 }
 0x51e   :  { %2087 = vmatprep.subr.bf16.mxu0 %v4973_v35  ;;  %2128 = vmatprep.subr.bf16.mxu1 %v4976_v16  ;;  %v6247_v35 = vld [vmem:[#allocation16_spill] sm:$0xff]  ;;  %v6248_v16 = vld [vmem:[#allocation17_spill] sm:$0xff] }
 0x593   :  { %v1783_v15 = vpop.f32.mrb[44].mxu0  ;;  %v1824_v30 = vpop.f32.mrb[44].mxu1 }
 0x594   :  { %v1784_v18 = vadd.f32 %v1783_v15, %v6245_v57  ;;  %v1785_v26 = vpop.f32.mrb[45].mxu0  ;;  %v1826_v55 = vpop.f32.mrb[45].mxu1  ;;  %v1825_v14 = vadd.f32 %v1824_v30, %v6248_v16  ;;  %v6249_v30 = vld [vmem:[#allocation80_spill] sm:$0xff]  ;;  %v6252_v16 = vld [vmem:[#allocation83_spill] sm:$0xff] }
 0x595   :  { %v1786_v49 = vadd.f32 %v1785_v26, %v6246_v39  ;;  %v1787_v52 = vpop.f32.mrb[46].mxu0  ;;  %v1828_v53 = vpop.f32.mrb[46].mxu1  ;;  %v1827_v17 = vadd.f32 %v1826_v55, %v6247_v35 }
 0x596   :  { %v3031_v23 = vmul.f32 -1.442695, %v1784_v18  ;;  %v1788_v32 = vpop.f32.mrb[47].mxu0  ;;  %v1829_v25 = vpop.f32.mrb[47].mxu1 }
 0x597   :  { %v3032_v20 = vmul.f32 -1.442695, %v1786_v49  ;;  %v3033_v54 = vmul.f32 -1.442695, %v1827_v17 }
 0x598   :  { %3385 = vpow2.f32 %v3031_v23 }
 0x599   :  { %3387 = vpow2.f32 %v3032_v20 }
 0x59a   :  { %3389 = vpow2.f32 %v3033_v54  ;;  %v6250_v54 = vld [vmem:[#allocation81_spill] sm:$0xff] }
 0x59b   :  { %3391 = vtanh.f32 %v1825_v14 }
 0x5a2   :  { %v3386_v19 = vpop.eup %3385 }
 0x5a3   :  { %v3388_v41 = vpop.eup %3387  ;;  %v1834_v15 = vadd.f32 1.0, %v3386_v19 }
 0x5a4   :  { %v1840_v57 = vadd.f32 1.0, %v3388_v41  ;;  %v3390_v52 = vpop.eup %3389 }
 0x5a5   :  { %3393 = vrcp.f32 %v1834_v15  ;;  %v3392_v53 = vpop.eup %3391  ;;  %v1847_v23 = vadd.f32 1.0, %v3390_v52 }
 0x5a6   :  { %3395 = vrcp.f32 %v1840_v57  ;;  %v6251_v57 = vld [vmem:[#allocation82_spill] sm:$0xff] }
 0x5a7   :  { %3397 = vrcp.f32 %v1847_v23 }
 0x5af   :  { %v3394_v32 = vpop.eup %3393 }
 0x5b0   :  { %v3396_v25 = vpop.eup %3395  ;;  %v1851_v49 = vmul.f32 %v3394_v32, %v3392_v53 }
 0x5b1   :  { %v1850_v20 = vmul.f32 %v3396_v25, %v4866_v27 }
 0x5b3   :  { %v1896_v26 = vpop.f32.mrb[48].mxu0  ;;  %v1937_v17 = vpop.f32.mrb[48].mxu1  ;;  %v4984_v18 = vadd.f32 %v1851_v49, %v1850_v20 }
 0x5b4   :  { %v1944_v19 = vadd.f32 %v1896_v26, %v6249_v30  ;;  %v1946_v14 = vadd.f32 %v1937_v17, %v6250_v54  ;;  %v1898_v41 = vpop.f32.mrb[49].mxu0  ;;  %v1939_v55 = vpop.f32.mrb[49].mxu1 }
 0x5b5   :  { %v1945_v15 = vadd.f32 %v1898_v41, %v6251_v57  ;;  %v1947_v35 = vadd.f32 %v1939_v55, %v6252_v16  ;;  %v1900_v39 = vpop.f32.mrb[50].mxu0  ;;  %v1941_v53 = vpop.f32.mrb[50].mxu1  ;;  %3399 = vtanh.f32 %v4984_v18 }
 0x5b6   :  { %v3034_v27 = vmul.f32 -1.442695, %v1944_v19  ;;  %v1901_v52 = vpop.f32.mrb[51].mxu0  ;;  %v1942_v32 = vpop.f32.mrb[51].mxu1 }
 0x5b7   :  { %v3035_v25 = vmul.f32 -1.442695, %v1945_v15  ;;  %v3398_v49 = vpop.eup %3397  ;;  %v3036_v20 = vmul.f32 -1.442695, %v1947_v35 }
 0x5b8   :  { %3401 = vpow2.f32 %v3034_v27 }
 0x5b9   :  { %3403 = vpow2.f32 %v3035_v25 }
 0x5ba   :  { %3405 = vpow2.f32 %v3036_v20  ;;  %v5008_v20 = vld [vmem:[#allocation3 + $0x2c] ss:$16 sps:$4 sm:$0xff]  }
 0x5bb   :  { %3407 = vtanh.f32 %v1946_v14 }
 0x5bf   :  { %v3400_v23 = vpop.eup %3399 }
 0x5c0   :  { %v1854_v26 = vmul.f32 %v3400_v23, %v3398_v49  ;;  %v4999_v49 = vld [vmem:[#allocation3] ss:$16 sps:$4 sm:$0xff]   ;;  %v5002_v23 = vld [vmem:[#allocation3 + $0x8] ss:$16 sps:$4 sm:$0xff]  }
 0x5c2   :  { %v3402_v17 = vpop.eup %3401  ;;  %v1973_v30 = vpack.c.bf16 %v1854_v26, %v1854_v26  ;;  %v5013_v26 = vld [vmem:[#allocation3 + $0x20] ss:$16 sps:$4 sm:$0xff]  }
 0x5c3   :  { %v3404_v54 = vpop.eup %3403  ;;  %v1951_v41 = vadd.f32 1.0, %v3402_v17  ;;  %v5016_v17 = vld [vmem:[#allocation3 + $0x28] ss:$16 sps:$4 sm:$0xff]  }
 0x5c4   :  { %v1957_v39 = vadd.f32 1.0, %v3404_v54  ;;  %2006 = vmatprep.mubr.bf16.mxu0 %v1973_v30  ;;  %2047 = vmatprep.mubr.bf16.mxu1 %v1973_v30  ;;  %v3406_v16 = vpop.eup %3405  ;;  %v5019_v30 = vld [vmem:[#allocation3 + $0x44] ss:$16 sps:$4 sm:$0xff]   ;;  %v5022_v54 = vld [vmem:[#allocation3 + $0x4c] ss:$16 sps:$4 sm:$0xff]  }
 0x5c5   :  { %3409 = vrcp.f32 %v1951_v41  ;;  %v3408_v19 = vpop.eup %3407  ;;  %v1964_v53 = vadd.f32 1.0, %v3406_v16  ;;  %v5025_v41 = vld [vmem:[#allocation3 + $0x40] ss:$16 sps:$4 sm:$0xff]   ;;  %v5031_v16 = vld [vmem:[#allocation3 + $0x64] ss:$16 sps:$4 sm:$0xff]  }
 0x5c6   :  { %3411 = vrcp.f32 %v1957_v39  ;;  %v5028_v39 = vld [vmem:[#allocation3 + $0x48] ss:$16 sps:$4 sm:$0xff]  }
 0x5c7   :  { %3413 = vrcp.f32 %v1964_v53  ;;  %v5046_v53 = vld [vmem:[#allocation3 + $0x8c] ss:$16 sps:$4 sm:$0xff]  }
 0x5c8   :  { %6254 = vst [vmem:[#allocation25_spill] sm:$0xff] %v5046_v53 }
 0x5cf   :  { %v3410_v55 = vpop.eup %3409 }
 0x5d0   :  { %v3412_v57 = vpop.eup %3411  ;;  %v1968_v15 = vmul.f32 %v3410_v55, %v3408_v19  ;;  %v5034_v19 = vld [vmem:[#allocation3 + $0x6c] ss:$16 sps:$4 sm:$0xff]   ;;  %v5037_v55 = vld [vmem:[#allocation3 + $0x60] ss:$16 sps:$4 sm:$0xff]  }
 0x5d1   :  { %v1967_v35 = vmul.f32 %v3412_v57, %v4874_v24  ;;  %v3414_v52 = vpop.eup %3413  ;;  %v5005_v24 = vld [vmem:[#allocation3 + $0x24] ss:$16 sps:$4 sm:$0xff]   ;;  %v5040_v57 = vld [vmem:[#allocation3 + $0x68] ss:$16 sps:$4 sm:$0xff]  }
 0x5d3   :  { %v4992_v27 = vadd.f32 %v1968_v15, %v1967_v35  ;;  %v5043_v15 = vld [vmem:[#allocation3 + $0x84] ss:$16 sps:$4 sm:$0xff]   ;;  %v5049_v35 = vld [vmem:[#allocation3 + $0x80] ss:$16 sps:$4 sm:$0xff]  }
 0x5d4   :  { %6253 = vst [vmem:[#allocation24_spill] sm:$0xff] %v5043_v15  ;;  %6255 = vst [vmem:[#allocation26_spill] sm:$0xff] %v5049_v35 }
 0x5d5   :  { %3415 = vtanh.f32 %v4992_v27 }
 0x5df   :  { %v3416_v14 = vpop.eup %3415 }
 0x5e0   :  { %v1971_v32 = vmul.f32 %v3416_v14, %v3414_v52  ;;  %v5052_v52 = vld [vmem:[#allocation3 + $0x88] ss:$16 sps:$4 sm:$0xff]   ;;  %v5055_v14 = vld [vmem:[#allocation3 + $0xa4] ss:$16 sps:$4 sm:$0xff]  }
 0x5e1   :  { %6256 = vst [vmem:[#allocation27_spill] sm:$0xff] %v5052_v52  ;;  %6257 = vst [vmem:[#allocation76_spill] sm:$0xff] %v5055_v14 }
 0x5e2   :  { %v4995_v25 = vpack.c.bf16 %v1971_v32, %v1971_v32  ;;  %v5058_v32 = vld [vmem:[#allocation3 + $0xac] ss:$16 sps:$4 sm:$0xff]  }
 0x5e3   :  { %6258 = vst [vmem:[#allocation77_spill] sm:$0xff] %v5058_v32 }
 0x5e4   :  { %2007 = vmatmul.mubr.bf16.vlgmr.msra.gmra.mrb[52].mxu0 %v4995_v25  ;;  %2048 = vmatmul.mubr.bf16.vlgmr.msra.gmra.mrb[52].mxu1 %v4995_v25 }
 0x5e5   :  { %2088 = vmatpush1.bf16.msra.mxu0 %v4999_v49  ;;  %2129 = vmatpush1.bf16.msra.mxu1 %v5002_v23 }
 0x5e6   :  { %2089 = vmatprep.subr.bf16.mxu0 %v5005_v24  ;;  %2130 = vmatprep.subr.bf16.mxu1 %v5008_v20 }
 0x5e7   :  { %2119 = vmatprep.mubr.bf16.mxu0 %v6006_v60  ;;  %2160 = vmatprep.mubr.bf16.mxu1 %v6006_v60 }
 0x5e9   :  { %2090 = vmatpush1.bf16.msra.mxu0 %v5013_v26  ;;  %2131 = vmatpush1.bf16.msra.mxu1 %v5016_v17 }
 0x5ea   :  { %2091 = vmatprep.subr.bf16.mxu0 %v5019_v30  ;;  %2132 = vmatprep.subr.bf16.mxu1 %v5022_v54 }
 0x5ed   :  { %2092 = vmatpush1.bf16.msra.mxu0 %v5025_v41  ;;  %2133 = vmatpush1.bf16.msra.mxu1 %v5028_v39 }
 0x5ee   :  { %2093 = vmatprep.subr.bf16.mxu0 %v5031_v16  ;;  %2134 = vmatprep.subr.bf16.mxu1 %v5034_v19 }
 0x5f1   :  { %2094 = vmatpush1.bf16.msra.mxu0 %v5037_v55  ;;  %2135 = vmatpush1.bf16.msra.mxu1 %v5040_v57 }
 0x5f2   :  { %2095 = vmatprep.subr.bf16.mxu0 %v5043_v15  ;;  %2136 = vmatprep.subr.bf16.mxu1 %v5046_v53  ;;  %v5061_v15 = vld [vmem:[#allocation3 + $0xa0] ss:$16 sps:$4 sm:$0xff]   ;;  %v5064_v53 = vld [vmem:[#allocation3 + $0xa8] ss:$16 sps:$4 sm:$0xff]  }
 0x5f3   :  { %6259 = vst [vmem:[#allocation78_spill] sm:$0xff] %v5061_v15  ;;  %6260 = vst [vmem:[#allocation79_spill] sm:$0xff] %v5064_v53 }
 0x5f5   :  { %2096 = vmatpush1.bf16.msra.mxu0 %v5049_v35  ;;  %2137 = vmatpush1.bf16.msra.mxu1 %v5052_v52  ;;  %v5067_v35 = vld [vmem:[#allocation3 + $0xc4] ss:$16 sps:$4 sm:$0xff]   ;;  %v5070_v52 = vld [vmem:[#allocation3 + $0xcc] ss:$16 sps:$4 sm:$0xff]  }
 0x5f6   :  { %2097 = vmatprep.subr.bf16.mxu0 %v5055_v14  ;;  %2138 = vmatprep.subr.bf16.mxu1 %v5058_v32  ;;  %6261 = vst [vmem:[#allocation28_spill] sm:$0xff] %v5067_v35  ;;  %6262 = vst [vmem:[#allocation29_spill] sm:$0xff] %v5070_v52  ;;  %v5073_v14 = vld [vmem:[#allocation3 + $0xc0] ss:$16 sps:$4 sm:$0xff]   ;;  %v5076_v32 = vld [vmem:[#allocation3 + $0xc8] ss:$16 sps:$4 sm:$0xff]  }
 0x5f9   :  { %2098 = vmatpush1.bf16.msra.mxu0 %v5061_v15  ;;  %2139 = vmatpush1.bf16.msra.mxu1 %v5064_v53  ;;  %v5079_v15 = vld [vmem:[#allocation3 + $0xe4] ss:$16 sps:$4 sm:$0xff]   ;;  %v5082_v53 = vld [vmem:[#allocation3 + $0xec] ss:$16 sps:$4 sm:$0xff]  }
 0x5fa   :  { %2099 = vmatprep.subr.bf16.mxu0 %v5067_v35  ;;  %2140 = vmatprep.subr.bf16.mxu1 %v5070_v52  ;;  %v5085_v35 = vld [vmem:[#allocation3 + $0xe0] ss:$16 sps:$4 sm:$0xff]   ;;  %v5088_v52 = vld [vmem:[#allocation3 + $0xe8] ss:$16 sps:$4 sm:$0xff]  }
 0x5fd   :  { %2100 = vmatpush1.bf16.msra.mxu0 %v5073_v14  ;;  %2141 = vmatpush1.bf16.msra.mxu1 %v5076_v32 }
 0x5fe   :  { %2101 = vmatprep.subr.bf16.mxu0 %v5079_v15  ;;  %2142 = vmatprep.subr.bf16.mxu1 %v5082_v53 }
 0x601   :  { %2102 = vmatpush1.bf16.msra.mxu0 %v5085_v35  ;;  %2143 = vmatpush1.bf16.msra.mxu1 %v5088_v52 }
 0x602   :  { %2199 = vmatprep.subr.bf16.mxu0 %v4667_v42  ;;  %2240 = vmatprep.subr.bf16.mxu1 %v4670_v43  ;;  %v6263_v42 = vld [vmem:[#allocation53_spill] sm:$0xff]  ;;  %v6264_v43 = vld [vmem:[#allocation54_spill] sm:$0xff] }
 0x604   :  { %2120 = vmatmul.mubr.bf16.vlgmr.msra.gmra.mrb[56].mxu0 %v4995_v25  ;;  %2161 = vmatmul.mubr.bf16.vlgmr.msra.gmra.mrb[56].mxu1 %v4995_v25  ;;  %v6291_v25 = vld [vmem:[#allocation16_spill] sm:$0xff] }
 0x605   :  { %2200 = vmatpush1.bf16.msra.mxu0 %v4673_v44  ;;  %2241 = vmatpush1.bf16.msra.mxu1 %v4676_v45  ;;  %v6265_v44 = vld [vmem:[#allocation55_spill] sm:$0xff]  ;;  %v6266_v45 = vld [vmem:[#allocation56_spill] sm:$0xff] }
 0x606   :  { %2201 = vmatprep.subr.bf16.mxu0 %v4679_v46  ;;  %2242 = vmatprep.subr.bf16.mxu1 %v4682_v6  ;;  %v6267_v46 = vld [vmem:[#allocation57_spill] sm:$0xff]  ;;  %v6268_v6 = vld [vmem:[#allocation58_spill] sm:$0xff] }
 0x609   :  { %2202 = vmatpush1.bf16.msra.mxu0 %v4685_v47  ;;  %2243 = vmatpush1.bf16.msra.mxu1 %v4688_v48  ;;  %v6269_v47 = vld [vmem:[#allocation59_spill] sm:$0xff]  ;;  %v6270_v48 = vld [vmem:[#allocation60_spill] sm:$0xff] }
 0x60a   :  { %2203 = vmatprep.subr.bf16.mxu0 %v4691_v50  ;;  %2244 = vmatprep.subr.bf16.mxu1 %v4694_v51  ;;  %v6271_v50 = vld [vmem:[#allocation61_spill] sm:$0xff]  ;;  %v6272_v51 = vld [vmem:[#allocation62_spill] sm:$0xff] }
 0x60d   :  { %2204 = vmatpush1.bf16.msra.mxu0 %v6189_v1  ;;  %2245 = vmatpush1.bf16.msra.mxu1 %v6190_v9  ;;  %v6273_v1 = vld [vmem:[#allocation63_spill] sm:$0xff]  ;;  %v6274_v9 = vld [vmem:[#allocation64_spill] sm:$0xff] }
 0x60e   :  { %2205 = vmatprep.subr.bf16.mxu0 %v6191_v56  ;;  %2246 = vmatprep.subr.bf16.mxu1 %v6192_v31  ;;  %v6275_v56 = vld [vmem:[#allocation65_spill] sm:$0xff]  ;;  %v6276_v31 = vld [vmem:[#allocation66_spill] sm:$0xff] }
 0x611   :  { %2206 = vmatpush1.bf16.msra.mxu0 %v6193_v58  ;;  %2247 = vmatpush1.bf16.msra.mxu1 %v6194_v62  ;;  %v6277_v58 = vld [vmem:[#allocation12_spill] sm:$0xff]  ;;  %v6278_v62 = vld [vmem:[#allocation13_spill] sm:$0xff] }
 0x612   :  { %2207 = vmatprep.subr.bf16.mxu0 %v6195_v59  ;;  %2248 = vmatprep.subr.bf16.mxu1 %v6196_v5  ;;  %v6279_v59 = vld [vmem:[#allocation18_spill] sm:$0xff]  ;;  %v6280_v5 = vld [vmem:[#allocation72_spill] sm:$0xff] }
 0x615   :  { %2208 = vmatpush1.bf16.msra.mxu0 %v6197_v40  ;;  %2249 = vmatpush1.bf16.msra.mxu1 %v6198_v22  ;;  %v6281_v40 = vld [vmem:[#allocation73_spill] sm:$0xff]  ;;  %v6282_v22 = vld [vmem:[#allocation74_spill] sm:$0xff] }
 0x616   :  { %2209 = vmatprep.subr.bf16.mxu0 %v6199_v0  ;;  %2250 = vmatprep.subr.bf16.mxu1 %v6200_v11  ;;  %v6283_v0 = vld [vmem:[#allocation75_spill] sm:$0xff] }
 0x617   :  { %v6284_v11 = vld [vmem:[#allocation19_spill] sm:$0xff] }
 0x619   :  { %2210 = vmatpush1.bf16.msra.mxu0 %v6201_v10  ;;  %2251 = vmatpush1.bf16.msra.mxu1 %v6202_v13  ;;  %v6285_v10 = vld [vmem:[#allocation20_spill] sm:$0xff]  ;;  %v6286_v13 = vld [vmem:[#allocation21_spill] sm:$0xff] }
 0x61a   :  { %2211 = vmatprep.subr.bf16.mxu0 %v6203_v12  ;;  %2252 = vmatprep.subr.bf16.mxu1 %v6204_v8  ;;  %v6287_v12 = vld [vmem:[#allocation22_spill] sm:$0xff]  ;;  %v6288_v8 = vld [vmem:[#allocation23_spill] sm:$0xff] }
 0x61d   :  { %2212 = vmatpush1.bf16.msra.mxu0 %v6205_v4  ;;  %2253 = vmatpush1.bf16.msra.mxu1 %v6206_v63 }
 0x61e   :  { %2213 = vmatprep.subr.bf16.mxu0 %v6207_v3  ;;  %2254 = vmatprep.subr.bf16.mxu1 %v6208_v7  ;;  %v6289_v3 = vld [vmem:[#allocation14_spill] sm:$0xff] }
 0x621   :  { %2214 = vmatpush1.bf16.msra.mxu0 %v6209_v2  ;;  %2255 = vmatpush1.bf16.msra.mxu1 %v6210_v21 }
 0x622   :  { %2215 = vmatprep.subr.bf16.mxu0 %v6211_v61  ;;  %2256 = vmatprep.subr.bf16.mxu1 %v6212_v28  ;;  %v6290_v61 = vld [vmem:[#allocation15_spill] sm:$0xff] }
 0x625   :  { %2216 = vmatpush1.bf16.msra.mxu0 %v6213_v29  ;;  %2257 = vmatpush1.bf16.msra.mxu1 %v6214_v33 }
 0x626   :  { %2217 = vmatprep.subr.bf16.mxu0 %v6215_v34  ;;  %2258 = vmatprep.subr.bf16.mxu1 %v6216_v36 }
 0x629   :  { %2218 = vmatpush1.bf16.msra.mxu0 %v6217_v37  ;;  %2259 = vmatpush1.bf16.msra.mxu1 %v6218_v38 }
 0x62a   :  { %2219 = vmatprep.subr.bf16.mxu0 %v6263_v42  ;;  %2260 = vmatprep.subr.bf16.mxu1 %v6264_v43 }
 0x62d   :  { %2220 = vmatpush1.bf16.msra.mxu0 %v6265_v44  ;;  %2261 = vmatpush1.bf16.msra.mxu1 %v6266_v45  ;;  %v6292_v44 = vld [vmem:[#allocation17_spill] sm:$0xff] }
 0x62e   :  { %2221 = vmatprep.subr.bf16.mxu0 %v6267_v46  ;;  %2262 = vmatprep.subr.bf16.mxu1 %v6268_v6 }
 0x631   :  { %2222 = vmatpush1.bf16.msra.mxu0 %v6269_v47  ;;  %2263 = vmatpush1.bf16.msra.mxu1 %v6270_v48 }
 0x632   :  { %2223 = vmatprep.subr.bf16.mxu0 %v6271_v50  ;;  %2264 = vmatprep.subr.bf16.mxu1 %v6272_v51 }
 0x635   :  { %2224 = vmatpush1.bf16.msra.mxu0 %v6273_v1  ;;  %2265 = vmatpush1.bf16.msra.mxu1 %v6274_v9 }
 0x636   :  { %2225 = vmatprep.subr.bf16.mxu0 %v6275_v56  ;;  %2266 = vmatprep.subr.bf16.mxu1 %v6276_v31 }
 0x639   :  { %2226 = vmatpush1.bf16.msra.mxu0 %v6277_v58  ;;  %2267 = vmatpush1.bf16.msra.mxu1 %v6278_v62 }
 0x63a   :  { %2227 = vmatprep.subr.bf16.mxu0 %v6279_v59  ;;  %2268 = vmatprep.subr.bf16.mxu1 %v6280_v5 }
 0x63d   :  { %2228 = vmatpush1.bf16.msra.mxu0 %v6281_v40  ;;  %2269 = vmatpush1.bf16.msra.mxu1 %v6282_v22  ;;  %v6293_v40 = vld [vmem:[#allocation84_spill] sm:$0xff] }
 0x63e   :  { %2229 = vmatprep.subr.bf16.mxu0 %v6283_v0  ;;  %2270 = vmatprep.subr.bf16.mxu1 %v6284_v11  ;;  %v6294_v0 = vld [vmem:[#allocation85_spill] sm:$0xff] }
 0x641   :  { %2230 = vmatpush1.bf16.msra.mxu0 %v6285_v10  ;;  %2271 = vmatpush1.bf16.msra.mxu1 %v6286_v13 }
 0x642   :  { %2312 = vmatprep.subr.bf16.mxu0 %v6287_v12  ;;  %2353 = vmatprep.subr.bf16.mxu1 %v6288_v8 }
 0x6b7   :  { %v2008_v4 = vpop.f32.mrb[52].mxu0  ;;  %v2049_v63 = vpop.f32.mrb[52].mxu1 }
 0x6b8   :  { %v2009_v7 = vadd.f32 %v2008_v4, %v6289_v3  ;;  %v2010_v2 = vpop.f32.mrb[53].mxu0  ;;  %v2051_v21 = vpop.f32.mrb[53].mxu1  ;;  %v2050_v45 = vadd.f32 %v2049_v63, %v6292_v44  ;;  %v6295_v4 = vld [vmem:[#allocation86_spill] sm:$0xff] }
 0x6b9   :  { %v2011_v28 = vadd.f32 %v2010_v2, %v6290_v61  ;;  %v2012_v29 = vpop.f32.mrb[54].mxu0  ;;  %v2053_v33 = vpop.f32.mrb[54].mxu1  ;;  %v2052_v42 = vadd.f32 %v2051_v21, %v6291_v25 }
 0x6ba   :  { %v3037_v34 = vmul.f32 -1.442695, %v2009_v7  ;;  %v2013_v36 = vpop.f32.mrb[55].mxu0  ;;  %v2054_v37 = vpop.f32.mrb[55].mxu1  ;;  %v6296_v7 = vld [vmem:[#allocation87_spill] sm:$0xff] }
 0x6bb   :  { %v3038_v38 = vmul.f32 -1.442695, %v2011_v28  ;;  %v3039_v43 = vmul.f32 -1.442695, %v2052_v42 }
 0x6bc   :  { %3417 = vpow2.f32 %v3037_v34 }
 0x6bd   :  { %3419 = vpow2.f32 %v3038_v38 }
 0x6be   :  { %3421 = vpow2.f32 %v3039_v43 }
 0x6bf   :  { %3423 = vtanh.f32 %v2050_v45 }
 0x6c6   :  { %v3418_v46 = vpop.eup %3417 }
 0x6c7   :  { %v3420_v6 = vpop.eup %3419  ;;  %v2059_v47 = vadd.f32 1.0, %v3418_v46 }
 0x6c8   :  { %v2065_v48 = vadd.f32 1.0, %v3420_v6  ;;  %v3422_v50 = vpop.eup %3421 }
 0x6c9   :  { %3425 = vrcp.f32 %v2059_v47  ;;  %v3424_v51 = vpop.eup %3423  ;;  %v2072_v31 = vadd.f32 1.0, %v3422_v50 }
 0x6ca   :  { %3427 = vrcp.f32 %v2065_v48 }
 0x6cb   :  { %3429 = vrcp.f32 %v2072_v31 }
 0x6d3   :  { %v3426_v1 = vpop.eup %3425 }
 0x6d4   :  { %v3428_v9 = vpop.eup %3427  ;;  %v2076_v56 = vmul.f32 %v3426_v1, %v3424_v51 }
 0x6d5   :  { %v2075_v58 = vmul.f32 %v3428_v9, %v4984_v18  ;;  %v3430_v36 = vpop.eup %3429 }
 0x6d7   :  { %v2121_v62 = vpop.f32.mrb[56].mxu0  ;;  %v2162_v59 = vpop.f32.mrb[56].mxu1  ;;  %v5164_v5 = vadd.f32 %v2076_v56, %v2075_v58 }
 0x6d8   :  { %v2169_v22 = vadd.f32 %v2121_v62, %v6293_v40  ;;  %v2171_v11 = vadd.f32 %v2162_v59, %v6294_v0  ;;  %v2123_v10 = vpop.f32.mrb[57].mxu0  ;;  %v2164_v13 = vpop.f32.mrb[57].mxu1  ;;  %v6298_v0 = vld [vmem:[#allocation25_spill] sm:$0xff] }
 0x6d9   :  { %v2170_v63 = vadd.f32 %v2123_v10, %v6295_v4  ;;  %v2172_v2 = vadd.f32 %v2164_v13, %v6296_v7  ;;  %v2125_v21 = vpop.f32.mrb[58].mxu0  ;;  %v2166_v28 = vpop.f32.mrb[58].mxu1  ;;  %3431 = vtanh.f32 %v5164_v5  ;;  %v6300_v10 = vld [vmem:[#allocation27_spill] sm:$0xff]  ;;  %v6301_v13 = vld [vmem:[#allocation76_spill] sm:$0xff]  ;;  %v6302_v4 = vld [vmem:[#allocation77_spill] sm:$0xff] }
 0x6da   :  { %v3040_v18 = vmul.f32 -1.442695, %v2169_v22  ;;  %v2126_v29 = vpop.f32.mrb[59].mxu0  ;;  %v2167_v33 = vpop.f32.mrb[59].mxu1  ;;  %v6304_v7 = vld [vmem:[#allocation79_spill] sm:$0xff]  ;;  %v6306_v21 = vld [vmem:[#allocation29_spill] sm:$0xff] }
 0x6db   :  { %v3041_v34 = vmul.f32 -1.442695, %v2170_v63  ;;  %v3042_v38 = vmul.f32 -1.442695, %v2172_v2  ;;  %v6303_v63 = vld [vmem:[#allocation78_spill] sm:$0xff]  ;;  %v6305_v2 = vld [vmem:[#allocation28_spill] sm:$0xff] }
 0x6dc   :  { %3433 = vpow2.f32 %v3040_v18  ;;  %v5207_v28 = vld [vmem:[#allocation6 + $0x4] ss:$16 sps:$4 sm:$0xff]   ;;  %v5210_v18 = vld [vmem:[#allocation6 + $0xc] ss:$16 sps:$4 sm:$0xff]   ;;  %v5213_v29 = vld [vmem:[#allocation6] ss:$16 sps:$4 sm:$0xff]  }
 0x6dd   :  { %3435 = vpow2.f32 %v3041_v34  ;;  %v5216_v33 = vld [vmem:[#allocation6 + $0x8] ss:$16 sps:$4 sm:$0xff]   ;;  %v5219_v34 = vld [vmem:[#allocation6 + $0x24] ss:$16 sps:$4 sm:$0xff]  }
 0x6de   :  { %3437 = vpow2.f32 %v3042_v38  ;;  %v5228_v38 = vld [vmem:[#allocation6 + $0x28] ss:$16 sps:$4 sm:$0xff]  }
 0x6df   :  { %3439 = vtanh.f32 %v2171_v11  ;;  %v6299_v11 = vld [vmem:[#allocation26_spill] sm:$0xff] }
 0x6e3   :  { %v3432_v37 = vpop.eup %3431 }
 0x6e4   :  { %v2079_v42 = vmul.f32 %v3432_v37, %v3430_v36  ;;  %v5222_v36 = vld [vmem:[#allocation6 + $0x2c] ss:$16 sps:$4 sm:$0xff]   ;;  %v5225_v37 = vld [vmem:[#allocation6 + $0x20] ss:$16 sps:$4 sm:$0xff]  }
 0x6e6   :  { %v3434_v43 = vpop.eup %3433  ;;  %v2198_v45 = vpack.c.bf16 %v2079_v42, %v2079_v42  ;;  %v5231_v42 = vld [vmem:[#allocation6 + $0x44] ss:$16 sps:$4 sm:$0xff]  }
 0x6e7   :  { %v3436_v46 = vpop.eup %3435  ;;  %v2176_v6 = vadd.f32 1.0, %v3434_v43  ;;  %v5234_v43 = vld [vmem:[#allocation6 + $0x4c] ss:$16 sps:$4 sm:$0xff]  }
 0x6e8   :  { %v2182_v47 = vadd.f32 1.0, %v3436_v46  ;;  %2231 = vmatprep.mubr.bf16.mxu0 %v2198_v45  ;;  %2272 = vmatprep.mubr.bf16.mxu1 %v2198_v45  ;;  %v3438_v48 = vpop.eup %3437  ;;  %v5237_v45 = vld [vmem:[#allocation6 + $0x40] ss:$16 sps:$4 sm:$0xff]   ;;  %v5240_v46 = vld [vmem:[#allocation6 + $0x48] ss:$16 sps:$4 sm:$0xff]  }
 0x6e9   :  { %3441 = vrcp.f32 %v2176_v6  ;;  %v3440_v50 = vpop.eup %3439  ;;  %v2189_v56 = vadd.f32 1.0, %v3438_v48  ;;  %6307 = vst [vmem:[#allocation30_spill] sm:$0xff] %v5237_v45  ;;  %6308 = vst [vmem:[#allocation31_spill] sm:$0xff] %v5240_v46  ;;  %v5243_v6 = vld [vmem:[#allocation6 + $0x64] ss:$16 sps:$4 sm:$0xff]  }
 0x6ea   :  { %3443 = vrcp.f32 %v2182_v47  ;;  %6309 = vst [vmem:[#allocation32_spill] sm:$0xff] %v5243_v6  ;;  %v5246_v47 = vld [vmem:[#allocation6 + $0x6c] ss:$16 sps:$4 sm:$0xff]   ;;  %v5249_v48 = vld [vmem:[#allocation6 + $0x60] ss:$16 sps:$4 sm:$0xff]  }
 0x6eb   :  { %3445 = vrcp.f32 %v2189_v56  ;;  %6310 = vst [vmem:[#allocation33_spill] sm:$0xff] %v5246_v47  ;;  %6311 = vst [vmem:[#allocation34_spill] sm:$0xff] %v5249_v48  ;;  %v5264_v56 = vld [vmem:[#allocation6 + $0x88] ss:$16 sps:$4 sm:$0xff]  }
 0x6ec   :  { %6316 = vst [vmem:[#allocation39_spill] sm:$0xff] %v5264_v56 }
 0x6f3   :  { %v3442_v51 = vpop.eup %3441 }
 0x6f4   :  { %v3444_v1 = vpop.eup %3443  ;;  %v2193_v9 = vmul.f32 %v3442_v51, %v3440_v50  ;;  %v5252_v50 = vld [vmem:[#allocation6 + $0x68] ss:$16 sps:$4 sm:$0xff]   ;;  %v5255_v51 = vld [vmem:[#allocation6 + $0x84] ss:$16 sps:$4 sm:$0xff]  }
 0x6f5   :  { %v2192_v31 = vmul.f32 %v3444_v1, %v4992_v27  ;;  %v3446_v62 = vpop.eup %3445  ;;  %v6297_v27 = vld [vmem:[#allocation24_spill] sm:$0xff]  ;;  %6312 = vst [vmem:[#allocation35_spill] sm:$0xff] %v5252_v50  ;;  %6313 = vst [vmem:[#allocation36_spill] sm:$0xff] %v5255_v51 }
 0x6f6   :  { %v5258_v1 = vld [vmem:[#allocation6 + $0x8c] ss:$16 sps:$4 sm:$0xff]  }
 0x6f7   :  { %v5172_v58 = vadd.f32 %v2193_v9, %v2192_v31  ;;  %6314 = vst [vmem:[#allocation37_spill] sm:$0xff] %v5258_v1  ;;  %v5261_v9 = vld [vmem:[#allocation6 + $0x80] ss:$16 sps:$4 sm:$0xff]   ;;  %v5267_v31 = vld [vmem:[#allocation6 + $0xa4] ss:$16 sps:$4 sm:$0xff]  }
 0x6f8   :  { %6315 = vst [vmem:[#allocation38_spill] sm:$0xff] %v5261_v9  ;;  %6317 = vst [vmem:[#allocation40_spill] sm:$0xff] %v5267_v31 }
 0x6f9   :  { %3447 = vtanh.f32 %v5172_v58 }
 0x703   :  { %v3448_v59 = vpop.eup %3447 }
 0x704   :  { %v2196_v40 = vmul.f32 %v3448_v59, %v3446_v62  ;;  %v5270_v62 = vld [vmem:[#allocation6 + $0xac] ss:$16 sps:$4 sm:$0xff]   ;;  %v5273_v59 = vld [vmem:[#allocation6 + $0xa0] ss:$16 sps:$4 sm:$0xff]  }
 0x705   :  { %6318 = vst [vmem:[#allocation41_spill] sm:$0xff] %v5270_v62  ;;  %6319 = vst [vmem:[#allocation42_spill] sm:$0xff] %v5273_v59 }
 0x706   :  { %v2197_v22 = vpack.c.bf16 %v2196_v40, %v2196_v40  ;;  %v5276_v40 = vld [vmem:[#allocation6 + $0xa8] ss:$16 sps:$4 sm:$0xff]  }
 0x707   :  { %6320 = vst [vmem:[#allocation67_spill] sm:$0xff] %v5276_v40 }
 0x708   :  { %2232 = vmatmul.mubr.bf16.vlgmr.msra.gmra.mrb[60].mxu0 %v2197_v22  ;;  %2273 = vmatmul.mubr.bf16.vlgmr.msra.gmra.mrb[60].mxu1 %v2197_v22 }
 0x709   :  { %2313 = vmatpush1.bf16.msra.mxu0 %v4999_v49  ;;  %2354 = vmatpush1.bf16.msra.mxu1 %v5002_v23 }
 0x70a   :  { %2314 = vmatprep.subr.bf16.mxu0 %v5005_v24  ;;  %2355 = vmatprep.subr.bf16.mxu1 %v5008_v20 }
 0x70b   :  { %2344 = vmatprep.mubr.bf16.mxu0 %v6006_v60  ;;  %2385 = vmatprep.mubr.bf16.mxu1 %v6006_v60 }
 0x70d   :  { %2315 = vmatpush1.bf16.msra.mxu0 %v5013_v26  ;;  %2356 = vmatpush1.bf16.msra.mxu1 %v5016_v17 }
 0x70e   :  { %2316 = vmatprep.subr.bf16.mxu0 %v5019_v30  ;;  %2357 = vmatprep.subr.bf16.mxu1 %v5022_v54 }
 0x711   :  { %2317 = vmatpush1.bf16.msra.mxu0 %v5025_v41  ;;  %2358 = vmatpush1.bf16.msra.mxu1 %v5028_v39 }
 0x712   :  { %2318 = vmatprep.subr.bf16.mxu0 %v5031_v16  ;;  %2359 = vmatprep.subr.bf16.mxu1 %v5034_v19 }
 0x715   :  { %2319 = vmatpush1.bf16.msra.mxu0 %v5037_v55  ;;  %2360 = vmatpush1.bf16.msra.mxu1 %v5040_v57 }
 0x716   :  { %2320 = vmatprep.subr.bf16.mxu0 %v6297_v27  ;;  %2361 = vmatprep.subr.bf16.mxu1 %v6298_v0 }
 0x719   :  { %2321 = vmatpush1.bf16.msra.mxu0 %v6299_v11  ;;  %2362 = vmatpush1.bf16.msra.mxu1 %v6300_v10 }
 0x71a   :  { %2322 = vmatprep.subr.bf16.mxu0 %v6301_v13  ;;  %2363 = vmatprep.subr.bf16.mxu1 %v6302_v4 }
 0x71d   :  { %2323 = vmatpush1.bf16.msra.mxu0 %v6303_v63  ;;  %2364 = vmatpush1.bf16.msra.mxu1 %v6304_v7 }
 0x71e   :  { %2324 = vmatprep.subr.bf16.mxu0 %v6305_v2  ;;  %2365 = vmatprep.subr.bf16.mxu1 %v6306_v21 }
 0x721   :  { %2325 = vmatpush1.bf16.msra.mxu0 %v5073_v14  ;;  %2366 = vmatpush1.bf16.msra.mxu1 %v5076_v32 }
 0x722   :  { %2326 = vmatprep.subr.bf16.mxu0 %v5079_v15  ;;  %2367 = vmatprep.subr.bf16.mxu1 %v5082_v53 }
 0x725   :  { %2327 = vmatpush1.bf16.msra.mxu0 %v5085_v35  ;;  %2368 = vmatpush1.bf16.msra.mxu1 %v5088_v52 }
 0x726   :  { %2424 = vmatprep.subr.bf16.mxu0 %v5207_v28  ;;  %2465 = vmatprep.subr.bf16.mxu1 %v5210_v18 }
 0x728   :  { %2345 = vmatmul.mubr.bf16.vlgmr.msra.gmra.mrb[64].mxu0 %v2197_v22  ;;  %2386 = vmatmul.mubr.bf16.vlgmr.msra.gmra.mrb[64].mxu1 %v2197_v22  ;;  %v5279_v22 = vld [vmem:[#allocation6 + $0xc4] ss:$16 sps:$4 sm:$0xff]  }
 0x729   :  { %2425 = vmatpush1.bf16.msra.mxu0 %v5213_v29  ;;  %2466 = vmatpush1.bf16.msra.mxu1 %v5216_v33  ;;  %6321 = vst [vmem:[#allocation68_spill] sm:$0xff] %v5279_v22 }
 0x72a   :  { %2426 = vmatprep.subr.bf16.mxu0 %v5219_v34  ;;  %2467 = vmatprep.subr.bf16.mxu1 %v5222_v36 }
 0x72d   :  { %2427 = vmatpush1.bf16.msra.mxu0 %v5225_v37  ;;  %2468 = vmatpush1.bf16.msra.mxu1 %v5228_v38 }
 0x72e   :  { %2428 = vmatprep.subr.bf16.mxu0 %v5231_v42  ;;  %2469 = vmatprep.subr.bf16.mxu1 %v5234_v43 }
 0x731   :  { %2429 = vmatpush1.bf16.msra.mxu0 %v5237_v45  ;;  %2470 = vmatpush1.bf16.msra.mxu1 %v5240_v46 }
 0x732   :  { %2430 = vmatprep.subr.bf16.mxu0 %v5243_v6  ;;  %2471 = vmatprep.subr.bf16.mxu1 %v5246_v47 }
 0x735   :  { %2431 = vmatpush1.bf16.msra.mxu0 %v5249_v48  ;;  %2472 = vmatpush1.bf16.msra.mxu1 %v5252_v50 }
 0x736   :  { %2432 = vmatprep.subr.bf16.mxu0 %v5255_v51  ;;  %2473 = vmatprep.subr.bf16.mxu1 %v5258_v1 }
 0x739   :  { %2433 = vmatpush1.bf16.msra.mxu0 %v5261_v9  ;;  %2474 = vmatpush1.bf16.msra.mxu1 %v5264_v56  ;;  %v5282_v56 = vld [vmem:[#allocation6 + $0xcc] ss:$16 sps:$4 sm:$0xff]  }
 0x73a   :  { %2434 = vmatprep.subr.bf16.mxu0 %v5267_v31  ;;  %2475 = vmatprep.subr.bf16.mxu1 %v5270_v62  ;;  %6322 = vst [vmem:[#allocation69_spill] sm:$0xff] %v5282_v56  ;;  %v5285_v31 = vld [vmem:[#allocation6 + $0xc0] ss:$16 sps:$4 sm:$0xff]   ;;  %v5288_v62 = vld [vmem:[#allocation6 + $0xc8] ss:$16 sps:$4 sm:$0xff]  }
 0x73b   :  { %6323 = vst [vmem:[#allocation70_spill] sm:$0xff] %v5285_v31  ;;  %6324 = vst [vmem:[#allocation71_spill] sm:$0xff] %v5288_v62 }
 0x73d   :  { %2435 = vmatpush1.bf16.msra.mxu0 %v5273_v59  ;;  %2476 = vmatpush1.bf16.msra.mxu1 %v5276_v40  ;;  %v5291_v59 = vld [vmem:[#allocation6 + $0xe4] ss:$16 sps:$4 sm:$0xff]   ;;  %v5294_v40 = vld [vmem:[#allocation6 + $0xec] ss:$16 sps:$4 sm:$0xff]  }
 0x73e   :  { %2436 = vmatprep.subr.bf16.mxu0 %v5279_v22  ;;  %2477 = vmatprep.subr.bf16.mxu1 %v5282_v56  ;;  %6325 = vst [vmem:[#allocation43_spill] sm:$0xff] %v5291_v59  ;;  %6326 = vst [vmem:[#allocation44_spill] sm:$0xff] %v5294_v40  ;;  %v5297_v22 = vld [vmem:[#allocation6 + $0xe0] ss:$16 sps:$4 sm:$0xff]   ;;  %v5300_v56 = vld [vmem:[#allocation6 + $0xe8] ss:$16 sps:$4 sm:$0xff]  }
 0x73f   :  { %6327 = vst [vmem:[#allocation45_spill] sm:$0xff] %v5297_v22  ;;  %6328 = vst [vmem:[#allocation46_spill] sm:$0xff] %v5300_v56 }
 0x741   :  { %2437 = vmatpush1.bf16.msra.mxu0 %v5285_v31  ;;  %2478 = vmatpush1.bf16.msra.mxu1 %v5288_v62  ;;  %v5303_v31 = vld [vmem:[#allocation6 + $0x104] ss:$16 sps:$4 sm:$0xff]   ;;  %v5306_v62 = vld [vmem:[#allocation6 + $0x10c] ss:$16 sps:$4 sm:$0xff]  }
 0x742   :  { %2438 = vmatprep.subr.bf16.mxu0 %v5291_v59  ;;  %2479 = vmatprep.subr.bf16.mxu1 %v5294_v40  ;;  %6329 = vst [vmem:[#allocation47_spill] sm:$0xff] %v5303_v31  ;;  %6330 = vst [vmem:[#allocation48_spill] sm:$0xff] %v5306_v62  ;;  %v5309_v59 = vld [vmem:[#allocation6 + $0x100] ss:$16 sps:$4 sm:$0xff]   ;;  %v5312_v40 = vld [vmem:[#allocation6 + $0x108] ss:$16 sps:$4 sm:$0xff]  }
 0x743   :  { %6331 = vst [vmem:[#allocation49_spill] sm:$0xff] %v5309_v59  ;;  %6332 = vst [vmem:[#allocation50_spill] sm:$0xff] %v5312_v40 }
 0x745   :  { %2439 = vmatpush1.bf16.msra.mxu0 %v5297_v22  ;;  %2480 = vmatpush1.bf16.msra.mxu1 %v5300_v56  ;;  %v5315_v22 = vld [vmem:[#allocation6 + $0x124] ss:$16 sps:$4 sm:$0xff]   ;;  %v5318_v56 = vld [vmem:[#allocation6 + $0x12c] ss:$16 sps:$4 sm:$0xff]  }
 0x746   :  { %2440 = vmatprep.subr.bf16.mxu0 %v5303_v31  ;;  %2481 = vmatprep.subr.bf16.mxu1 %v5306_v62  ;;  %6333 = vst [vmem:[#allocation51_spill] sm:$0xff] %v5315_v22  ;;  %6334 = vst [vmem:[#allocation52_spill] sm:$0xff] %v5318_v56  ;;  %v5321_v31 = vld [vmem:[#allocation6 + $0x120] ss:$16 sps:$4 sm:$0xff]   ;;  %v5324_v62 = vld [vmem:[#allocation6 + $0x128] ss:$16 sps:$4 sm:$0xff]  }
 0x747   :  { %6335 = vst [vmem:[#allocation80_spill] sm:$0xff] %v5321_v31  ;;  %6336 = vst [vmem:[#allocation81_spill] sm:$0xff] %v5324_v62 }
 0x749   :  { %2441 = vmatpush1.bf16.msra.mxu0 %v5309_v59  ;;  %2482 = vmatpush1.bf16.msra.mxu1 %v5312_v40  ;;  %v5327_v59 = vld [vmem:[#allocation6 + $0x144] ss:$16 sps:$4 sm:$0xff]   ;;  %v5330_v40 = vld [vmem:[#allocation6 + $0x14c] ss:$16 sps:$4 sm:$0xff]  }
 0x74a   :  { %2442 = vmatprep.subr.bf16.mxu0 %v5315_v22  ;;  %2483 = vmatprep.subr.bf16.mxu1 %v5318_v56  ;;  %6337 = vst [vmem:[#allocation82_spill] sm:$0xff] %v5327_v59  ;;  %6338 = vst [vmem:[#allocation83_spill] sm:$0xff] %v5330_v40  ;;  %v5333_v22 = vld [vmem:[#allocation6 + $0x140] ss:$16 sps:$4 sm:$0xff]   ;;  %v5336_v56 = vld [vmem:[#allocation6 + $0x148] ss:$16 sps:$4 sm:$0xff]  }
 0x74b   :  { %6339 = vst [vmem:[#allocation53_spill] sm:$0xff] %v5333_v22  ;;  %6340 = vst [vmem:[#allocation54_spill] sm:$0xff] %v5336_v56 }
 0x74d   :  { %2443 = vmatpush1.bf16.msra.mxu0 %v5321_v31  ;;  %2484 = vmatpush1.bf16.msra.mxu1 %v5324_v62  ;;  %v5339_v31 = vld [vmem:[#allocation6 + $0x164] ss:$16 sps:$4 sm:$0xff]   ;;  %v5342_v62 = vld [vmem:[#allocation6 + $0x16c] ss:$16 sps:$4 sm:$0xff]  }
 0x74e   :  { %2444 = vmatprep.subr.bf16.mxu0 %v5327_v59  ;;  %2485 = vmatprep.subr.bf16.mxu1 %v5330_v40  ;;  %6341 = vst [vmem:[#allocation55_spill] sm:$0xff] %v5339_v31  ;;  %6342 = vst [vmem:[#allocation56_spill] sm:$0xff] %v5342_v62  ;;  %v5345_v59 = vld [vmem:[#allocation6 + $0x160] ss:$16 sps:$4 sm:$0xff]   ;;  %v5348_v40 = vld [vmem:[#allocation6 + $0x168] ss:$16 sps:$4 sm:$0xff]  }
 0x74f   :  { %6343 = vst [vmem:[#allocation57_spill] sm:$0xff] %v5345_v59  ;;  %6344 = vst [vmem:[#allocation58_spill] sm:$0xff] %v5348_v40 }
 0x751   :  { %2445 = vmatpush1.bf16.msra.mxu0 %v5333_v22  ;;  %2486 = vmatpush1.bf16.msra.mxu1 %v5336_v56  ;;  %v5351_v22 = vld [vmem:[#allocation6 + $0x184] ss:$16 sps:$4 sm:$0xff]   ;;  %v5354_v56 = vld [vmem:[#allocation6 + $0x18c] ss:$16 sps:$4 sm:$0xff]  }
 0x752   :  { %2446 = vmatprep.subr.bf16.mxu0 %v5339_v31  ;;  %2487 = vmatprep.subr.bf16.mxu1 %v5342_v62  ;;  %6345 = vst [vmem:[#allocation59_spill] sm:$0xff] %v5351_v22  ;;  %6346 = vst [vmem:[#allocation60_spill] sm:$0xff] %v5354_v56  ;;  %v5357_v31 = vld [vmem:[#allocation6 + $0x180] ss:$16 sps:$4 sm:$0xff]   ;;  %v5360_v62 = vld [vmem:[#allocation6 + $0x188] ss:$16 sps:$4 sm:$0xff]  }
 0x753   :  { %6347 = vst [vmem:[#allocation61_spill] sm:$0xff] %v5357_v31  ;;  %6348 = vst [vmem:[#allocation62_spill] sm:$0xff] %v5360_v62 }
 0x755   :  { %2447 = vmatpush1.bf16.msra.mxu0 %v5345_v59  ;;  %2488 = vmatpush1.bf16.msra.mxu1 %v5348_v40  ;;  %v5363_v59 = vld [vmem:[#allocation6 + $0x1a4] ss:$16 sps:$4 sm:$0xff]   ;;  %v5366_v40 = vld [vmem:[#allocation6 + $0x1ac] ss:$16 sps:$4 sm:$0xff]  }
 0x756   :  { %2448 = vmatprep.subr.bf16.mxu0 %v5351_v22  ;;  %2489 = vmatprep.subr.bf16.mxu1 %v5354_v56  ;;  %6349 = vst [vmem:[#allocation63_spill] sm:$0xff] %v5363_v59  ;;  %6350 = vst [vmem:[#allocation64_spill] sm:$0xff] %v5366_v40  ;;  %v5369_v22 = vld [vmem:[#allocation6 + $0x1a0] ss:$16 sps:$4 sm:$0xff]   ;;  %v5372_v56 = vld [vmem:[#allocation6 + $0x1a8] ss:$16 sps:$4 sm:$0xff]  }
 0x757   :  { %6351 = vst [vmem:[#allocation65_spill] sm:$0xff] %v5369_v22  ;;  %6352 = vst [vmem:[#allocation66_spill] sm:$0xff] %v5372_v56 }
 0x759   :  { %2449 = vmatpush1.bf16.msra.mxu0 %v5357_v31  ;;  %2490 = vmatpush1.bf16.msra.mxu1 %v5360_v62  ;;  %v5375_v31 = vld [vmem:[#allocation6 + $0x1c4] ss:$16 sps:$4 sm:$0xff]   ;;  %v5378_v62 = vld [vmem:[#allocation6 + $0x1cc] ss:$16 sps:$4 sm:$0xff]  }
 0x75a   :  { %2450 = vmatprep.subr.bf16.mxu0 %v5363_v59  ;;  %2491 = vmatprep.subr.bf16.mxu1 %v5366_v40  ;;  %6353 = vst [vmem:[#allocation12_spill] sm:$0xff] %v5375_v31  ;;  %6354 = vst [vmem:[#allocation13_spill] sm:$0xff] %v5378_v62  ;;  %v5381_v59 = vld [vmem:[#allocation6 + $0x1c0] ss:$16 sps:$4 sm:$0xff]   ;;  %v5384_v40 = vld [vmem:[#allocation6 + $0x1c8] ss:$16 sps:$4 sm:$0xff]  }
 0x75b   :  { %6355 = vst [vmem:[#allocation18_spill] sm:$0xff] %v5381_v59  ;;  %6356 = vst [vmem:[#allocation72_spill] sm:$0xff] %v5384_v40 }
 0x75d   :  { %2451 = vmatpush1.bf16.msra.mxu0 %v5369_v22  ;;  %2492 = vmatpush1.bf16.msra.mxu1 %v5372_v56  ;;  %v5387_v22 = vld [vmem:[#allocation6 + $0x1e4] ss:$16 sps:$4 sm:$0xff]   ;;  %v5390_v56 = vld [vmem:[#allocation6 + $0x1ec] ss:$16 sps:$4 sm:$0xff]  }
 0x75e   :  { %2452 = vmatprep.subr.bf16.mxu0 %v5375_v31  ;;  %2493 = vmatprep.subr.bf16.mxu1 %v5378_v62  ;;  %6357 = vst [vmem:[#allocation73_spill] sm:$0xff] %v5387_v22  ;;  %6358 = vst [vmem:[#allocation74_spill] sm:$0xff] %v5390_v56  ;;  %v5393_v31 = vld [vmem:[#allocation6 + $0x1e0] ss:$16 sps:$4 sm:$0xff]   ;;  %v5396_v62 = vld [vmem:[#allocation6 + $0x1e8] ss:$16 sps:$4 sm:$0xff]  }
 0x75f   :  { %6359 = vst [vmem:[#allocation75_spill] sm:$0xff] %v5393_v31  ;;  %6360 = vst [vmem:[#allocation19_spill] sm:$0xff] %v5396_v62 }
 0x761   :  { %2453 = vmatpush1.bf16.msra.mxu0 %v5381_v59  ;;  %2494 = vmatpush1.bf16.msra.mxu1 %v5384_v40 }
 0x762   :  { %2454 = vmatprep.subr.bf16.mxu0 %v5387_v22  ;;  %2495 = vmatprep.subr.bf16.mxu1 %v5390_v56 }
 0x765   :  { %2455 = vmatpush1.bf16.msra.mxu0 %v5393_v31  ;;  %2496 = vmatpush1.bf16.msra.mxu1 %v5396_v62 }
 0x766   :  { %2537 = vmatprep.subr.bf16.mxu0 %v6287_v12  ;;  %2578 = vmatprep.subr.bf16.mxu1 %v6288_v8 }
 0x7db   :  { %v2233_v40 = vpop.f32.mrb[60].mxu0  ;;  %v2274_v59 = vpop.f32.mrb[60].mxu1 }
 0x7dc   :  { %v2234_v22 = vadd.f32 %v2233_v40, %v6289_v3  ;;  %v2235_v9 = vpop.f32.mrb[61].mxu0  ;;  %v2276_v1 = vpop.f32.mrb[61].mxu1  ;;  %v2275_v8 = vadd.f32 %v2274_v59, %v6292_v44  ;;  %v6361_v59 = vld [vmem:[#allocation88_spill] sm:$0xff]  ;;  %v6364_v44 = vld [vmem:[#allocation91_spill] sm:$0xff] }
 0x7dd   :  { %v2236_v56 = vadd.f32 %v2235_v9, %v6290_v61  ;;  %v2237_v51 = vpop.f32.mrb[62].mxu0  ;;  %v2278_v50 = vpop.f32.mrb[62].mxu1  ;;  %v2277_v12 = vadd.f32 %v2276_v1, %v6291_v25 }
 0x7de   :  { %v3043_v48 = vmul.f32 -1.442695, %v2234_v22  ;;  %v2238_v31 = vpop.f32.mrb[63].mxu0  ;;  %v2279_v47 = vpop.f32.mrb[63].mxu1 }
 0x7df   :  { %v3044_v6 = vmul.f32 -1.442695, %v2236_v56  ;;  %v3045_v62 = vmul.f32 -1.442695, %v2277_v12 }
 0x7e0   :  { %3449 = vpow2.f32 %v3043_v48 }
 0x7e1   :  { %3451 = vpow2.f32 %v3044_v6 }
 0x7e2   :  { %3453 = vpow2.f32 %v3045_v62  ;;  %v6362_v62 = vld [vmem:[#allocation89_spill] sm:$0xff] }
 0x7e3   :  { %3455 = vtanh.f32 %v2275_v8 }
 0x7ea   :  { %v3450_v46 = vpop.eup %3449 }
 0x7eb   :  { %v3452_v45 = vpop.eup %3451  ;;  %v2284_v40 = vadd.f32 1.0, %v3450_v46 }
 0x7ec   :  { %v2290_v3 = vadd.f32 1.0, %v3452_v45  ;;  %v3454_v50 = vpop.eup %3453 }
 0x7ed   :  { %3457 = vrcp.f32 %v2284_v40  ;;  %v3456_v51 = vpop.eup %3455  ;;  %v2297_v48 = vadd.f32 1.0, %v3454_v50 }
 0x7ee   :  { %3459 = vrcp.f32 %v2290_v3  ;;  %v6363_v3 = vld [vmem:[#allocation90_spill] sm:$0xff] }
 0x7ef   :  { %3461 = vrcp.f32 %v2297_v48 }
 0x7f7   :  { %v3458_v9 = vpop.eup %3457 }
 0x7f8   :  { %v3460_v47 = vpop.eup %3459  ;;  %v2301_v56 = vmul.f32 %v3458_v9, %v3456_v51 }
 0x7f9   :  { %v2300_v6 = vmul.f32 %v3460_v47, %v5164_v5 }
 0x7fb   :  { %v2346_v1 = vpop.f32.mrb[64].mxu0  ;;  %v2387_v31 = vpop.f32.mrb[64].mxu1  ;;  %v5406_v22 = vadd.f32 %v2301_v56, %v2300_v6 }
 0x7fc   :  { %v2394_v46 = vadd.f32 %v2346_v1, %v6361_v59  ;;  %v2396_v12 = vadd.f32 %v2387_v31, %v6362_v62  ;;  %v2348_v45 = vpop.f32.mrb[65].mxu0  ;;  %v2389_v8 = vpop.f32.mrb[65].mxu1 }
 0x7fd   :  { %v2395_v40 = vadd.f32 %v2348_v45, %v6363_v3  ;;  %v2397_v25 = vadd.f32 %v2389_v8, %v6364_v44  ;;  %v2350_v61 = vpop.f32.mrb[66].mxu0  ;;  %v2391_v51 = vpop.f32.mrb[66].mxu1  ;;  %3463 = vtanh.f32 %v5406_v22 }
 0x7fe   :  { %v3046_v5 = vmul.f32 -1.442695, %v2394_v46  ;;  %v2351_v50 = vpop.f32.mrb[67].mxu0  ;;  %v2392_v9 = vpop.f32.mrb[67].mxu1 }
 0x7ff   :  { %v3047_v47 = vmul.f32 -1.442695, %v2395_v40  ;;  %v3462_v56 = vpop.eup %3461  ;;  %v3048_v6 = vmul.f32 -1.442695, %v2397_v25 }
 0x800   :  { %3465 = vpow2.f32 %v3046_v5 }
 0x801   :  { %3467 = vpow2.f32 %v3047_v47 }
 0x802   :  { %3469 = vpow2.f32 %v3048_v6  ;;  %v6409_v6 = vld [vmem:[#allocation65_spill] sm:$0xff] }
 0x803   :  { %3471 = vtanh.f32 %v2396_v12 }
 0x807   :  { %v3464_v48 = vpop.eup %3463 }
 0x808   :  { %v2304_v1 = vmul.f32 %v3464_v48, %v3462_v56  ;;  %v6407_v56 = vld [vmem:[#allocation63_spill] sm:$0xff]  ;;  %v6408_v48 = vld [vmem:[#allocation64_spill] sm:$0xff] }
 0x80a   :  { %v3466_v31 = vpop.eup %3465  ;;  %v2423_v59 = vpack.c.bf16 %v2304_v1, %v2304_v1  ;;  %v6410_v1 = vld [vmem:[#allocation66_spill] sm:$0xff] }
 0x80b   :  { %v3468_v62 = vpop.eup %3467  ;;  %v2401_v45 = vadd.f32 1.0, %v3466_v31  ;;  %v6411_v31 = vld [vmem:[#allocation12_spill] sm:$0xff] }
 0x80c   :  { %v2407_v61 = vadd.f32 1.0, %v3468_v62  ;;  %2456 = vmatprep.mubr.bf16.mxu0 %v2423_v59  ;;  %2497 = vmatprep.mubr.bf16.mxu1 %v2423_v59  ;;  %v3470_v44 = vpop.eup %3469  ;;  %v6412_v59 = vld [vmem:[#allocation13_spill] sm:$0xff]  ;;  %v6413_v62 = vld [vmem:[#allocation18_spill] sm:$0xff] }
 0x80d   :  { %3473 = vrcp.f32 %v2401_v45  ;;  %v3472_v46 = vpop.eup %3471  ;;  %v2414_v51 = vadd.f32 1.0, %v3470_v44  ;;  %v6414_v45 = vld [vmem:[#allocation72_spill] sm:$0xff]  ;;  %v6416_v44 = vld [vmem:[#allocation74_spill] sm:$0xff] }
 0x80e   :  { %3475 = vrcp.f32 %v2407_v61  ;;  %v6415_v61 = vld [vmem:[#allocation73_spill] sm:$0xff] }
 0x80f   :  { %3477 = vrcp.f32 %v2414_v51  ;;  %v6419_v51 = vld [vmem:[#allocation14_spill] sm:$0xff] }
 0x817   :  { %v3474_v8 = vpop.eup %3473 }
 0x818   :  { %v3476_v3 = vpop.eup %3475  ;;  %v2418_v40 = vmul.f32 %v3474_v8, %v3472_v46  ;;  %v6417_v46 = vld [vmem:[#allocation75_spill] sm:$0xff] }
 0x819   :  { %v2417_v25 = vmul.f32 %v3476_v3, %v5172_v58  ;;  %v3478_v50 = vpop.eup %3477  ;;  %v6386_v58 = vld [vmem:[#allocation46_spill] sm:$0xff]  ;;  %v6418_v8 = vld [vmem:[#allocation19_spill] sm:$0xff] }
 0x81b   :  { %v5414_v5 = vadd.f32 %v2418_v40, %v2417_v25 }
 0x81d   :  { %3479 = vtanh.f32 %v5414_v5 }
 0x827   :  { %v3480_v12 = vpop.eup %3479 }
 0x828   :  { %v2421_v9 = vmul.f32 %v3480_v12, %v3478_v50 }
 0x82a   :  { %v2422_v47 = vpack.c.bf16 %v2421_v9, %v2421_v9  ;;  %v6420_v9 = vld [vmem:[#allocation15_spill] sm:$0xff] }
 0x82c   :  { %2457 = vmatmul.mubr.bf16.vlgmr.msra.gmra.mrb[68].mxu0 %v2422_v47  ;;  %2498 = vmatmul.mubr.bf16.vlgmr.msra.gmra.mrb[68].mxu1 %v2422_v47 }
 0x82d   :  { %2538 = vmatpush1.bf16.msra.mxu0 %v4999_v49  ;;  %2579 = vmatpush1.bf16.msra.mxu1 %v5002_v23  ;;  %v6366_v49 = vld [vmem:[#allocation31_spill] sm:$0xff]  ;;  %v6367_v23 = vld [vmem:[#allocation32_spill] sm:$0xff] }
 0x82e   :  { %2539 = vmatprep.subr.bf16.mxu0 %v5005_v24  ;;  %2580 = vmatprep.subr.bf16.mxu1 %v5008_v20  ;;  %v6368_v24 = vld [vmem:[#allocation33_spill] sm:$0xff]  ;;  %v6369_v20 = vld [vmem:[#allocation34_spill] sm:$0xff] }
 0x82f   :  { %2569 = vmatprep.mubr.bf16.mxu0 %v6006_v60  ;;  %2610 = vmatprep.mubr.bf16.mxu1 %v6006_v60  ;;  %v6365_v60 = vld [vmem:[#allocation30_spill] sm:$0xff] }
 0x831   :  { %2540 = vmatpush1.bf16.msra.mxu0 %v5013_v26  ;;  %2581 = vmatpush1.bf16.msra.mxu1 %v5016_v17  ;;  %v6370_v26 = vld [vmem:[#allocation35_spill] sm:$0xff]  ;;  %v6371_v17 = vld [vmem:[#allocation36_spill] sm:$0xff] }
 0x832   :  { %2541 = vmatprep.subr.bf16.mxu0 %v5019_v30  ;;  %2582 = vmatprep.subr.bf16.mxu1 %v5022_v54  ;;  %v6372_v30 = vld [vmem:[#allocation37_spill] sm:$0xff]  ;;  %v6373_v54 = vld [vmem:[#allocation38_spill] sm:$0xff] }
 0x835   :  { %2542 = vmatpush1.bf16.msra.mxu0 %v5025_v41  ;;  %2583 = vmatpush1.bf16.msra.mxu1 %v5028_v39  ;;  %v6374_v41 = vld [vmem:[#allocation39_spill] sm:$0xff]  ;;  %v6375_v39 = vld [vmem:[#allocation40_spill] sm:$0xff] }
 0x836   :  { %2543 = vmatprep.subr.bf16.mxu0 %v5031_v16  ;;  %2584 = vmatprep.subr.bf16.mxu1 %v5034_v19  ;;  %v6376_v16 = vld [vmem:[#allocation41_spill] sm:$0xff]  ;;  %v6377_v19 = vld [vmem:[#allocation42_spill] sm:$0xff] }
 0x839   :  { %2544 = vmatpush1.bf16.msra.mxu0 %v5037_v55  ;;  %2585 = vmatpush1.bf16.msra.mxu1 %v5040_v57  ;;  %v6378_v55 = vld [vmem:[#allocation67_spill] sm:$0xff]  ;;  %v6379_v57 = vld [vmem:[#allocation68_spill] sm:$0xff] }
 0x83a   :  { %2545 = vmatprep.subr.bf16.mxu0 %v6297_v27  ;;  %2586 = vmatprep.subr.bf16.mxu1 %v6298_v0  ;;  %v6387_v27 = vld [vmem:[#allocation47_spill] sm:$0xff]  ;;  %v6388_v0 = vld [vmem:[#allocation48_spill] sm:$0xff] }
 0x83d   :  { %2546 = vmatpush1.bf16.msra.mxu0 %v6299_v11  ;;  %2587 = vmatpush1.bf16.msra.mxu1 %v6300_v10  ;;  %v6389_v11 = vld [vmem:[#allocation49_spill] sm:$0xff]  ;;  %v6390_v10 = vld [vmem:[#allocation50_spill] sm:$0xff] }
 0x83e   :  { %2547 = vmatprep.subr.bf16.mxu0 %v6301_v13  ;;  %2588 = vmatprep.subr.bf16.mxu1 %v6302_v4  ;;  %v6391_v13 = vld [vmem:[#allocation51_spill] sm:$0xff]  ;;  %v6392_v4 = vld [vmem:[#allocation52_spill] sm:$0xff] }
 0x841   :  { %2548 = vmatpush1.bf16.msra.mxu0 %v6303_v63  ;;  %2589 = vmatpush1.bf16.msra.mxu1 %v6304_v7  ;;  %v6393_v63 = vld [vmem:[#allocation80_spill] sm:$0xff]  ;;  %v6394_v7 = vld [vmem:[#allocation81_spill] sm:$0xff] }
 0x842   :  { %2549 = vmatprep.subr.bf16.mxu0 %v6305_v2  ;;  %2590 = vmatprep.subr.bf16.mxu1 %v6306_v21  ;;  %v6395_v2 = vld [vmem:[#allocation82_spill] sm:$0xff]  ;;  %v6396_v21 = vld [vmem:[#allocation83_spill] sm:$0xff] }
 0x845   :  { %2550 = vmatpush1.bf16.msra.mxu0 %v5073_v14  ;;  %2591 = vmatpush1.bf16.msra.mxu1 %v5076_v32  ;;  %v6384_v14 = vld [vmem:[#allocation44_spill] sm:$0xff]  ;;  %v6385_v32 = vld [vmem:[#allocation45_spill] sm:$0xff] }
 0x846   :  { %2551 = vmatprep.subr.bf16.mxu0 %v5079_v15  ;;  %2592 = vmatprep.subr.bf16.mxu1 %v5082_v53  ;;  %v6380_v15 = vld [vmem:[#allocation69_spill] sm:$0xff]  ;;  %v6381_v53 = vld [vmem:[#allocation70_spill] sm:$0xff] }
 0x849   :  { %2552 = vmatpush1.bf16.msra.mxu0 %v5085_v35  ;;  %2593 = vmatpush1.bf16.msra.mxu1 %v5088_v52  ;;  %v6382_v35 = vld [vmem:[#allocation71_spill] sm:$0xff] }
 0x84a   :  { %2649 = vmatprep.subr.bf16.mxu0 %v5207_v28  ;;  %2690 = vmatprep.subr.bf16.mxu1 %v5210_v18  ;;  %v6383_v52 = vld [vmem:[#allocation43_spill] sm:$0xff]  ;;  %v6397_v28 = vld [vmem:[#allocation53_spill] sm:$0xff]  ;;  %v6398_v18 = vld [vmem:[#allocation54_spill] sm:$0xff] }
 0x84c   :  { %2570 = vmatmul.mubr.bf16.vlgmr.msra.gmra.mrb[72].mxu0 %v2422_v47  ;;  %2611 = vmatmul.mubr.bf16.vlgmr.msra.gmra.mrb[72].mxu1 %v2422_v47 }
 0x84d   :  { %2650 = vmatpush1.bf16.msra.mxu0 %v5213_v29  ;;  %2691 = vmatpush1.bf16.msra.mxu1 %v5216_v33  ;;  %v6399_v29 = vld [vmem:[#allocation55_spill] sm:$0xff]  ;;  %v6400_v33 = vld [vmem:[#allocation56_spill] sm:$0xff] }
 0x84e   :  { %2651 = vmatprep.subr.bf16.mxu0 %v5219_v34  ;;  %2692 = vmatprep.subr.bf16.mxu1 %v5222_v36  ;;  %v6401_v34 = vld [vmem:[#allocation57_spill] sm:$0xff]  ;;  %v6402_v36 = vld [vmem:[#allocation58_spill] sm:$0xff] }
 0x851   :  { %2652 = vmatpush1.bf16.msra.mxu0 %v5225_v37  ;;  %2693 = vmatpush1.bf16.msra.mxu1 %v5228_v38  ;;  %v6403_v37 = vld [vmem:[#allocation59_spill] sm:$0xff]  ;;  %v6404_v38 = vld [vmem:[#allocation60_spill] sm:$0xff] }
 0x852   :  { %2653 = vmatprep.subr.bf16.mxu0 %v5231_v42  ;;  %2694 = vmatprep.subr.bf16.mxu1 %v5234_v43  ;;  %v6405_v42 = vld [vmem:[#allocation61_spill] sm:$0xff]  ;;  %v6406_v43 = vld [vmem:[#allocation62_spill] sm:$0xff] }
 0x855   :  { %2654 = vmatpush1.bf16.msra.mxu0 %v6365_v60  ;;  %2695 = vmatpush1.bf16.msra.mxu1 %v6366_v49 }
 0x856   :  { %2655 = vmatprep.subr.bf16.mxu0 %v6367_v23  ;;  %2696 = vmatprep.subr.bf16.mxu1 %v6368_v24 }
 0x859   :  { %2656 = vmatpush1.bf16.msra.mxu0 %v6369_v20  ;;  %2697 = vmatpush1.bf16.msra.mxu1 %v6370_v26 }
 0x85a   :  { %2657 = vmatprep.subr.bf16.mxu0 %v6371_v17  ;;  %2698 = vmatprep.subr.bf16.mxu1 %v6372_v30  ;;  %v6421_v17 = vld [vmem:[#allocation16_spill] sm:$0xff] }
 0x85d   :  { %2658 = vmatpush1.bf16.msra.mxu0 %v6373_v54  ;;  %2699 = vmatpush1.bf16.msra.mxu1 %v6374_v41  ;;  %v6422_v41 = vld [vmem:[#allocation17_spill] sm:$0xff] }
 0x85e   :  { %2659 = vmatprep.subr.bf16.mxu0 %v6375_v39  ;;  %2700 = vmatprep.subr.bf16.mxu1 %v6376_v16 }
 0x861   :  { %2660 = vmatpush1.bf16.msra.mxu0 %v6377_v19  ;;  %2701 = vmatpush1.bf16.msra.mxu1 %v6378_v55 }
 0x862   :  { %2661 = vmatprep.subr.bf16.mxu0 %v6379_v57  ;;  %2702 = vmatprep.subr.bf16.mxu1 %v6380_v15 }
 0x865   :  { %2662 = vmatpush1.bf16.msra.mxu0 %v6381_v53  ;;  %2703 = vmatpush1.bf16.msra.mxu1 %v6382_v35 }
 0x866   :  { %2663 = vmatprep.subr.bf16.mxu0 %v6383_v52  ;;  %2704 = vmatprep.subr.bf16.mxu1 %v6384_v14 }
 0x869   :  { %2664 = vmatpush1.bf16.msra.mxu0 %v6385_v32  ;;  %2705 = vmatpush1.bf16.msra.mxu1 %v6386_v58 }
 0x86a   :  { %2665 = vmatprep.subr.bf16.mxu0 %v6387_v27  ;;  %2706 = vmatprep.subr.bf16.mxu1 %v6388_v0 }
 0x86d   :  { %2666 = vmatpush1.bf16.msra.mxu0 %v6389_v11  ;;  %2707 = vmatpush1.bf16.msra.mxu1 %v6390_v10  ;;  %v6423_v10 = vld [vmem:[#allocation92_spill] sm:$0xff] }
 0x86e   :  { %2667 = vmatprep.subr.bf16.mxu0 %v6391_v13  ;;  %2708 = vmatprep.subr.bf16.mxu1 %v6392_v4  ;;  %v6424_v4 = vld [vmem:[#allocation93_spill] sm:$0xff] }
 0x871   :  { %2668 = vmatpush1.bf16.msra.mxu0 %v6393_v63  ;;  %2709 = vmatpush1.bf16.msra.mxu1 %v6394_v7 }
 0x872   :  { %2669 = vmatprep.subr.bf16.mxu0 %v6395_v2  ;;  %2710 = vmatprep.subr.bf16.mxu1 %v6396_v21  ;;  %v6425_v21 = vld [vmem:[#allocation94_spill] sm:$0xff] }
 0x875   :  { %2670 = vmatpush1.bf16.msra.mxu0 %v6397_v28  ;;  %2711 = vmatpush1.bf16.msra.mxu1 %v6398_v18  ;;  %v6426_v18 = vld [vmem:[#allocation95_spill] sm:$0xff] }
 0x876   :  { %2671 = vmatprep.subr.bf16.mxu0 %v6399_v29  ;;  %2712 = vmatprep.subr.bf16.mxu1 %v6400_v33 }
 0x879   :  { %2672 = vmatpush1.bf16.msra.mxu0 %v6401_v34  ;;  %2713 = vmatpush1.bf16.msra.mxu1 %v6402_v36 }
 0x87a   :  { %2673 = vmatprep.subr.bf16.mxu0 %v6403_v37  ;;  %2714 = vmatprep.subr.bf16.mxu1 %v6404_v38 }
 0x87d   :  { %2674 = vmatpush1.bf16.msra.mxu0 %v6405_v42  ;;  %2715 = vmatpush1.bf16.msra.mxu1 %v6406_v43 }
 0x87e   :  { %2675 = vmatprep.subr.bf16.mxu0 %v6407_v56  ;;  %2716 = vmatprep.subr.bf16.mxu1 %v6408_v48 }
 0x881   :  { %2676 = vmatpush1.bf16.msra.mxu0 %v6409_v6  ;;  %2717 = vmatpush1.bf16.msra.mxu1 %v6410_v1 }
 0x882   :  { %2677 = vmatprep.subr.bf16.mxu0 %v6411_v31  ;;  %2718 = vmatprep.subr.bf16.mxu1 %v6412_v59 }
 0x885   :  { %2678 = vmatpush1.bf16.msra.mxu0 %v6413_v62  ;;  %2719 = vmatpush1.bf16.msra.mxu1 %v6414_v45 }
 0x886   :  { %2679 = vmatprep.subr.bf16.mxu0 %v6415_v61  ;;  %2720 = vmatprep.subr.bf16.mxu1 %v6416_v44 }
 0x889   :  { %2680 = vmatpush1.bf16.msra.mxu0 %v6417_v46  ;;  %2721 = vmatpush1.bf16.msra.mxu1 %v6418_v8 }
 0x8ff   :  { %v2458_v3 = vpop.f32.mrb[68].mxu0  ;;  %v2499_v40 = vpop.f32.mrb[68].mxu1 }
 0x900   :  { %v2459_v25 = vadd.f32 %v2458_v3, %v6419_v51  ;;  %v2460_v50 = vpop.f32.mrb[69].mxu0  ;;  %v2501_v12 = vpop.f32.mrb[69].mxu1  ;;  %v2500_v39 = vadd.f32 %v2499_v40, %v6422_v41 }
 0x901   :  { %v2461_v47 = vadd.f32 %v2460_v50, %v6420_v9  ;;  %v2462_v60 = vpop.f32.mrb[70].mxu0  ;;  %v2503_v49 = vpop.f32.mrb[70].mxu1  ;;  %v2502_v30 = vadd.f32 %v2501_v12, %v6421_v17 }
 0x902   :  { %v3049_v23 = vmul.f32 -1.442695, %v2459_v25  ;;  %v2463_v24 = vpop.f32.mrb[71].mxu0  ;;  %v2504_v20 = vpop.f32.mrb[71].mxu1  ;;  %v3265_v49 = vld [vmem:[%s5576_s6] sm:$0xff]  }
 0x903   :  { %v3050_v26 = vmul.f32 -1.442695, %v2461_v47  ;;  %v3051_v54 = vmul.f32 -1.442695, %v2502_v30  ;;  %v3267_v24 = vld [vmem:[%s5576_s6 + $0x10] sm:$0xff]   ;;  %v3268_v20 = vld [vmem:[%s5576_s6 + $0x18] sm:$0xff]  }
 0x904   :  { %3481 = vpow2.f32 %v3049_v23  ;;  %v3799_v23 = vmov 0.0   ;;  %v3270_v30 = vld [vmem:[%s5576_s6 + $0x28] sm:$0xff]  }
 0x905   :  { %3483 = vpow2.f32 %v3050_v26  ;;  %3076 = vmatprep.subr.bf16.mxu0 %v3799_v23  ;;  %v3269_v26 = vld [vmem:[%s5576_s6 + $0x20] sm:$0xff]  }
 0x906   :  { %3485 = vpow2.f32 %v3051_v54  ;;  %v3271_v54 = vld [vmem:[%s5576_s6 + $0x30] sm:$0xff]  }
 0x907   :  { %3487 = vtanh.f32 %v2500_v39  ;;  %v3272_v39 = vld [vmem:[%s5576_s6 + $0x38] sm:$0xff]  }
 0x90e   :  { %v3482_v16 = vpop.eup %3481 }
 0x90f   :  { %v3484_v19 = vpop.eup %3483  ;;  %v2509_v55 = vadd.f32 1.0, %v3482_v16 }
 0x910   :  { %v2515_v57 = vadd.f32 1.0, %v3484_v19  ;;  %v3486_v15 = vpop.eup %3485 }
 0x911   :  { %3489 = vrcp.f32 %v2509_v55  ;;  %v3488_v53 = vpop.eup %3487  ;;  %v2522_v32 = vadd.f32 1.0, %v3486_v15 }
 0x912   :  { %3491 = vrcp.f32 %v2515_v57 }
 0x913   :  { %3493 = vrcp.f32 %v2522_v32 }
 0x91b   :  { %v3490_v35 = vpop.eup %3489 }
 0x91c   :  { %v3492_v52 = vpop.eup %3491  ;;  %v2526_v14 = vmul.f32 %v3490_v35, %v3488_v53 }
 0x91d   :  { %v2525_v58 = vmul.f32 %v3492_v52, %v5406_v22  ;;  %v3494_v42 = vpop.eup %3493 }
 0x91f   :  { %v2571_v27 = vpop.f32.mrb[72].mxu0  ;;  %v2612_v0 = vpop.f32.mrb[72].mxu1  ;;  %v5518_v11 = vadd.f32 %v2526_v14, %v2525_v58 }
 0x920   :  { %v2619_v13 = vadd.f32 %v2571_v27, %v6423_v10  ;;  %v2621_v63 = vadd.f32 %v2612_v0, %v6424_v4  ;;  %v2573_v7 = vpop.f32.mrb[73].mxu0  ;;  %v2614_v2 = vpop.f32.mrb[73].mxu1 }
 0x921   :  { %v2620_v28 = vadd.f32 %v2573_v7, %v6425_v21  ;;  %v2622_v29 = vadd.f32 %v2614_v2, %v6426_v18  ;;  %v2575_v33 = vpop.f32.mrb[74].mxu0  ;;  %v2616_v34 = vpop.f32.mrb[74].mxu1  ;;  %3495 = vtanh.f32 %v5518_v11 }
 0x922   :  { %v3052_v22 = vmul.f32 -1.442695, %v2619_v13  ;;  %v2576_v36 = vpop.f32.mrb[75].mxu0  ;;  %v2617_v37 = vpop.f32.mrb[75].mxu1 }
 0x923   :  { %v3053_v38 = vmul.f32 -1.442695, %v2620_v28  ;;  %v3054_v56 = vmul.f32 -1.442695, %v2622_v29  ;;  %v3058_v37 = vld [vmem:[%s5577_s7] ss:$0 sm:$0xff] }
 0x924   :  { %3497 = vpow2.f32 %v3052_v22 }
 0x925   :  { %3499 = vpow2.f32 %v3053_v38 }
 0x926   :  { %3501 = vpow2.f32 %v3054_v56 }
 0x927   :  { %3503 = vtanh.f32 %v2621_v63 }
 0x92b   :  { %v3496_v43 = vpop.eup %3495 }
 0x92c   :  { %v2529_v48 = vmul.f32 %v3496_v43, %v3494_v42 }
 0x92e   :  { %v3498_v6 = vpop.eup %3497  ;;  %v2648_v1 = vpack.c.bf16 %v2529_v48, %v2529_v48 }
 0x92f   :  { %v3500_v31 = vpop.eup %3499  ;;  %v2626_v59 = vadd.f32 1.0, %v3498_v6 }
 0x930   :  { %v2632_v62 = vadd.f32 1.0, %v3500_v31  ;;  %2681 = vmatprep.mubr.bf16.mxu0 %v2648_v1  ;;  %2722 = vmatprep.mubr.bf16.mxu1 %v2648_v1  ;;  %v3502_v45 = vpop.eup %3501 }
 0x931   :  { %3505 = vrcp.f32 %v2626_v59  ;;  %v3504_v61 = vpop.eup %3503  ;;  %v2639_v3 = vadd.f32 1.0, %v3502_v45 }
 0x932   :  { %3507 = vrcp.f32 %v2632_v62 }
 0x933   :  { %3509 = vrcp.f32 %v2639_v3 }
 0x93b   :  { %v3506_v44 = vpop.eup %3505 }
 0x93c   :  { %v3508_v46 = vpop.eup %3507  ;;  %v2643_v8 = vmul.f32 %v3506_v44, %v3504_v61 }
 0x93d   :  { %v2642_v40 = vmul.f32 %v3508_v46, %v5414_v5  ;;  %v3510_v50 = vpop.eup %3509  ;;  %v3266_v5 = vld [vmem:[%s5576_s6 + $0x8] sm:$0xff]  }
 0x93f   :  { %v2644_v25 = vadd.f32 %v2643_v8, %v2642_v40 }
 0x941   :  { %3511 = vtanh.f32 %v2644_v25 }
 0x94b   :  { %v3512_v12 = vpop.eup %3511 }
 0x94c   :  { %v2646_v47 = vmul.f32 %v3512_v12, %v3510_v50 }
 0x94e   :  { %v2647_v60 = vpack.c.bf16 %v2646_v47, %v2646_v47 }
 0x950   :  { %2682 = vmatmul.mubr.bf16.vlgmr.msra.gmra.mrb[76].mxu0 %v2647_v60  ;;  %2723 = vmatmul.mubr.bf16.vlgmr.msra.gmra.mrb[76].mxu1 %v2647_v60 }
 0x951   :  { %3077 = vmatpush3.bf16.msra.mxu0 %v3265_v49  ;;  %3092 = vmatprep.mubr.msk.bf16.mxu0 %vm3800_vm2, %v3799_v23 }
 0x952   :  { %3078 = vmatprep.subr.bf16.mxu0 %v3799_v23 }
 0x955   :  { %3079 = vmatpush3.bf16.msra.mxu0 %v3266_v5 }
 0x956   :  { %3080 = vmatprep.subr.bf16.mxu0 %v3799_v23 }
 0x959   :  { %3081 = vmatpush3.bf16.msra.mxu0 %v3267_v24 }
 0x95a   :  { %3082 = vmatprep.subr.bf16.mxu0 %v3799_v23 }
 0x95d   :  { %3083 = vmatpush3.bf16.msra.mxu0 %v3268_v20 }
 0x95e   :  { %3084 = vmatprep.subr.bf16.mxu0 %v3799_v23 }
 0x961   :  { %3085 = vmatpush3.bf16.msra.mxu0 %v3269_v26 }
 0x962   :  { %3086 = vmatprep.subr.bf16.mxu0 %v3799_v23 }
 0x965   :  { %3087 = vmatpush3.bf16.msra.mxu0 %v3270_v30 }
 0x966   :  { %3088 = vmatprep.subr.bf16.mxu0 %v3799_v23 }
 0x969   :  { %3089 = vmatpush3.bf16.msra.mxu0 %v3271_v54 }
 0x96a   :  { %3090 = vmatprep.subr.bf16.mxu0 %v3799_v23 }
 0x96d   :  { %3091 = vmatpush3.bf16.msra.mxu0 %v3272_v39 }
 0xa23   :  { %v2683_v16 = vpop.f32.mrb[76].mxu0  ;;  %v2724_v19 = vpop.f32.mrb[76].mxu1 }
 0xa24   :  { %v2684_v55 = vadd.f32 %v2683_v16, %v6419_v51  ;;  %v2685_v57 = vpop.f32.mrb[77].mxu0  ;;  %v2726_v15 = vpop.f32.mrb[77].mxu1  ;;  %v2725_v13 = vadd.f32 %v2724_v19, %v6422_v41 }
 0xa25   :  { %v2686_v53 = vadd.f32 %v2685_v57, %v6420_v9  ;;  %v2687_v35 = vpop.f32.mrb[78].mxu0  ;;  %v2728_v52 = vpop.f32.mrb[78].mxu1  ;;  %v2727_v0 = vadd.f32 %v2726_v15, %v6421_v17 }
 0xa26   :  { %v3055_v14 = vmul.f32 -1.442695, %v2684_v55  ;;  %v2688_v32 = vpop.f32.mrb[79].mxu0  ;;  %v2729_v58 = vpop.f32.mrb[79].mxu1 }
 0xa27   :  { %v3056_v27 = vmul.f32 -1.442695, %v2686_v53  ;;  %v3057_v10 = vmul.f32 -1.442695, %v2727_v0 }
 0xa28   :  { %3513 = vpow2.f32 %v3055_v14 }
 0xa29   :  { %3515 = vpow2.f32 %v3056_v27 }
 0xa2a   :  { %3517 = vpow2.f32 %v3057_v10 }
 0xa2b   :  { %3519 = vtanh.f32 %v2725_v13 }
 0xa32   :  { %v3514_v4 = vpop.eup %3513 }
 0xa33   :  { %v3516_v63 = vpop.eup %3515  ;;  %v2734_v51 = vadd.f32 1.0, %v3514_v4 }
 0xa34   :  { %v2740_v7 = vadd.f32 1.0, %v3516_v63  ;;  %v3518_v9 = vpop.eup %3517 }
 0xa35   :  { %3521 = vrcp.f32 %v2734_v51  ;;  %v3520_v2 = vpop.eup %3519  ;;  %v2747_v29 = vadd.f32 1.0, %v3518_v9 }
 0xa36   :  { %3523 = vrcp.f32 %v2740_v7 }
 0xa37   :  { %3525 = vrcp.f32 %v2747_v29 }
 0xa3f   :  { %v3522_v21 = vpop.eup %3521 }
 0xa40   :  { %v3524_v28 = vpop.eup %3523  ;;  %v2751_v18 = vmul.f32 %v3522_v21, %v3520_v2 }
 0xa41   :  { %v2750_v33 = vmul.f32 %v3524_v28, %v5518_v11  ;;  %v3526_v41 = vpop.eup %3525 }
 0xa43   :  { %v2752_v17 = vadd.f32 %v2751_v18, %v2750_v33 }
 0xa45   :  { %3527 = vtanh.f32 %v2752_v17 }
 0xa4f   :  { %v3528_v34 = vpop.eup %3527 }
 0xa50   :  { %v2754_v22 = vmul.f32 %v3528_v34, %v3526_v41 }
 0xa52   :  { %v2755_v36 = vpack.c.bf16 %v2754_v22, %v2754_v22 }
 0xa54   :  { %3093 = vmatmul.mubr.bf16.vlgmr.msra.gmra.mrb[80].mxu0 %v2755_v36 }
 0xb27   :  { %v2861_v38 = vpop.f32.mrb[80].mxu0 }
 0xb28   :  { %v2862_v42 = vadd.f32 %v3058_v37, %v2861_v38  ;;  %v3094_v43 = vpop.f32.mrb[81].mxu0 }
 0xb29   :  { %v2864_v11 = vpop.f32.mrb[82].mxu0 }
 0xb2a   :  { %v3095_v56 = vpop.f32.mrb[83].mxu0  ;;  %2868 = vst.msk [vmem:[#allocation8] sm:$0xff] %vm2867_vm3, %v2862_v42 }
 0xb2b   :  { %3776 = shalt.err (!%p3773_p6)
}
 0xb2c   :  { %s3777_s7 = scalar_lea.hbm %s5578_s8, 128 }
 0xb2d   :  { %p3778_p7 = scmp.ne.s32.totalorder %s5578_s8, %s3777_s7  ;;  %p3781_p8 = scmp.lt.u32.totalorder %s3777_s7, %s5578_s8 }
 0xb2f   :  { %p3783_p9 = pnand %p3781_p8, %p3778_p7 }
 0xb31   :  { %3786 = shalt.err (!%p3783_p9)
}
 0xb32   :  { %2878 = dma.vmem_to_hbm [thread:$0]  %s2876_s1, 128, %s5578_s8, [#allocation5]  }
 0xb33   :  { %3791 = dma.done.wait [#allocation5], 128  }
 0xb34   :  { %3792 = vsyncadd [#allocation5], 4294967168 }
 0xb35   :  { %2882 = vsyncpa [#allocation4], 1 }
 0xb36   :  { %2883 = vsyncpa [#allocation7], 1 }
 0xb37   :  { %2884 = vsyncpa [#allocation5], 1 }

</bundles_post_ra>
